<compile_context>
chip_gen: v7x
topology: tpu7x:2x2x1
jax: 0.10.0
libtpu: 0.0.40
codegen_flags: <defaults>
</compile_context>

<pallas_src>
import functools
import math

import jax
import jax.numpy as jnp
import numpy as np
from jax import lax
from jax.experimental import pallas as pl
from jax.experimental.pallas import tpu as pltpu

_MXU_MIN_CHANNELS = 32  # below this, the VPU tap-FMA path beats the MXU path


def _basic_block_kernel(x_ref, w1_ref, b1_ref, w2_ref, b2_ref, m_ref, o_ref,
                        *scratch, H, W, C, B, use_mxu):
    """Fused conv1+bn1+relu -> conv2+bn2+identity+relu for B images.

    x_ref  : (B, C, H*W)   input activations (lane dim = H*W)
    w*_ref : (C, 9*C)      BN-scale-folded weights; column = (ky*3+kx)*C + ci
                           (bf16 when use_mxu else f32)
    b*_ref : (C, 1) f32    folded BN shift: beta - mean * gamma/sqrt(var+eps)
    m_ref  : (9, H*W) f32  combined row/col validity mask per 3x3 tap
    o_ref  : (B, C, H*W)   output
    scratch: [(9*C, H*W) bf16 cols] iff use_mxu
    """
    HW = H * W
    taps = [(oy, ox) for oy in (-1, 0, 1) for ox in (-1, 0, 1)]

    def shifted_tap(act, t):
        # cols_t[ci, p] = act[ci, p + oy*W + ox] where the tap is in-bounds,
        # else 0.  pltpu.roll == jnp.roll semantics: out[i] = x[(i-shift)%n],
        # so shift = -(oy*W+ox) mod HW; wrapped / row-crossing lanes are
        # exactly the masked-out ones.
        oy, ox = taps[t]
        off = oy * W + ox
        sh = act if off == 0 else pltpu.roll(act, shift=(-off) % HW, axis=1)
        return sh * m_ref[t:t + 1, :]                    # mask in f32

    def conv(act, w_ref):
        if use_mxu:
            cols_ref = scratch[0]
            for t in range(9):
                # mask (f32) then a single cast, fused into the bf16 tap store
                cols_ref[t * C:(t + 1) * C, :] = (
                    shifted_tap(act, t).astype(jnp.bfloat16))
            return jnp.dot(w_ref[...], cols_ref[...],
                           preferred_element_type=jnp.float32)
        # tiny-C path: 9*C broadcast FMAs on the VPU, all in f32 (exact).
        acc = jnp.zeros((C, HW), jnp.float32)
        for t in range(9):
            sh = shifted_tap(act, t)                     # (C, HW)
            for ci in range(C):
                k = t * C + ci
                acc = acc + w_ref[:, k:k + 1] * sh[ci:ci + 1, :]
        return acc

    for b in range(B):                                   # B images per step
        x = x_ref[b].astype(jnp.float32)                 # (C, HW) residual
        y = jnp.maximum(conv(x, w1_ref) + b1_ref[...], 0.0)
        y = conv(y, w2_ref) + b2_ref[...] + x
        o_ref[b] = jnp.maximum(y, 0.0).astype(o_ref.dtype)


def _prep_conv_bn(w_oihw, bn, eps, mxu):
    """Fold BN scale into the conv weight matrix (f32) and build the shift."""
    gamma, beta, mean, var = bn
    co, ci, kh, kw = w_oihw.shape
    scale = gamma / jnp.sqrt(var + eps)                              # (co,)
    shift = (beta - mean * scale).astype(jnp.float32).reshape(co, 1)
    w = jnp.transpose(w_oihw, (0, 2, 3, 1)).reshape(co, kh * kw * ci)
    w = w * scale[:, None]                   # fold scale BEFORE any cast
    return w.astype(jnp.bfloat16 if mxu else jnp.float32), shift


def _tap_masks(H, W):
    """(9, H*W) f32 validity masks (height + width halo) per 3x3 tap."""
    ids = np.arange(H * W)
    yy, xx = ids // W, ids % W
    rows = [((yy + oy >= 0) & (yy + oy < H) & (xx + ox >= 0) & (xx + ox < W))
            for oy in (-1, 0, 1) for ox in (-1, 0, 1)]
    return jnp.asarray(np.stack(rows).astype(np.float32))


def _pick_images_per_step(N, C, HW, budget_bytes=8 << 20):
    """Largest divisor of N whose activation blocks fit a small VMEM budget;
    for N >= 4 keep >= 2 grid steps so v7x megacore gets a fat step per TC."""
    per_img = 4 * C * HW * 4            # in + out blocks, double-buffered f32
    fit = [d for d in range(1, N + 1)
           if N % d == 0 and d * per_img <= budget_bytes] or [1]
    if N >= 4:
        fit = [d for d in fit if N // d >= 2] or [1]
    return max(fit)


@jax.jit
def basic_block_forward(x_nchw, params):
    """BasicBlock forward. Input/output NCHW (PyTorch convention), f32."""
    N, C, H, W = x_nchw.shape
    HW = H * W
    eps = 1e-5
    use_mxu = C >= _MXU_MIN_CHANNELS

    x_flat = x_nchw.reshape(N, C, HW)             # contiguous -> free reshape
    w1, b1 = _prep_conv_bn(params["w1"], params["bn1"], eps, use_mxu)
    w2, b2 = _prep_conv_bn(params["w2"], params["bn2"], eps, use_mxu)
    masks = _tap_masks(H, W)                      # trace-time constant

    B = _pick_images_per_step(N, C, HW)
    kernel = functools.partial(_basic_block_kernel, H=H, W=W, C=C, B=B,
                               use_mxu=use_mxu)

    out_flat = pl.pallas_call(
        kernel,
        out_shape=jax.ShapeDtypeStruct((N, C, HW), x_nchw.dtype),
        grid=(N // B,),
        in_specs=[
            pl.BlockSpec((B, C, HW), lambda n: (n, 0, 0)),   # x (B images)
            pl.BlockSpec((C, 9 * C), lambda n: (0, 0)),      # w1 (resident)
            pl.BlockSpec((C, 1), lambda n: (0, 0)),          # bn1 shift
            pl.BlockSpec((C, 9 * C), lambda n: (0, 0)),      # w2
            pl.BlockSpec((C, 1), lambda n: (0, 0)),          # bn2 shift
            pl.BlockSpec((9, HW), lambda n: (0, 0)),         # tap masks
        ],
        out_specs=pl.BlockSpec((B, C, HW), lambda n: (n, 0, 0)),
        scratch_shapes=(
            [pltpu.VMEM((9 * C, HW), jnp.bfloat16)] if use_mxu else []),
        compiler_params=pltpu.CompilerParams(
            dimension_semantics=("parallel",)),
    )(x_flat, w1, b1, w2, b2, masks)

    return out_flat.reshape(N, C, H, W)


# --------------------- pure-JAX reference (PyTorch semantics) ---------------
def _reference_forward(x, params, eps=1e-5):
    def conv(x, w):
        return lax.conv_general_dilated(
            x, w, window_strides=(1, 1), padding=((1, 1), (1, 1)),
            dimension_numbers=("NCHW", "OIHW", "NCHW"),
            precision=lax.Precision.HIGHEST)

    def bn(x, p):
        g, b, m, v = p
        sc = (g / jnp.sqrt(v + eps))[None, :, None, None]
        return (x - m[None, :, None, None]) * sc + b[None, :, None, None]

    out = jax.nn.relu(bn(conv(x, params["w1"]), params["bn1"]))
    out = bn(conv(out, params["w2"]), params["bn2"])
    return jax.nn.relu(out + x)


if __name__ == "__main__":
    def make_inputs(key, N, C, H, W):
        ks = jax.random.split(key, 11)
        x = jax.random.normal(ks[0], (N, C, H, W), jnp.float32)
        fan = 1.0 / math.sqrt(9 * C)
        params = {
            "w1": jax.random.normal(ks[1], (C, C, 3, 3), jnp.float32) * fan,
            "w2": jax.random.normal(ks[2], (C, C, 3, 3), jnp.float32) * fan,
            "bn1": (1.0 + 0.1 * jax.random.normal(ks[3], (C,), jnp.float32),
                    0.1 * jax.random.normal(ks[4], (C,), jnp.float32),
                    0.1 * jax.random.normal(ks[5], (C,), jnp.float32),
                    1.0 + 0.1 * jax.random.uniform(ks[6], (C,), jnp.float32)),
            "bn2": (1.0 + 0.1 * jax.random.normal(ks[7], (C,), jnp.float32),
                    0.1 * jax.random.normal(ks[8], (C,), jnp.float32),
                    0.1 * jax.random.normal(ks[9], (C,), jnp.float32),
                    1.0 + 0.1 * jax.random.uniform(ks[10], (C,), jnp.float32)),
        }
        return x, params

    k1, k2 = jax.random.split(jax.random.PRNGKey(0))

    # BasicBlock(inplanes=4, planes=4): exercises the exact-f32 VPU conv path.
    x, params = make_inputs(k1, 2, 4, 16, 16)
    out = jax.block_until_ready(basic_block_forward(x, params))
    ref = jax.block_until_ready(_reference_forward(x, params))
    np.testing.assert_allclose(np.asarray(out), np.asarray(ref),
                               rtol=1e-4, atol=1e-4)

    # BasicBlock(inplanes=64, planes=64): exercises the MXU (bf16 cols) path.
    x, params = make_inputs(k2, 2, 64, 16, 16)
    out = jax.block_until_ready(basic_block_forward(x, params))
    ref = jax.block_until_ready(_reference_forward(x, params))
    np.testing.assert_allclose(np.asarray(out), np.asarray(ref),
                               rtol=5e-2, atol=5e-2)

    print("KERNEL_OK")
</pallas_src>

<mosaic_0001>
module attributes {stable_mosaic.version = 11 : i64} {
  func.func @_basic_block_kernel(%arg0: i32, %arg1: memref<2x4x256xf32, #tpu.memory_space<vmem>>, %arg2: memref<4x36xf32, #tpu.memory_space<vmem>>, %arg3: memref<4x1xf32, #tpu.memory_space<vmem>>, %arg4: memref<4x36xf32, #tpu.memory_space<vmem>>, %arg5: memref<4x1xf32, #tpu.memory_space<vmem>>, %arg6: memref<9x256xf32, #tpu.memory_space<vmem>>, %arg7: memref<2x4x256xf32, #tpu.memory_space<vmem>>) attributes {dimension_semantics = [#tpu.dimension_semantics<parallel>], iteration_bounds = array<i64: 1>, scalar_prefetch = 0 : i64, scratch_operands = 0 : i64, tpu.core_type = #tpu.core_type<tc>, window_params = [{transform_indices = @transform_0, window_bounds = array<i64: 2, 4, 256>}, {pipeline_mode = #tpu.pipeline_mode<synchronous>, transform_indices = @transform_1, window_bounds = array<i64: 4, 36>}, {pipeline_mode = #tpu.pipeline_mode<synchronous>, transform_indices = @transform_2, window_bounds = array<i64: 4, 1>}, {pipeline_mode = #tpu.pipeline_mode<synchronous>, transform_indices = @transform_3, window_bounds = array<i64: 4, 36>}, {pipeline_mode = #tpu.pipeline_mode<synchronous>, transform_indices = @transform_4, window_bounds = array<i64: 4, 1>}, {pipeline_mode = #tpu.pipeline_mode<synchronous>, transform_indices = @transform_5, window_bounds = array<i64: 9, 256>}, {transform_indices = @transform_6, window_bounds = array<i64: 2, 4, 256>}]} {
    %c0 = arith.constant 0 : index
    %c0_0 = arith.constant 0 : index
    %c0_1 = arith.constant 0 : index
    %0 = vector.load %arg1[%c0, %c0_0, %c0_1] : memref<2x4x256xf32, #tpu.memory_space<vmem>>, vector<1x4x256xf32>
    %1 = vector.shape_cast %0 : vector<1x4x256xf32> to vector<4x256xf32>
    %cst = arith.constant 0.000000e+00 : f32
    %2 = vector.broadcast %cst : f32 to vector<4x256xf32>
    %c17_i32 = arith.constant 17 : i32
    %3 = tpu.dynamic_rotate %1 by %c17_i32 dim 1 : vector<4x256xf32>, i32 -> vector<4x256xf32>
    %c0_2 = arith.constant 0 : index
    %c0_3 = arith.constant 0 : index
    %4 = vector.load %arg6[%c0_2, %c0_3] : memref<9x256xf32, #tpu.memory_space<vmem>>, vector<1x256xf32>
    %5 = vector.broadcast %4 : vector<1x256xf32> to vector<4x256xf32>
    %6 = arith.mulf %3, %5 : vector<4x256xf32>
    %c0_4 = arith.constant 0 : index
    %c0_5 = arith.constant 0 : index
    %7 = vector.load %arg2[%c0_4, %c0_5] : memref<4x36xf32, #tpu.memory_space<vmem>>, vector<4x1xf32>
    %8 = vector.extract_strided_slice %6 {offsets = [0, 0], sizes = [1, 256], strides = [1, 1]} : vector<4x256xf32> to vector<1x256xf32>
    %9 = vector.broadcast %7 : vector<4x1xf32> to vector<4x256xf32>
    %10 = vector.broadcast %8 : vector<1x256xf32> to vector<4x256xf32>
    %11 = arith.mulf %9, %10 : vector<4x256xf32>
    %12 = arith.addf %2, %11 : vector<4x256xf32>
    %c0_6 = arith.constant 0 : index
    %c1 = arith.constant 1 : index
    %13 = vector.load %arg2[%c0_6, %c1] : memref<4x36xf32, #tpu.memory_space<vmem>>, vector<4x1xf32>
    %14 = vector.extract_strided_slice %6 {offsets = [1, 0], sizes = [1, 256], strides = [1, 1]} : vector<4x256xf32> to vector<1x256xf32>
    %15 = vector.broadcast %13 : vector<4x1xf32> to vector<4x256xf32>
    %16 = vector.broadcast %14 : vector<1x256xf32> to vector<4x256xf32>
    %17 = arith.mulf %15, %16 : vector<4x256xf32>
    %18 = arith.addf %12, %17 : vector<4x256xf32>
    %c0_7 = arith.constant 0 : index
    %c2 = arith.constant 2 : index
    %19 = vector.load %arg2[%c0_7, %c2] : memref<4x36xf32, #tpu.memory_space<vmem>>, vector<4x1xf32>
    %20 = vector.extract_strided_slice %6 {offsets = [2, 0], sizes = [1, 256], strides = [1, 1]} : vector<4x256xf32> to vector<1x256xf32>
    %21 = vector.broadcast %19 : vector<4x1xf32> to vector<4x256xf32>
    %22 = vector.broadcast %20 : vector<1x256xf32> to vector<4x256xf32>
    %23 = arith.mulf %21, %22 : vector<4x256xf32>
    %24 = arith.addf %18, %23 : vector<4x256xf32>
    %c0_8 = arith.constant 0 : index
    %c3 = arith.constant 3 : index
    %25 = vector.load %arg2[%c0_8, %c3] : memref<4x36xf32, #tpu.memory_space<vmem>>, vector<4x1xf32>
    %26 = vector.extract_strided_slice %6 {offsets = [3, 0], sizes = [1, 256], strides = [1, 1]} : vector<4x256xf32> to vector<1x256xf32>
    %27 = vector.broadcast %25 : vector<4x1xf32> to vector<4x256xf32>
    %28 = vector.broadcast %26 : vector<1x256xf32> to vector<4x256xf32>
    %29 = arith.mulf %27, %28 : vector<4x256xf32>
    %30 = arith.addf %24, %29 : vector<4x256xf32>
    %c16_i32 = arith.constant 16 : i32
    %31 = tpu.dynamic_rotate %1 by %c16_i32 dim 1 : vector<4x256xf32>, i32 -> vector<4x256xf32>
    %c1_9 = arith.constant 1 : index
    %c0_10 = arith.constant 0 : index
    %32 = vector.load %arg6[%c1_9, %c0_10] : memref<9x256xf32, #tpu.memory_space<vmem>>, vector<1x256xf32>
    %33 = vector.broadcast %32 : vector<1x256xf32> to vector<4x256xf32>
    %34 = arith.mulf %31, %33 : vector<4x256xf32>
    %c0_11 = arith.constant 0 : index
    %c4 = arith.constant 4 : index
    %35 = vector.load %arg2[%c0_11, %c4] : memref<4x36xf32, #tpu.memory_space<vmem>>, vector<4x1xf32>
    %36 = vector.extract_strided_slice %34 {offsets = [0, 0], sizes = [1, 256], strides = [1, 1]} : vector<4x256xf32> to vector<1x256xf32>
    %37 = vector.broadcast %35 : vector<4x1xf32> to vector<4x256xf32>
    %38 = vector.broadcast %36 : vector<1x256xf32> to vector<4x256xf32>
    %39 = arith.mulf %37, %38 : vector<4x256xf32>
    %40 = arith.addf %30, %39 : vector<4x256xf32>
    %c0_12 = arith.constant 0 : index
    %c5 = arith.constant 5 : index
    %41 = vector.load %arg2[%c0_12, %c5] : memref<4x36xf32, #tpu.memory_space<vmem>>, vector<4x1xf32>
    %42 = vector.extract_strided_slice %34 {offsets = [1, 0], sizes = [1, 256], strides = [1, 1]} : vector<4x256xf32> to vector<1x256xf32>
    %43 = vector.broadcast %41 : vector<4x1xf32> to vector<4x256xf32>
    %44 = vector.broadcast %42 : vector<1x256xf32> to vector<4x256xf32>
    %45 = arith.mulf %43, %44 : vector<4x256xf32>
    %46 = arith.addf %40, %45 : vector<4x256xf32>
    %c0_13 = arith.constant 0 : index
    %c6 = arith.constant 6 : index
    %47 = vector.load %arg2[%c0_13, %c6] : memref<4x36xf32, #tpu.memory_space<vmem>>, vector<4x1xf32>
    %48 = vector.extract_strided_slice %34 {offsets = [2, 0], sizes = [1, 256], strides = [1, 1]} : vector<4x256xf32> to vector<1x256xf32>
    %49 = vector.broadcast %47 : vector<4x1xf32> to vector<4x256xf32>
    %50 = vector.broadcast %48 : vector<1x256xf32> to vector<4x256xf32>
    %51 = arith.mulf %49, %50 : vector<4x256xf32>
    %52 = arith.addf %46, %51 : vector<4x256xf32>
    %c0_14 = arith.constant 0 : index
    %c7 = arith.constant 7 : index
    %53 = vector.load %arg2[%c0_14, %c7] : memref<4x36xf32, #tpu.memory_space<vmem>>, vector<4x1xf32>
    %54 = vector.extract_strided_slice %34 {offsets = [3, 0], sizes = [1, 256], strides = [1, 1]} : vector<4x256xf32> to vector<1x256xf32>
    %55 = vector.broadcast %53 : vector<4x1xf32> to vector<4x256xf32>
    %56 = vector.broadcast %54 : vector<1x256xf32> to vector<4x256xf32>
    %57 = arith.mulf %55, %56 : vector<4x256xf32>
    %58 = arith.addf %52, %57 : vector<4x256xf32>
    %c15_i32 = arith.constant 15 : i32
    %59 = tpu.dynamic_rotate %1 by %c15_i32 dim 1 : vector<4x256xf32>, i32 -> vector<4x256xf32>
    %c2_15 = arith.constant 2 : index
    %c0_16 = arith.constant 0 : index
    %60 = vector.load %arg6[%c2_15, %c0_16] : memref<9x256xf32, #tpu.memory_space<vmem>>, vector<1x256xf32>
    %61 = vector.broadcast %60 : vector<1x256xf32> to vector<4x256xf32>
    %62 = arith.mulf %59, %61 : vector<4x256xf32>
    %c0_17 = arith.constant 0 : index
    %c8 = arith.constant 8 : index
    %63 = vector.load %arg2[%c0_17, %c8] : memref<4x36xf32, #tpu.memory_space<vmem>>, vector<4x1xf32>
    %64 = vector.extract_strided_slice %62 {offsets = [0, 0], sizes = [1, 256], strides = [1, 1]} : vector<4x256xf32> to vector<1x256xf32>
    %65 = vector.broadcast %63 : vector<4x1xf32> to vector<4x256xf32>
    %66 = vector.broadcast %64 : vector<1x256xf32> to vector<4x256xf32>
    %67 = arith.mulf %65, %66 : vector<4x256xf32>
    %68 = arith.addf %58, %67 : vector<4x256xf32>
    %c0_18 = arith.constant 0 : index
    %c9 = arith.constant 9 : index
    %69 = vector.load %arg2[%c0_18, %c9] : memref<4x36xf32, #tpu.memory_space<vmem>>, vector<4x1xf32>
    %70 = vector.extract_strided_slice %62 {offsets = [1, 0], sizes = [1, 256], strides = [1, 1]} : vector<4x256xf32> to vector<1x256xf32>
    %71 = vector.broadcast %69 : vector<4x1xf32> to vector<4x256xf32>
    %72 = vector.broadcast %70 : vector<1x256xf32> to vector<4x256xf32>
    %73 = arith.mulf %71, %72 : vector<4x256xf32>
    %74 = arith.addf %68, %73 : vector<4x256xf32>
    %c0_19 = arith.constant 0 : index
    %c10 = arith.constant 10 : index
    %75 = vector.load %arg2[%c0_19, %c10] : memref<4x36xf32, #tpu.memory_space<vmem>>, vector<4x1xf32>
    %76 = vector.extract_strided_slice %62 {offsets = [2, 0], sizes = [1, 256], strides = [1, 1]} : vector<4x256xf32> to vector<1x256xf32>
    %77 = vector.broadcast %75 : vector<4x1xf32> to vector<4x256xf32>
    %78 = vector.broadcast %76 : vector<1x256xf32> to vector<4x256xf32>
    %79 = arith.mulf %77, %78 : vector<4x256xf32>
    %80 = arith.addf %74, %79 : vector<4x256xf32>
    %c0_20 = arith.constant 0 : index
    %c11 = arith.constant 11 : index
    %81 = vector.load %arg2[%c0_20, %c11] : memref<4x36xf32, #tpu.memory_space<vmem>>, vector<4x1xf32>
    %82 = vector.extract_strided_slice %62 {offsets = [3, 0], sizes = [1, 256], strides = [1, 1]} : vector<4x256xf32> to vector<1x256xf32>
    %83 = vector.broadcast %81 : vector<4x1xf32> to vector<4x256xf32>
    %84 = vector.broadcast %82 : vector<1x256xf32> to vector<4x256xf32>
    %85 = arith.mulf %83, %84 : vector<4x256xf32>
    %86 = arith.addf %80, %85 : vector<4x256xf32>
    %c1_i32 = arith.constant 1 : i32
    %87 = tpu.dynamic_rotate %1 by %c1_i32 dim 1 : vector<4x256xf32>, i32 -> vector<4x256xf32>
    %c3_21 = arith.constant 3 : index
    %c0_22 = arith.constant 0 : index
    %88 = vector.load %arg6[%c3_21, %c0_22] : memref<9x256xf32, #tpu.memory_space<vmem>>, vector<1x256xf32>
    %89 = vector.broadcast %88 : vector<1x256xf32> to vector<4x256xf32>
    %90 = arith.mulf %87, %89 : vector<4x256xf32>
    %c0_23 = arith.constant 0 : index
    %c12 = arith.constant 12 : index
    %91 = vector.load %arg2[%c0_23, %c12] : memref<4x36xf32, #tpu.memory_space<vmem>>, vector<4x1xf32>
    %92 = vector.extract_strided_slice %90 {offsets = [0, 0], sizes = [1, 256], strides = [1, 1]} : vector<4x256xf32> to vector<1x256xf32>
    %93 = vector.broadcast %91 : vector<4x1xf32> to vector<4x256xf32>
    %94 = vector.broadcast %92 : vector<1x256xf32> to vector<4x256xf32>
    %95 = arith.mulf %93, %94 : vector<4x256xf32>
    %96 = arith.addf %86, %95 : vector<4x256xf32>
    %c0_24 = arith.constant 0 : index
    %c13 = arith.constant 13 : index
    %97 = vector.load %arg2[%c0_24, %c13] : memref<4x36xf32, #tpu.memory_space<vmem>>, vector<4x1xf32>
    %98 = vector.extract_strided_slice %90 {offsets = [1, 0], sizes = [1, 256], strides = [1, 1]} : vector<4x256xf32> to vector<1x256xf32>
    %99 = vector.broadcast %97 : vector<4x1xf32> to vector<4x256xf32>
    %100 = vector.broadcast %98 : vector<1x256xf32> to vector<4x256xf32>
    %101 = arith.mulf %99, %100 : vector<4x256xf32>
    %102 = arith.addf %96, %101 : vector<4x256xf32>
    %c0_25 = arith.constant 0 : index
    %c14 = arith.constant 14 : index
    %103 = vector.load %arg2[%c0_25, %c14] : memref<4x36xf32, #tpu.memory_space<vmem>>, vector<4x1xf32>
    %104 = vector.extract_strided_slice %90 {offsets = [2, 0], sizes = [1, 256], strides = [1, 1]} : vector<4x256xf32> to vector<1x256xf32>
    %105 = vector.broadcast %103 : vector<4x1xf32> to vector<4x256xf32>
    %106 = vector.broadcast %104 : vector<1x256xf32> to vector<4x256xf32>
    %107 = arith.mulf %105, %106 : vector<4x256xf32>
    %108 = arith.addf %102, %107 : vector<4x256xf32>
    %c0_26 = arith.constant 0 : index
    %c15 = arith.constant 15 : index
    %109 = vector.load %arg2[%c0_26, %c15] : memref<4x36xf32, #tpu.memory_space<vmem>>, vector<4x1xf32>
    %110 = vector.extract_strided_slice %90 {offsets = [3, 0], sizes = [1, 256], strides = [1, 1]} : vector<4x256xf32> to vector<1x256xf32>
    %111 = vector.broadcast %109 : vector<4x1xf32> to vector<4x256xf32>
    %112 = vector.broadcast %110 : vector<1x256xf32> to vector<4x256xf32>
    %113 = arith.mulf %111, %112 : vector<4x256xf32>
    %114 = arith.addf %108, %113 : vector<4x256xf32>
    %c4_27 = arith.constant 4 : index
    %c0_28 = arith.constant 0 : index
    %115 = vector.load %arg6[%c4_27, %c0_28] : memref<9x256xf32, #tpu.memory_space<vmem>>, vector<1x256xf32>
    %116 = vector.broadcast %115 : vector<1x256xf32> to vector<4x256xf32>
    %117 = arith.mulf %1, %116 : vector<4x256xf32>
    %c0_29 = arith.constant 0 : index
    %c16 = arith.constant 16 : index
    %118 = vector.load %arg2[%c0_29, %c16] : memref<4x36xf32, #tpu.memory_space<vmem>>, vector<4x1xf32>
    %119 = vector.extract_strided_slice %117 {offsets = [0, 0], sizes = [1, 256], strides = [1, 1]} : vector<4x256xf32> to vector<1x256xf32>
    %120 = vector.broadcast %118 : vector<4x1xf32> to vector<4x256xf32>
    %121 = vector.broadcast %119 : vector<1x256xf32> to vector<4x256xf32>
    %122 = arith.mulf %120, %121 : vector<4x256xf32>
    %123 = arith.addf %114, %122 : vector<4x256xf32>
    %c0_30 = arith.constant 0 : index
    %c17 = arith.constant 17 : index
    %124 = vector.load %arg2[%c0_30, %c17] : memref<4x36xf32, #tpu.memory_space<vmem>>, vector<4x1xf32>
    %125 = vector.extract_strided_slice %117 {offsets = [1, 0], sizes = [1, 256], strides = [1, 1]} : vector<4x256xf32> to vector<1x256xf32>
    %126 = vector.broadcast %124 : vector<4x1xf32> to vector<4x256xf32>
    %127 = vector.broadcast %125 : vector<1x256xf32> to vector<4x256xf32>
    %128 = arith.mulf %126, %127 : vector<4x256xf32>
    %129 = arith.addf %123, %128 : vector<4x256xf32>
    %c0_31 = arith.constant 0 : index
    %c18 = arith.constant 18 : index
    %130 = vector.load %arg2[%c0_31, %c18] : memref<4x36xf32, #tpu.memory_space<vmem>>, vector<4x1xf32>
    %131 = vector.extract_strided_slice %117 {offsets = [2, 0], sizes = [1, 256], strides = [1, 1]} : vector<4x256xf32> to vector<1x256xf32>
    %132 = vector.broadcast %130 : vector<4x1xf32> to vector<4x256xf32>
    %133 = vector.broadcast %131 : vector<1x256xf32> to vector<4x256xf32>
    %134 = arith.mulf %132, %133 : vector<4x256xf32>
    %135 = arith.addf %129, %134 : vector<4x256xf32>
    %c0_32 = arith.constant 0 : index
    %c19 = arith.constant 19 : index
    %136 = vector.load %arg2[%c0_32, %c19] : memref<4x36xf32, #tpu.memory_space<vmem>>, vector<4x1xf32>
    %137 = vector.extract_strided_slice %117 {offsets = [3, 0], sizes = [1, 256], strides = [1, 1]} : vector<4x256xf32> to vector<1x256xf32>
    %138 = vector.broadcast %136 : vector<4x1xf32> to vector<4x256xf32>
    %139 = vector.broadcast %137 : vector<1x256xf32> to vector<4x256xf32>
    %140 = arith.mulf %138, %139 : vector<4x256xf32>
    %141 = arith.addf %135, %140 : vector<4x256xf32>
    %c255_i32 = arith.constant 255 : i32
    %142 = tpu.dynamic_rotate %1 by %c255_i32 dim 1 : vector<4x256xf32>, i32 -> vector<4x256xf32>
    %c5_33 = arith.constant 5 : index
    %c0_34 = arith.constant 0 : index
    %143 = vector.load %arg6[%c5_33, %c0_34] : memref<9x256xf32, #tpu.memory_space<vmem>>, vector<1x256xf32>
    %144 = vector.broadcast %143 : vector<1x256xf32> to vector<4x256xf32>
    %145 = arith.mulf %142, %144 : vector<4x256xf32>
    %c0_35 = arith.constant 0 : index
    %c20 = arith.constant 20 : index
    %146 = vector.load %arg2[%c0_35, %c20] : memref<4x36xf32, #tpu.memory_space<vmem>>, vector<4x1xf32>
    %147 = vector.extract_strided_slice %145 {offsets = [0, 0], sizes = [1, 256], strides = [1, 1]} : vector<4x256xf32> to vector<1x256xf32>
    %148 = vector.broadcast %146 : vector<4x1xf32> to vector<4x256xf32>
    %149 = vector.broadcast %147 : vector<1x256xf32> to vector<4x256xf32>
    %150 = arith.mulf %148, %149 : vector<4x256xf32>
    %151 = arith.addf %141, %150 : vector<4x256xf32>
    %c0_36 = arith.constant 0 : index
    %c21 = arith.constant 21 : index
    %152 = vector.load %arg2[%c0_36, %c21] : memref<4x36xf32, #tpu.memory_space<vmem>>, vector<4x1xf32>
    %153 = vector.extract_strided_slice %145 {offsets = [1, 0], sizes = [1, 256], strides = [1, 1]} : vector<4x256xf32> to vector<1x256xf32>
    %154 = vector.broadcast %152 : vector<4x1xf32> to vector<4x256xf32>
    %155 = vector.broadcast %153 : vector<1x256xf32> to vector<4x256xf32>
    %156 = arith.mulf %154, %155 : vector<4x256xf32>
    %157 = arith.addf %151, %156 : vector<4x256xf32>
    %c0_37 = arith.constant 0 : index
    %c22 = arith.constant 22 : index
    %158 = vector.load %arg2[%c0_37, %c22] : memref<4x36xf32, #tpu.memory_space<vmem>>, vector<4x1xf32>
    %159 = vector.extract_strided_slice %145 {offsets = [2, 0], sizes = [1, 256], strides = [1, 1]} : vector<4x256xf32> to vector<1x256xf32>
    %160 = vector.broadcast %158 : vector<4x1xf32> to vector<4x256xf32>
    %161 = vector.broadcast %159 : vector<1x256xf32> to vector<4x256xf32>
    %162 = arith.mulf %160, %161 : vector<4x256xf32>
    %163 = arith.addf %157, %162 : vector<4x256xf32>
    %c0_38 = arith.constant 0 : index
    %c23 = arith.constant 23 : index
    %164 = vector.load %arg2[%c0_38, %c23] : memref<4x36xf32, #tpu.memory_space<vmem>>, vector<4x1xf32>
    %165 = vector.extract_strided_slice %145 {offsets = [3, 0], sizes = [1, 256], strides = [1, 1]} : vector<4x256xf32> to vector<1x256xf32>
    %166 = vector.broadcast %164 : vector<4x1xf32> to vector<4x256xf32>
    %167 = vector.broadcast %165 : vector<1x256xf32> to vector<4x256xf32>
    %168 = arith.mulf %166, %167 : vector<4x256xf32>
    %169 = arith.addf %163, %168 : vector<4x256xf32>
    %c241_i32 = arith.constant 241 : i32
    %170 = tpu.dynamic_rotate %1 by %c241_i32 dim 1 : vector<4x256xf32>, i32 -> vector<4x256xf32>
    %c6_39 = arith.constant 6 : index
    %c0_40 = arith.constant 0 : index
    %171 = vector.load %arg6[%c6_39, %c0_40] : memref<9x256xf32, #tpu.memory_space<vmem>>, vector<1x256xf32>
    %172 = vector.broadcast %171 : vector<1x256xf32> to vector<4x256xf32>
    %173 = arith.mulf %170, %172 : vector<4x256xf32>
    %c0_41 = arith.constant 0 : index
    %c24 = arith.constant 24 : index
    %174 = vector.load %arg2[%c0_41, %c24] : memref<4x36xf32, #tpu.memory_space<vmem>>, vector<4x1xf32>
    %175 = vector.extract_strided_slice %173 {offsets = [0, 0], sizes = [1, 256], strides = [1, 1]} : vector<4x256xf32> to vector<1x256xf32>
    %176 = vector.broadcast %174 : vector<4x1xf32> to vector<4x256xf32>
    %177 = vector.broadcast %175 : vector<1x256xf32> to vector<4x256xf32>
    %178 = arith.mulf %176, %177 : vector<4x256xf32>
    %179 = arith.addf %169, %178 : vector<4x256xf32>
    %c0_42 = arith.constant 0 : index
    %c25 = arith.constant 25 : index
    %180 = vector.load %arg2[%c0_42, %c25] : memref<4x36xf32, #tpu.memory_space<vmem>>, vector<4x1xf32>
    %181 = vector.extract_strided_slice %173 {offsets = [1, 0], sizes = [1, 256], strides = [1, 1]} : vector<4x256xf32> to vector<1x256xf32>
    %182 = vector.broadcast %180 : vector<4x1xf32> to vector<4x256xf32>
    %183 = vector.broadcast %181 : vector<1x256xf32> to vector<4x256xf32>
    %184 = arith.mulf %182, %183 : vector<4x256xf32>
    %185 = arith.addf %179, %184 : vector<4x256xf32>
    %c0_43 = arith.constant 0 : index
    %c26 = arith.constant 26 : index
    %186 = vector.load %arg2[%c0_43, %c26] : memref<4x36xf32, #tpu.memory_space<vmem>>, vector<4x1xf32>
    %187 = vector.extract_strided_slice %173 {offsets = [2, 0], sizes = [1, 256], strides = [1, 1]} : vector<4x256xf32> to vector<1x256xf32>
    %188 = vector.broadcast %186 : vector<4x1xf32> to vector<4x256xf32>
    %189 = vector.broadcast %187 : vector<1x256xf32> to vector<4x256xf32>
    %190 = arith.mulf %188, %189 : vector<4x256xf32>
    %191 = arith.addf %185, %190 : vector<4x256xf32>
    %c0_44 = arith.constant 0 : index
    %c27 = arith.constant 27 : index
    %192 = vector.load %arg2[%c0_44, %c27] : memref<4x36xf32, #tpu.memory_space<vmem>>, vector<4x1xf32>
    %193 = vector.extract_strided_slice %173 {offsets = [3, 0], sizes = [1, 256], strides = [1, 1]} : vector<4x256xf32> to vector<1x256xf32>
    %194 = vector.broadcast %192 : vector<4x1xf32> to vector<4x256xf32>
    %195 = vector.broadcast %193 : vector<1x256xf32> to vector<4x256xf32>
    %196 = arith.mulf %194, %195 : vector<4x256xf32>
    %197 = arith.addf %191, %196 : vector<4x256xf32>
    %c240_i32 = arith.constant 240 : i32
    %198 = tpu.dynamic_rotate %1 by %c240_i32 dim 1 : vector<4x256xf32>, i32 -> vector<4x256xf32>
    %c7_45 = arith.constant 7 : index
    %c0_46 = arith.constant 0 : index
    %199 = vector.load %arg6[%c7_45, %c0_46] : memref<9x256xf32, #tpu.memory_space<vmem>>, vector<1x256xf32>
    %200 = vector.broadcast %199 : vector<1x256xf32> to vector<4x256xf32>
    %201 = arith.mulf %198, %200 : vector<4x256xf32>
    %c0_47 = arith.constant 0 : index
    %c28 = arith.constant 28 : index
    %202 = vector.load %arg2[%c0_47, %c28] : memref<4x36xf32, #tpu.memory_space<vmem>>, vector<4x1xf32>
    %203 = vector.extract_strided_slice %201 {offsets = [0, 0], sizes = [1, 256], strides = [1, 1]} : vector<4x256xf32> to vector<1x256xf32>
    %204 = vector.broadcast %202 : vector<4x1xf32> to vector<4x256xf32>
    %205 = vector.broadcast %203 : vector<1x256xf32> to vector<4x256xf32>
    %206 = arith.mulf %204, %205 : vector<4x256xf32>
    %207 = arith.addf %197, %206 : vector<4x256xf32>
    %c0_48 = arith.constant 0 : index
    %c29 = arith.constant 29 : index
    %208 = vector.load %arg2[%c0_48, %c29] : memref<4x36xf32, #tpu.memory_space<vmem>>, vector<4x1xf32>
    %209 = vector.extract_strided_slice %201 {offsets = [1, 0], sizes = [1, 256], strides = [1, 1]} : vector<4x256xf32> to vector<1x256xf32>
    %210 = vector.broadcast %208 : vector<4x1xf32> to vector<4x256xf32>
    %211 = vector.broadcast %209 : vector<1x256xf32> to vector<4x256xf32>
    %212 = arith.mulf %210, %211 : vector<4x256xf32>
    %213 = arith.addf %207, %212 : vector<4x256xf32>
    %c0_49 = arith.constant 0 : index
    %c30 = arith.constant 30 : index
    %214 = vector.load %arg2[%c0_49, %c30] : memref<4x36xf32, #tpu.memory_space<vmem>>, vector<4x1xf32>
    %215 = vector.extract_strided_slice %201 {offsets = [2, 0], sizes = [1, 256], strides = [1, 1]} : vector<4x256xf32> to vector<1x256xf32>
    %216 = vector.broadcast %214 : vector<4x1xf32> to vector<4x256xf32>
    %217 = vector.broadcast %215 : vector<1x256xf32> to vector<4x256xf32>
    %218 = arith.mulf %216, %217 : vector<4x256xf32>
    %219 = arith.addf %213, %218 : vector<4x256xf32>
    %c0_50 = arith.constant 0 : index
    %c31 = arith.constant 31 : index
    %220 = vector.load %arg2[%c0_50, %c31] : memref<4x36xf32, #tpu.memory_space<vmem>>, vector<4x1xf32>
    %221 = vector.extract_strided_slice %201 {offsets = [3, 0], sizes = [1, 256], strides = [1, 1]} : vector<4x256xf32> to vector<1x256xf32>
    %222 = vector.broadcast %220 : vector<4x1xf32> to vector<4x256xf32>
    %223 = vector.broadcast %221 : vector<1x256xf32> to vector<4x256xf32>
    %224 = arith.mulf %222, %223 : vector<4x256xf32>
    %225 = arith.addf %219, %224 : vector<4x256xf32>
    %c239_i32 = arith.constant 239 : i32
    %226 = tpu.dynamic_rotate %1 by %c239_i32 dim 1 : vector<4x256xf32>, i32 -> vector<4x256xf32>
    %c8_51 = arith.constant 8 : index
    %c0_52 = arith.constant 0 : index
    %227 = vector.load %arg6[%c8_51, %c0_52] : memref<9x256xf32, #tpu.memory_space<vmem>>, vector<1x256xf32>
    %228 = vector.broadcast %227 : vector<1x256xf32> to vector<4x256xf32>
    %229 = arith.mulf %226, %228 : vector<4x256xf32>
    %c0_53 = arith.constant 0 : index
    %c32 = arith.constant 32 : index
    %230 = vector.load %arg2[%c0_53, %c32] : memref<4x36xf32, #tpu.memory_space<vmem>>, vector<4x1xf32>
    %231 = vector.extract_strided_slice %229 {offsets = [0, 0], sizes = [1, 256], strides = [1, 1]} : vector<4x256xf32> to vector<1x256xf32>
    %232 = vector.broadcast %230 : vector<4x1xf32> to vector<4x256xf32>
    %233 = vector.broadcast %231 : vector<1x256xf32> to vector<4x256xf32>
    %234 = arith.mulf %232, %233 : vector<4x256xf32>
    %235 = arith.addf %225, %234 : vector<4x256xf32>
    %c0_54 = arith.constant 0 : index
    %c33 = arith.constant 33 : index
    %236 = vector.load %arg2[%c0_54, %c33] : memref<4x36xf32, #tpu.memory_space<vmem>>, vector<4x1xf32>
    %237 = vector.extract_strided_slice %229 {offsets = [1, 0], sizes = [1, 256], strides = [1, 1]} : vector<4x256xf32> to vector<1x256xf32>
    %238 = vector.broadcast %236 : vector<4x1xf32> to vector<4x256xf32>
    %239 = vector.broadcast %237 : vector<1x256xf32> to vector<4x256xf32>
    %240 = arith.mulf %238, %239 : vector<4x256xf32>
    %241 = arith.addf %235, %240 : vector<4x256xf32>
    %c0_55 = arith.constant 0 : index
    %c34 = arith.constant 34 : index
    %242 = vector.load %arg2[%c0_55, %c34] : memref<4x36xf32, #tpu.memory_space<vmem>>, vector<4x1xf32>
    %243 = vector.extract_strided_slice %229 {offsets = [2, 0], sizes = [1, 256], strides = [1, 1]} : vector<4x256xf32> to vector<1x256xf32>
    %244 = vector.broadcast %242 : vector<4x1xf32> to vector<4x256xf32>
    %245 = vector.broadcast %243 : vector<1x256xf32> to vector<4x256xf32>
    %246 = arith.mulf %244, %245 : vector<4x256xf32>
    %247 = arith.addf %241, %246 : vector<4x256xf32>
    %c0_56 = arith.constant 0 : index
    %c35 = arith.constant 35 : index
    %248 = vector.load %arg2[%c0_56, %c35] : memref<4x36xf32, #tpu.memory_space<vmem>>, vector<4x1xf32>
    %249 = vector.extract_strided_slice %229 {offsets = [3, 0], sizes = [1, 256], strides = [1, 1]} : vector<4x256xf32> to vector<1x256xf32>
    %250 = vector.broadcast %248 : vector<4x1xf32> to vector<4x256xf32>
    %251 = vector.broadcast %249 : vector<1x256xf32> to vector<4x256xf32>
    %252 = arith.mulf %250, %251 : vector<4x256xf32>
    %253 = arith.addf %247, %252 : vector<4x256xf32>
    %c0_57 = arith.constant 0 : index
    %c0_58 = arith.constant 0 : index
    %254 = vector.load %arg3[%c0_57, %c0_58] : memref<4x1xf32, #tpu.memory_space<vmem>>, vector<4x1xf32>
    %255 = vector.broadcast %254 : vector<4x1xf32> to vector<4x256xf32>
    %256 = arith.addf %253, %255 : vector<4x256xf32>
    %cst_59 = arith.constant 0.000000e+00 : f32
    %257 = vector.broadcast %cst_59 : f32 to vector<4x256xf32>
    %258 = arith.maximumf %256, %257 : vector<4x256xf32>
    %cst_60 = arith.constant 0.000000e+00 : f32
    %259 = vector.broadcast %cst_60 : f32 to vector<4x256xf32>
    %c17_i32_61 = arith.constant 17 : i32
    %260 = tpu.dynamic_rotate %258 by %c17_i32_61 dim 1 : vector<4x256xf32>, i32 -> vector<4x256xf32>
    %c0_62 = arith.constant 0 : index
    %c0_63 = arith.constant 0 : index
    %261 = vector.load %arg6[%c0_62, %c0_63] : memref<9x256xf32, #tpu.memory_space<vmem>>, vector<1x256xf32>
    %262 = vector.broadcast %261 : vector<1x256xf32> to vector<4x256xf32>
    %263 = arith.mulf %260, %262 : vector<4x256xf32>
    %c0_64 = arith.constant 0 : index
    %c0_65 = arith.constant 0 : index
    %264 = vector.load %arg4[%c0_64, %c0_65] : memref<4x36xf32, #tpu.memory_space<vmem>>, vector<4x1xf32>
    %265 = vector.extract_strided_slice %263 {offsets = [0, 0], sizes = [1, 256], strides = [1, 1]} : vector<4x256xf32> to vector<1x256xf32>
    %266 = vector.broadcast %264 : vector<4x1xf32> to vector<4x256xf32>
    %267 = vector.broadcast %265 : vector<1x256xf32> to vector<4x256xf32>
    %268 = arith.mulf %266, %267 : vector<4x256xf32>
    %269 = arith.addf %259, %268 : vector<4x256xf32>
    %c0_66 = arith.constant 0 : index
    %c1_67 = arith.constant 1 : index
    %270 = vector.load %arg4[%c0_66, %c1_67] : memref<4x36xf32, #tpu.memory_space<vmem>>, vector<4x1xf32>
    %271 = vector.extract_strided_slice %263 {offsets = [1, 0], sizes = [1, 256], strides = [1, 1]} : vector<4x256xf32> to vector<1x256xf32>
    %272 = vector.broadcast %270 : vector<4x1xf32> to vector<4x256xf32>
    %273 = vector.broadcast %271 : vector<1x256xf32> to vector<4x256xf32>
    %274 = arith.mulf %272, %273 : vector<4x256xf32>
    %275 = arith.addf %269, %274 : vector<4x256xf32>
    %c0_68 = arith.constant 0 : index
    %c2_69 = arith.constant 2 : index
    %276 = vector.load %arg4[%c0_68, %c2_69] : memref<4x36xf32, #tpu.memory_space<vmem>>, vector<4x1xf32>
    %277 = vector.extract_strided_slice %263 {offsets = [2, 0], sizes = [1, 256], strides = [1, 1]} : vector<4x256xf32> to vector<1x256xf32>
    %278 = vector.broadcast %276 : vector<4x1xf32> to vector<4x256xf32>
    %279 = vector.broadcast %277 : vector<1x256xf32> to vector<4x256xf32>
    %280 = arith.mulf %278, %279 : vector<4x256xf32>
    %281 = arith.addf %275, %280 : vector<4x256xf32>
    %c0_70 = arith.constant 0 : index
    %c3_71 = arith.constant 3 : index
    %282 = vector.load %arg4[%c0_70, %c3_71] : memref<4x36xf32, #tpu.memory_space<vmem>>, vector<4x1xf32>
    %283 = vector.extract_strided_slice %263 {offsets = [3, 0], sizes = [1, 256], strides = [1, 1]} : vector<4x256xf32> to vector<1x256xf32>
    %284 = vector.broadcast %282 : vector<4x1xf32> to vector<4x256xf32>
    %285 = vector.broadcast %283 : vector<1x256xf32> to vector<4x256xf32>
    %286 = arith.mulf %284, %285 : vector<4x256xf32>
    %287 = arith.addf %281, %286 : vector<4x256xf32>
    %c16_i32_72 = arith.constant 16 : i32
    %288 = tpu.dynamic_rotate %258 by %c16_i32_72 dim 1 : vector<4x256xf32>, i32 -> vector<4x256xf32>
    %c1_73 = arith.constant 1 : index
    %c0_74 = arith.constant 0 : index
    %289 = vector.load %arg6[%c1_73, %c0_74] : memref<9x256xf32, #tpu.memory_space<vmem>>, vector<1x256xf32>
    %290 = vector.broadcast %289 : vector<1x256xf32> to vector<4x256xf32>
    %291 = arith.mulf %288, %290 : vector<4x256xf32>
    %c0_75 = arith.constant 0 : index
    %c4_76 = arith.constant 4 : index
    %292 = vector.load %arg4[%c0_75, %c4_76] : memref<4x36xf32, #tpu.memory_space<vmem>>, vector<4x1xf32>
    %293 = vector.extract_strided_slice %291 {offsets = [0, 0], sizes = [1, 256], strides = [1, 1]} : vector<4x256xf32> to vector<1x256xf32>
    %294 = vector.broadcast %292 : vector<4x1xf32> to vector<4x256xf32>
    %295 = vector.broadcast %293 : vector<1x256xf32> to vector<4x256xf32>
    %296 = arith.mulf %294, %295 : vector<4x256xf32>
    %297 = arith.addf %287, %296 : vector<4x256xf32>
    %c0_77 = arith.constant 0 : index
    %c5_78 = arith.constant 5 : index
    %298 = vector.load %arg4[%c0_77, %c5_78] : memref<4x36xf32, #tpu.memory_space<vmem>>, vector<4x1xf32>
    %299 = vector.extract_strided_slice %291 {offsets = [1, 0], sizes = [1, 256], strides = [1, 1]} : vector<4x256xf32> to vector<1x256xf32>
    %300 = vector.broadcast %298 : vector<4x1xf32> to vector<4x256xf32>
    %301 = vector.broadcast %299 : vector<1x256xf32> to vector<4x256xf32>
    %302 = arith.mulf %300, %301 : vector<4x256xf32>
    %303 = arith.addf %297, %302 : vector<4x256xf32>
    %c0_79 = arith.constant 0 : index
    %c6_80 = arith.constant 6 : index
    %304 = vector.load %arg4[%c0_79, %c6_80] : memref<4x36xf32, #tpu.memory_space<vmem>>, vector<4x1xf32>
    %305 = vector.extract_strided_slice %291 {offsets = [2, 0], sizes = [1, 256], strides = [1, 1]} : vector<4x256xf32> to vector<1x256xf32>
    %306 = vector.broadcast %304 : vector<4x1xf32> to vector<4x256xf32>
    %307 = vector.broadcast %305 : vector<1x256xf32> to vector<4x256xf32>
    %308 = arith.mulf %306, %307 : vector<4x256xf32>
    %309 = arith.addf %303, %308 : vector<4x256xf32>
    %c0_81 = arith.constant 0 : index
    %c7_82 = arith.constant 7 : index
    %310 = vector.load %arg4[%c0_81, %c7_82] : memref<4x36xf32, #tpu.memory_space<vmem>>, vector<4x1xf32>
    %311 = vector.extract_strided_slice %291 {offsets = [3, 0], sizes = [1, 256], strides = [1, 1]} : vector<4x256xf32> to vector<1x256xf32>
    %312 = vector.broadcast %310 : vector<4x1xf32> to vector<4x256xf32>
    %313 = vector.broadcast %311 : vector<1x256xf32> to vector<4x256xf32>
    %314 = arith.mulf %312, %313 : vector<4x256xf32>
    %315 = arith.addf %309, %314 : vector<4x256xf32>
    %c15_i32_83 = arith.constant 15 : i32
    %316 = tpu.dynamic_rotate %258 by %c15_i32_83 dim 1 : vector<4x256xf32>, i32 -> vector<4x256xf32>
    %c2_84 = arith.constant 2 : index
    %c0_85 = arith.constant 0 : index
    %317 = vector.load %arg6[%c2_84, %c0_85] : memref<9x256xf32, #tpu.memory_space<vmem>>, vector<1x256xf32>
    %318 = vector.broadcast %317 : vector<1x256xf32> to vector<4x256xf32>
    %319 = arith.mulf %316, %318 : vector<4x256xf32>
    %c0_86 = arith.constant 0 : index
    %c8_87 = arith.constant 8 : index
    %320 = vector.load %arg4[%c0_86, %c8_87] : memref<4x36xf32, #tpu.memory_space<vmem>>, vector<4x1xf32>
    %321 = vector.extract_strided_slice %319 {offsets = [0, 0], sizes = [1, 256], strides = [1, 1]} : vector<4x256xf32> to vector<1x256xf32>
    %322 = vector.broadcast %320 : vector<4x1xf32> to vector<4x256xf32>
    %323 = vector.broadcast %321 : vector<1x256xf32> to vector<4x256xf32>
    %324 = arith.mulf %322, %323 : vector<4x256xf32>
    %325 = arith.addf %315, %324 : vector<4x256xf32>
    %c0_88 = arith.constant 0 : index
    %c9_89 = arith.constant 9 : index
    %326 = vector.load %arg4[%c0_88, %c9_89] : memref<4x36xf32, #tpu.memory_space<vmem>>, vector<4x1xf32>
    %327 = vector.extract_strided_slice %319 {offsets = [1, 0], sizes = [1, 256], strides = [1, 1]} : vector<4x256xf32> to vector<1x256xf32>
    %328 = vector.broadcast %326 : vector<4x1xf32> to vector<4x256xf32>
    %329 = vector.broadcast %327 : vector<1x256xf32> to vector<4x256xf32>
    %330 = arith.mulf %328, %329 : vector<4x256xf32>
    %331 = arith.addf %325, %330 : vector<4x256xf32>
    %c0_90 = arith.constant 0 : index
    %c10_91 = arith.constant 10 : index
    %332 = vector.load %arg4[%c0_90, %c10_91] : memref<4x36xf32, #tpu.memory_space<vmem>>, vector<4x1xf32>
    %333 = vector.extract_strided_slice %319 {offsets = [2, 0], sizes = [1, 256], strides = [1, 1]} : vector<4x256xf32> to vector<1x256xf32>
    %334 = vector.broadcast %332 : vector<4x1xf32> to vector<4x256xf32>
    %335 = vector.broadcast %333 : vector<1x256xf32> to vector<4x256xf32>
    %336 = arith.mulf %334, %335 : vector<4x256xf32>
    %337 = arith.addf %331, %336 : vector<4x256xf32>
    %c0_92 = arith.constant 0 : index
    %c11_93 = arith.constant 11 : index
    %338 = vector.load %arg4[%c0_92, %c11_93] : memref<4x36xf32, #tpu.memory_space<vmem>>, vector<4x1xf32>
    %339 = vector.extract_strided_slice %319 {offsets = [3, 0], sizes = [1, 256], strides = [1, 1]} : vector<4x256xf32> to vector<1x256xf32>
    %340 = vector.broadcast %338 : vector<4x1xf32> to vector<4x256xf32>
    %341 = vector.broadcast %339 : vector<1x256xf32> to vector<4x256xf32>
    %342 = arith.mulf %340, %341 : vector<4x256xf32>
    %343 = arith.addf %337, %342 : vector<4x256xf32>
    %c1_i32_94 = arith.constant 1 : i32
    %344 = tpu.dynamic_rotate %258 by %c1_i32_94 dim 1 : vector<4x256xf32>, i32 -> vector<4x256xf32>
    %c3_95 = arith.constant 3 : index
    %c0_96 = arith.constant 0 : index
    %345 = vector.load %arg6[%c3_95, %c0_96] : memref<9x256xf32, #tpu.memory_space<vmem>>, vector<1x256xf32>
    %346 = vector.broadcast %345 : vector<1x256xf32> to vector<4x256xf32>
    %347 = arith.mulf %344, %346 : vector<4x256xf32>
    %c0_97 = arith.constant 0 : index
    %c12_98 = arith.constant 12 : index
    %348 = vector.load %arg4[%c0_97, %c12_98] : memref<4x36xf32, #tpu.memory_space<vmem>>, vector<4x1xf32>
    %349 = vector.extract_strided_slice %347 {offsets = [0, 0], sizes = [1, 256], strides = [1, 1]} : vector<4x256xf32> to vector<1x256xf32>
    %350 = vector.broadcast %348 : vector<4x1xf32> to vector<4x256xf32>
    %351 = vector.broadcast %349 : vector<1x256xf32> to vector<4x256xf32>
    %352 = arith.mulf %350, %351 : vector<4x256xf32>
    %353 = arith.addf %343, %352 : vector<4x256xf32>
    %c0_99 = arith.constant 0 : index
    %c13_100 = arith.constant 13 : index
    %354 = vector.load %arg4[%c0_99, %c13_100] : memref<4x36xf32, #tpu.memory_space<vmem>>, vector<4x1xf32>
    %355 = vector.extract_strided_slice %347 {offsets = [1, 0], sizes = [1, 256], strides = [1, 1]} : vector<4x256xf32> to vector<1x256xf32>
    %356 = vector.broadcast %354 : vector<4x1xf32> to vector<4x256xf32>
    %357 = vector.broadcast %355 : vector<1x256xf32> to vector<4x256xf32>
    %358 = arith.mulf %356, %357 : vector<4x256xf32>
    %359 = arith.addf %353, %358 : vector<4x256xf32>
    %c0_101 = arith.constant 0 : index
    %c14_102 = arith.constant 14 : index
    %360 = vector.load %arg4[%c0_101, %c14_102] : memref<4x36xf32, #tpu.memory_space<vmem>>, vector<4x1xf32>
    %361 = vector.extract_strided_slice %347 {offsets = [2, 0], sizes = [1, 256], strides = [1, 1]} : vector<4x256xf32> to vector<1x256xf32>
    %362 = vector.broadcast %360 : vector<4x1xf32> to vector<4x256xf32>
    %363 = vector.broadcast %361 : vector<1x256xf32> to vector<4x256xf32>
    %364 = arith.mulf %362, %363 : vector<4x256xf32>
    %365 = arith.addf %359, %364 : vector<4x256xf32>
    %c0_103 = arith.constant 0 : index
    %c15_104 = arith.constant 15 : index
    %366 = vector.load %arg4[%c0_103, %c15_104] : memref<4x36xf32, #tpu.memory_space<vmem>>, vector<4x1xf32>
    %367 = vector.extract_strided_slice %347 {offsets = [3, 0], sizes = [1, 256], strides = [1, 1]} : vector<4x256xf32> to vector<1x256xf32>
    %368 = vector.broadcast %366 : vector<4x1xf32> to vector<4x256xf32>
    %369 = vector.broadcast %367 : vector<1x256xf32> to vector<4x256xf32>
    %370 = arith.mulf %368, %369 : vector<4x256xf32>
    %371 = arith.addf %365, %370 : vector<4x256xf32>
    %c4_105 = arith.constant 4 : index
    %c0_106 = arith.constant 0 : index
    %372 = vector.load %arg6[%c4_105, %c0_106] : memref<9x256xf32, #tpu.memory_space<vmem>>, vector<1x256xf32>
    %373 = vector.broadcast %372 : vector<1x256xf32> to vector<4x256xf32>
    %374 = arith.mulf %258, %373 : vector<4x256xf32>
    %c0_107 = arith.constant 0 : index
    %c16_108 = arith.constant 16 : index
    %375 = vector.load %arg4[%c0_107, %c16_108] : memref<4x36xf32, #tpu.memory_space<vmem>>, vector<4x1xf32>
    %376 = vector.extract_strided_slice %374 {offsets = [0, 0], sizes = [1, 256], strides = [1, 1]} : vector<4x256xf32> to vector<1x256xf32>
    %377 = vector.broadcast %375 : vector<4x1xf32> to vector<4x256xf32>
    %378 = vector.broadcast %376 : vector<1x256xf32> to vector<4x256xf32>
    %379 = arith.mulf %377, %378 : vector<4x256xf32>
    %380 = arith.addf %371, %379 : vector<4x256xf32>
    %c0_109 = arith.constant 0 : index
    %c17_110 = arith.constant 17 : index
    %381 = vector.load %arg4[%c0_109, %c17_110] : memref<4x36xf32, #tpu.memory_space<vmem>>, vector<4x1xf32>
    %382 = vector.extract_strided_slice %374 {offsets = [1, 0], sizes = [1, 256], strides = [1, 1]} : vector<4x256xf32> to vector<1x256xf32>
    %383 = vector.broadcast %381 : vector<4x1xf32> to vector<4x256xf32>
    %384 = vector.broadcast %382 : vector<1x256xf32> to vector<4x256xf32>
    %385 = arith.mulf %383, %384 : vector<4x256xf32>
    %386 = arith.addf %380, %385 : vector<4x256xf32>
    %c0_111 = arith.constant 0 : index
    %c18_112 = arith.constant 18 : index
    %387 = vector.load %arg4[%c0_111, %c18_112] : memref<4x36xf32, #tpu.memory_space<vmem>>, vector<4x1xf32>
    %388 = vector.extract_strided_slice %374 {offsets = [2, 0], sizes = [1, 256], strides = [1, 1]} : vector<4x256xf32> to vector<1x256xf32>
    %389 = vector.broadcast %387 : vector<4x1xf32> to vector<4x256xf32>
    %390 = vector.broadcast %388 : vector<1x256xf32> to vector<4x256xf32>
    %391 = arith.mulf %389, %390 : vector<4x256xf32>
    %392 = arith.addf %386, %391 : vector<4x256xf32>
    %c0_113 = arith.constant 0 : index
    %c19_114 = arith.constant 19 : index
    %393 = vector.load %arg4[%c0_113, %c19_114] : memref<4x36xf32, #tpu.memory_space<vmem>>, vector<4x1xf32>
    %394 = vector.extract_strided_slice %374 {offsets = [3, 0], sizes = [1, 256], strides = [1, 1]} : vector<4x256xf32> to vector<1x256xf32>
    %395 = vector.broadcast %393 : vector<4x1xf32> to vector<4x256xf32>
    %396 = vector.broadcast %394 : vector<1x256xf32> to vector<4x256xf32>
    %397 = arith.mulf %395, %396 : vector<4x256xf32>
    %398 = arith.addf %392, %397 : vector<4x256xf32>
    %c255_i32_115 = arith.constant 255 : i32
    %399 = tpu.dynamic_rotate %258 by %c255_i32_115 dim 1 : vector<4x256xf32>, i32 -> vector<4x256xf32>
    %c5_116 = arith.constant 5 : index
    %c0_117 = arith.constant 0 : index
    %400 = vector.load %arg6[%c5_116, %c0_117] : memref<9x256xf32, #tpu.memory_space<vmem>>, vector<1x256xf32>
    %401 = vector.broadcast %400 : vector<1x256xf32> to vector<4x256xf32>
    %402 = arith.mulf %399, %401 : vector<4x256xf32>
    %c0_118 = arith.constant 0 : index
    %c20_119 = arith.constant 20 : index
    %403 = vector.load %arg4[%c0_118, %c20_119] : memref<4x36xf32, #tpu.memory_space<vmem>>, vector<4x1xf32>
    %404 = vector.extract_strided_slice %402 {offsets = [0, 0], sizes = [1, 256], strides = [1, 1]} : vector<4x256xf32> to vector<1x256xf32>
    %405 = vector.broadcast %403 : vector<4x1xf32> to vector<4x256xf32>
    %406 = vector.broadcast %404 : vector<1x256xf32> to vector<4x256xf32>
    %407 = arith.mulf %405, %406 : vector<4x256xf32>
    %408 = arith.addf %398, %407 : vector<4x256xf32>
    %c0_120 = arith.constant 0 : index
    %c21_121 = arith.constant 21 : index
    %409 = vector.load %arg4[%c0_120, %c21_121] : memref<4x36xf32, #tpu.memory_space<vmem>>, vector<4x1xf32>
    %410 = vector.extract_strided_slice %402 {offsets = [1, 0], sizes = [1, 256], strides = [1, 1]} : vector<4x256xf32> to vector<1x256xf32>
    %411 = vector.broadcast %409 : vector<4x1xf32> to vector<4x256xf32>
    %412 = vector.broadcast %410 : vector<1x256xf32> to vector<4x256xf32>
    %413 = arith.mulf %411, %412 : vector<4x256xf32>
    %414 = arith.addf %408, %413 : vector<4x256xf32>
    %c0_122 = arith.constant 0 : index
    %c22_123 = arith.constant 22 : index
    %415 = vector.load %arg4[%c0_122, %c22_123] : memref<4x36xf32, #tpu.memory_space<vmem>>, vector<4x1xf32>
    %416 = vector.extract_strided_slice %402 {offsets = [2, 0], sizes = [1, 256], strides = [1, 1]} : vector<4x256xf32> to vector<1x256xf32>
    %417 = vector.broadcast %415 : vector<4x1xf32> to vector<4x256xf32>
    %418 = vector.broadcast %416 : vector<1x256xf32> to vector<4x256xf32>
    %419 = arith.mulf %417, %418 : vector<4x256xf32>
    %420 = arith.addf %414, %419 : vector<4x256xf32>
    %c0_124 = arith.constant 0 : index
    %c23_125 = arith.constant 23 : index
    %421 = vector.load %arg4[%c0_124, %c23_125] : memref<4x36xf32, #tpu.memory_space<vmem>>, vector<4x1xf32>
    %422 = vector.extract_strided_slice %402 {offsets = [3, 0], sizes = [1, 256], strides = [1, 1]} : vector<4x256xf32> to vector<1x256xf32>
    %423 = vector.broadcast %421 : vector<4x1xf32> to vector<4x256xf32>
    %424 = vector.broadcast %422 : vector<1x256xf32> to vector<4x256xf32>
    %425 = arith.mulf %423, %424 : vector<4x256xf32>
    %426 = arith.addf %420, %425 : vector<4x256xf32>
    %c241_i32_126 = arith.constant 241 : i32
    %427 = tpu.dynamic_rotate %258 by %c241_i32_126 dim 1 : vector<4x256xf32>, i32 -> vector<4x256xf32>
    %c6_127 = arith.constant 6 : index
    %c0_128 = arith.constant 0 : index
    %428 = vector.load %arg6[%c6_127, %c0_128] : memref<9x256xf32, #tpu.memory_space<vmem>>, vector<1x256xf32>
    %429 = vector.broadcast %428 : vector<1x256xf32> to vector<4x256xf32>
    %430 = arith.mulf %427, %429 : vector<4x256xf32>
    %c0_129 = arith.constant 0 : index
    %c24_130 = arith.constant 24 : index
    %431 = vector.load %arg4[%c0_129, %c24_130] : memref<4x36xf32, #tpu.memory_space<vmem>>, vector<4x1xf32>
    %432 = vector.extract_strided_slice %430 {offsets = [0, 0], sizes = [1, 256], strides = [1, 1]} : vector<4x256xf32> to vector<1x256xf32>
    %433 = vector.broadcast %431 : vector<4x1xf32> to vector<4x256xf32>
    %434 = vector.broadcast %432 : vector<1x256xf32> to vector<4x256xf32>
    %435 = arith.mulf %433, %434 : vector<4x256xf32>
    %436 = arith.addf %426, %435 : vector<4x256xf32>
    %c0_131 = arith.constant 0 : index
    %c25_132 = arith.constant 25 : index
    %437 = vector.load %arg4[%c0_131, %c25_132] : memref<4x36xf32, #tpu.memory_space<vmem>>, vector<4x1xf32>
    %438 = vector.extract_strided_slice %430 {offsets = [1, 0], sizes = [1, 256], strides = [1, 1]} : vector<4x256xf32> to vector<1x256xf32>
    %439 = vector.broadcast %437 : vector<4x1xf32> to vector<4x256xf32>
    %440 = vector.broadcast %438 : vector<1x256xf32> to vector<4x256xf32>
    %441 = arith.mulf %439, %440 : vector<4x256xf32>
    %442 = arith.addf %436, %441 : vector<4x256xf32>
    %c0_133 = arith.constant 0 : index
    %c26_134 = arith.constant 26 : index
    %443 = vector.load %arg4[%c0_133, %c26_134] : memref<4x36xf32, #tpu.memory_space<vmem>>, vector<4x1xf32>
    %444 = vector.extract_strided_slice %430 {offsets = [2, 0], sizes = [1, 256], strides = [1, 1]} : vector<4x256xf32> to vector<1x256xf32>
    %445 = vector.broadcast %443 : vector<4x1xf32> to vector<4x256xf32>
    %446 = vector.broadcast %444 : vector<1x256xf32> to vector<4x256xf32>
    %447 = arith.mulf %445, %446 : vector<4x256xf32>
    %448 = arith.addf %442, %447 : vector<4x256xf32>
    %c0_135 = arith.constant 0 : index
    %c27_136 = arith.constant 27 : index
    %449 = vector.load %arg4[%c0_135, %c27_136] : memref<4x36xf32, #tpu.memory_space<vmem>>, vector<4x1xf32>
    %450 = vector.extract_strided_slice %430 {offsets = [3, 0], sizes = [1, 256], strides = [1, 1]} : vector<4x256xf32> to vector<1x256xf32>
    %451 = vector.broadcast %449 : vector<4x1xf32> to vector<4x256xf32>
    %452 = vector.broadcast %450 : vector<1x256xf32> to vector<4x256xf32>
    %453 = arith.mulf %451, %452 : vector<4x256xf32>
    %454 = arith.addf %448, %453 : vector<4x256xf32>
    %c240_i32_137 = arith.constant 240 : i32
    %455 = tpu.dynamic_rotate %258 by %c240_i32_137 dim 1 : vector<4x256xf32>, i32 -> vector<4x256xf32>
    %c7_138 = arith.constant 7 : index
    %c0_139 = arith.constant 0 : index
    %456 = vector.load %arg6[%c7_138, %c0_139] : memref<9x256xf32, #tpu.memory_space<vmem>>, vector<1x256xf32>
    %457 = vector.broadcast %456 : vector<1x256xf32> to vector<4x256xf32>
    %458 = arith.mulf %455, %457 : vector<4x256xf32>
    %c0_140 = arith.constant 0 : index
    %c28_141 = arith.constant 28 : index
    %459 = vector.load %arg4[%c0_140, %c28_141] : memref<4x36xf32, #tpu.memory_space<vmem>>, vector<4x1xf32>
    %460 = vector.extract_strided_slice %458 {offsets = [0, 0], sizes = [1, 256], strides = [1, 1]} : vector<4x256xf32> to vector<1x256xf32>
    %461 = vector.broadcast %459 : vector<4x1xf32> to vector<4x256xf32>
    %462 = vector.broadcast %460 : vector<1x256xf32> to vector<4x256xf32>
    %463 = arith.mulf %461, %462 : vector<4x256xf32>
    %464 = arith.addf %454, %463 : vector<4x256xf32>
    %c0_142 = arith.constant 0 : index
    %c29_143 = arith.constant 29 : index
    %465 = vector.load %arg4[%c0_142, %c29_143] : memref<4x36xf32, #tpu.memory_space<vmem>>, vector<4x1xf32>
    %466 = vector.extract_strided_slice %458 {offsets = [1, 0], sizes = [1, 256], strides = [1, 1]} : vector<4x256xf32> to vector<1x256xf32>
    %467 = vector.broadcast %465 : vector<4x1xf32> to vector<4x256xf32>
    %468 = vector.broadcast %466 : vector<1x256xf32> to vector<4x256xf32>
    %469 = arith.mulf %467, %468 : vector<4x256xf32>
    %470 = arith.addf %464, %469 : vector<4x256xf32>
    %c0_144 = arith.constant 0 : index
    %c30_145 = arith.constant 30 : index
    %471 = vector.load %arg4[%c0_144, %c30_145] : memref<4x36xf32, #tpu.memory_space<vmem>>, vector<4x1xf32>
    %472 = vector.extract_strided_slice %458 {offsets = [2, 0], sizes = [1, 256], strides = [1, 1]} : vector<4x256xf32> to vector<1x256xf32>
    %473 = vector.broadcast %471 : vector<4x1xf32> to vector<4x256xf32>
    %474 = vector.broadcast %472 : vector<1x256xf32> to vector<4x256xf32>
    %475 = arith.mulf %473, %474 : vector<4x256xf32>
    %476 = arith.addf %470, %475 : vector<4x256xf32>
    %c0_146 = arith.constant 0 : index
    %c31_147 = arith.constant 31 : index
    %477 = vector.load %arg4[%c0_146, %c31_147] : memref<4x36xf32, #tpu.memory_space<vmem>>, vector<4x1xf32>
    %478 = vector.extract_strided_slice %458 {offsets = [3, 0], sizes = [1, 256], strides = [1, 1]} : vector<4x256xf32> to vector<1x256xf32>
    %479 = vector.broadcast %477 : vector<4x1xf32> to vector<4x256xf32>
    %480 = vector.broadcast %478 : vector<1x256xf32> to vector<4x256xf32>
    %481 = arith.mulf %479, %480 : vector<4x256xf32>
    %482 = arith.addf %476, %481 : vector<4x256xf32>
    %c239_i32_148 = arith.constant 239 : i32
    %483 = tpu.dynamic_rotate %258 by %c239_i32_148 dim 1 : vector<4x256xf32>, i32 -> vector<4x256xf32>
    %c8_149 = arith.constant 8 : index
    %c0_150 = arith.constant 0 : index
    %484 = vector.load %arg6[%c8_149, %c0_150] : memref<9x256xf32, #tpu.memory_space<vmem>>, vector<1x256xf32>
    %485 = vector.broadcast %484 : vector<1x256xf32> to vector<4x256xf32>
    %486 = arith.mulf %483, %485 : vector<4x256xf32>
    %c0_151 = arith.constant 0 : index
    %c32_152 = arith.constant 32 : index
    %487 = vector.load %arg4[%c0_151, %c32_152] : memref<4x36xf32, #tpu.memory_space<vmem>>, vector<4x1xf32>
    %488 = vector.extract_strided_slice %486 {offsets = [0, 0], sizes = [1, 256], strides = [1, 1]} : vector<4x256xf32> to vector<1x256xf32>
    %489 = vector.broadcast %487 : vector<4x1xf32> to vector<4x256xf32>
    %490 = vector.broadcast %488 : vector<1x256xf32> to vector<4x256xf32>
    %491 = arith.mulf %489, %490 : vector<4x256xf32>
    %492 = arith.addf %482, %491 : vector<4x256xf32>
    %c0_153 = arith.constant 0 : index
    %c33_154 = arith.constant 33 : index
    %493 = vector.load %arg4[%c0_153, %c33_154] : memref<4x36xf32, #tpu.memory_space<vmem>>, vector<4x1xf32>
    %494 = vector.extract_strided_slice %486 {offsets = [1, 0], sizes = [1, 256], strides = [1, 1]} : vector<4x256xf32> to vector<1x256xf32>
    %495 = vector.broadcast %493 : vector<4x1xf32> to vector<4x256xf32>
    %496 = vector.broadcast %494 : vector<1x256xf32> to vector<4x256xf32>
    %497 = arith.mulf %495, %496 : vector<4x256xf32>
    %498 = arith.addf %492, %497 : vector<4x256xf32>
    %c0_155 = arith.constant 0 : index
    %c34_156 = arith.constant 34 : index
    %499 = vector.load %arg4[%c0_155, %c34_156] : memref<4x36xf32, #tpu.memory_space<vmem>>, vector<4x1xf32>
    %500 = vector.extract_strided_slice %486 {offsets = [2, 0], sizes = [1, 256], strides = [1, 1]} : vector<4x256xf32> to vector<1x256xf32>
    %501 = vector.broadcast %499 : vector<4x1xf32> to vector<4x256xf32>
    %502 = vector.broadcast %500 : vector<1x256xf32> to vector<4x256xf32>
    %503 = arith.mulf %501, %502 : vector<4x256xf32>
    %504 = arith.addf %498, %503 : vector<4x256xf32>
    %c0_157 = arith.constant 0 : index
    %c35_158 = arith.constant 35 : index
    %505 = vector.load %arg4[%c0_157, %c35_158] : memref<4x36xf32, #tpu.memory_space<vmem>>, vector<4x1xf32>
    %506 = vector.extract_strided_slice %486 {offsets = [3, 0], sizes = [1, 256], strides = [1, 1]} : vector<4x256xf32> to vector<1x256xf32>
    %507 = vector.broadcast %505 : vector<4x1xf32> to vector<4x256xf32>
    %508 = vector.broadcast %506 : vector<1x256xf32> to vector<4x256xf32>
    %509 = arith.mulf %507, %508 : vector<4x256xf32>
    %510 = arith.addf %504, %509 : vector<4x256xf32>
    %c0_159 = arith.constant 0 : index
    %c0_160 = arith.constant 0 : index
    %511 = vector.load %arg5[%c0_159, %c0_160] : memref<4x1xf32, #tpu.memory_space<vmem>>, vector<4x1xf32>
    %512 = vector.broadcast %511 : vector<4x1xf32> to vector<4x256xf32>
    %513 = arith.addf %510, %512 : vector<4x256xf32>
    %514 = arith.addf %513, %1 : vector<4x256xf32>
    %cst_161 = arith.constant 0.000000e+00 : f32
    %515 = vector.broadcast %cst_161 : f32 to vector<4x256xf32>
    %516 = arith.maximumf %514, %515 : vector<4x256xf32>
    %c0_162 = arith.constant 0 : index
    %c0_163 = arith.constant 0 : index
    %c0_164 = arith.constant 0 : index
    %517 = vector.load %arg7[%c0_162, %c0_163, %c0_164] : memref<2x4x256xf32, #tpu.memory_space<vmem>>, vector<1x4x256xf32>
    %518 = vector.shape_cast %517 : vector<1x4x256xf32> to vector<4x256xf32>
    %519 = vector.shape_cast %516 : vector<4x256xf32> to vector<1x4x256xf32>
    tpu.vector_store %arg7[%c0_162, %c0_163, %c0_164], %519 {strides = array<i32>} : memref<2x4x256xf32, #tpu.memory_space<vmem>>, vector<1x4x256xf32>,
    %c1_165 = arith.constant 1 : index
    %c0_166 = arith.constant 0 : index
    %c0_167 = arith.constant 0 : index
    %520 = vector.load %arg1[%c1_165, %c0_166, %c0_167] : memref<2x4x256xf32, #tpu.memory_space<vmem>>, vector<1x4x256xf32>
    %521 = vector.shape_cast %520 : vector<1x4x256xf32> to vector<4x256xf32>
    %cst_168 = arith.constant 0.000000e+00 : f32
    %522 = vector.broadcast %cst_168 : f32 to vector<4x256xf32>
    %c17_i32_169 = arith.constant 17 : i32
    %523 = tpu.dynamic_rotate %521 by %c17_i32_169 dim 1 : vector<4x256xf32>, i32 -> vector<4x256xf32>
    %c0_170 = arith.constant 0 : index
    %c0_171 = arith.constant 0 : index
    %524 = vector.load %arg6[%c0_170, %c0_171] : memref<9x256xf32, #tpu.memory_space<vmem>>, vector<1x256xf32>
    %525 = vector.broadcast %524 : vector<1x256xf32> to vector<4x256xf32>
    %526 = arith.mulf %523, %525 : vector<4x256xf32>
    %c0_172 = arith.constant 0 : index
    %c0_173 = arith.constant 0 : index
    %527 = vector.load %arg2[%c0_172, %c0_173] : memref<4x36xf32, #tpu.memory_space<vmem>>, vector<4x1xf32>
    %528 = vector.extract_strided_slice %526 {offsets = [0, 0], sizes = [1, 256], strides = [1, 1]} : vector<4x256xf32> to vector<1x256xf32>
    %529 = vector.broadcast %527 : vector<4x1xf32> to vector<4x256xf32>
    %530 = vector.broadcast %528 : vector<1x256xf32> to vector<4x256xf32>
    %531 = arith.mulf %529, %530 : vector<4x256xf32>
    %532 = arith.addf %522, %531 : vector<4x256xf32>
    %c0_174 = arith.constant 0 : index
    %c1_175 = arith.constant 1 : index
    %533 = vector.load %arg2[%c0_174, %c1_175] : memref<4x36xf32, #tpu.memory_space<vmem>>, vector<4x1xf32>
    %534 = vector.extract_strided_slice %526 {offsets = [1, 0], sizes = [1, 256], strides = [1, 1]} : vector<4x256xf32> to vector<1x256xf32>
    %535 = vector.broadcast %533 : vector<4x1xf32> to vector<4x256xf32>
    %536 = vector.broadcast %534 : vector<1x256xf32> to vector<4x256xf32>
    %537 = arith.mulf %535, %536 : vector<4x256xf32>
    %538 = arith.addf %532, %537 : vector<4x256xf32>
    %c0_176 = arith.constant 0 : index
    %c2_177 = arith.constant 2 : index
    %539 = vector.load %arg2[%c0_176, %c2_177] : memref<4x36xf32, #tpu.memory_space<vmem>>, vector<4x1xf32>
    %540 = vector.extract_strided_slice %526 {offsets = [2, 0], sizes = [1, 256], strides = [1, 1]} : vector<4x256xf32> to vector<1x256xf32>
    %541 = vector.broadcast %539 : vector<4x1xf32> to vector<4x256xf32>
    %542 = vector.broadcast %540 : vector<1x256xf32> to vector<4x256xf32>
    %543 = arith.mulf %541, %542 : vector<4x256xf32>
    %544 = arith.addf %538, %543 : vector<4x256xf32>
    %c0_178 = arith.constant 0 : index
    %c3_179 = arith.constant 3 : index
    %545 = vector.load %arg2[%c0_178, %c3_179] : memref<4x36xf32, #tpu.memory_space<vmem>>, vector<4x1xf32>
    %546 = vector.extract_strided_slice %526 {offsets = [3, 0], sizes = [1, 256], strides = [1, 1]} : vector<4x256xf32> to vector<1x256xf32>
    %547 = vector.broadcast %545 : vector<4x1xf32> to vector<4x256xf32>
    %548 = vector.broadcast %546 : vector<1x256xf32> to vector<4x256xf32>
    %549 = arith.mulf %547, %548 : vector<4x256xf32>
    %550 = arith.addf %544, %549 : vector<4x256xf32>
    %c16_i32_180 = arith.constant 16 : i32
    %551 = tpu.dynamic_rotate %521 by %c16_i32_180 dim 1 : vector<4x256xf32>, i32 -> vector<4x256xf32>
    %c1_181 = arith.constant 1 : index
    %c0_182 = arith.constant 0 : index
    %552 = vector.load %arg6[%c1_181, %c0_182] : memref<9x256xf32, #tpu.memory_space<vmem>>, vector<1x256xf32>
    %553 = vector.broadcast %552 : vector<1x256xf32> to vector<4x256xf32>
    %554 = arith.mulf %551, %553 : vector<4x256xf32>
    %c0_183 = arith.constant 0 : index
    %c4_184 = arith.constant 4 : index
    %555 = vector.load %arg2[%c0_183, %c4_184] : memref<4x36xf32, #tpu.memory_space<vmem>>, vector<4x1xf32>
    %556 = vector.extract_strided_slice %554 {offsets = [0, 0], sizes = [1, 256], strides = [1, 1]} : vector<4x256xf32> to vector<1x256xf32>
    %557 = vector.broadcast %555 : vector<4x1xf32> to vector<4x256xf32>
    %558 = vector.broadcast %556 : vector<1x256xf32> to vector<4x256xf32>
    %559 = arith.mulf %557, %558 : vector<4x256xf32>
    %560 = arith.addf %550, %559 : vector<4x256xf32>
    %c0_185 = arith.constant 0 : index
    %c5_186 = arith.constant 5 : index
    %561 = vector.load %arg2[%c0_185, %c5_186] : memref<4x36xf32, #tpu.memory_space<vmem>>, vector<4x1xf32>
    %562 = vector.extract_strided_slice %554 {offsets = [1, 0], sizes = [1, 256], strides = [1, 1]} : vector<4x256xf32> to vector<1x256xf32>
    %563 = vector.broadcast %561 : vector<4x1xf32> to vector<4x256xf32>
    %564 = vector.broadcast %562 : vector<1x256xf32> to vector<4x256xf32>
    %565 = arith.mulf %563, %564 : vector<4x256xf32>
    %566 = arith.addf %560, %565 : vector<4x256xf32>
    %c0_187 = arith.constant 0 : index
    %c6_188 = arith.constant 6 : index
    %567 = vector.load %arg2[%c0_187, %c6_188] : memref<4x36xf32, #tpu.memory_space<vmem>>, vector<4x1xf32>
    %568 = vector.extract_strided_slice %554 {offsets = [2, 0], sizes = [1, 256], strides = [1, 1]} : vector<4x256xf32> to vector<1x256xf32>
    %569 = vector.broadcast %567 : vector<4x1xf32> to vector<4x256xf32>
    %570 = vector.broadcast %568 : vector<1x256xf32> to vector<4x256xf32>
    %571 = arith.mulf %569, %570 : vector<4x256xf32>
    %572 = arith.addf %566, %571 : vector<4x256xf32>
    %c0_189 = arith.constant 0 : index
    %c7_190 = arith.constant 7 : index
    %573 = vector.load %arg2[%c0_189, %c7_190] : memref<4x36xf32, #tpu.memory_space<vmem>>, vector<4x1xf32>
    %574 = vector.extract_strided_slice %554 {offsets = [3, 0], sizes = [1, 256], strides = [1, 1]} : vector<4x256xf32> to vector<1x256xf32>
    %575 = vector.broadcast %573 : vector<4x1xf32> to vector<4x256xf32>
    %576 = vector.broadcast %574 : vector<1x256xf32> to vector<4x256xf32>
    %577 = arith.mulf %575, %576 : vector<4x256xf32>
    %578 = arith.addf %572, %577 : vector<4x256xf32>
    %c15_i32_191 = arith.constant 15 : i32
    %579 = tpu.dynamic_rotate %521 by %c15_i32_191 dim 1 : vector<4x256xf32>, i32 -> vector<4x256xf32>
    %c2_192 = arith.constant 2 : index
    %c0_193 = arith.constant 0 : index
    %580 = vector.load %arg6[%c2_192, %c0_193] : memref<9x256xf32, #tpu.memory_space<vmem>>, vector<1x256xf32>
    %581 = vector.broadcast %580 : vector<1x256xf32> to vector<4x256xf32>
    %582 = arith.mulf %579, %581 : vector<4x256xf32>
    %c0_194 = arith.constant 0 : index
    %c8_195 = arith.constant 8 : index
    %583 = vector.load %arg2[%c0_194, %c8_195] : memref<4x36xf32, #tpu.memory_space<vmem>>, vector<4x1xf32>
    %584 = vector.extract_strided_slice %582 {offsets = [0, 0], sizes = [1, 256], strides = [1, 1]} : vector<4x256xf32> to vector<1x256xf32>
    %585 = vector.broadcast %583 : vector<4x1xf32> to vector<4x256xf32>
    %586 = vector.broadcast %584 : vector<1x256xf32> to vector<4x256xf32>
    %587 = arith.mulf %585, %586 : vector<4x256xf32>
    %588 = arith.addf %578, %587 : vector<4x256xf32>
    %c0_196 = arith.constant 0 : index
    %c9_197 = arith.constant 9 : index
    %589 = vector.load %arg2[%c0_196, %c9_197] : memref<4x36xf32, #tpu.memory_space<vmem>>, vector<4x1xf32>
    %590 = vector.extract_strided_slice %582 {offsets = [1, 0], sizes = [1, 256], strides = [1, 1]} : vector<4x256xf32> to vector<1x256xf32>
    %591 = vector.broadcast %589 : vector<4x1xf32> to vector<4x256xf32>
    %592 = vector.broadcast %590 : vector<1x256xf32> to vector<4x256xf32>
    %593 = arith.mulf %591, %592 : vector<4x256xf32>
    %594 = arith.addf %588, %593 : vector<4x256xf32>
    %c0_198 = arith.constant 0 : index
    %c10_199 = arith.constant 10 : index
    %595 = vector.load %arg2[%c0_198, %c10_199] : memref<4x36xf32, #tpu.memory_space<vmem>>, vector<4x1xf32>
    %596 = vector.extract_strided_slice %582 {offsets = [2, 0], sizes = [1, 256], strides = [1, 1]} : vector<4x256xf32> to vector<1x256xf32>
    %597 = vector.broadcast %595 : vector<4x1xf32> to vector<4x256xf32>
    %598 = vector.broadcast %596 : vector<1x256xf32> to vector<4x256xf32>
    %599 = arith.mulf %597, %598 : vector<4x256xf32>
    %600 = arith.addf %594, %599 : vector<4x256xf32>
    %c0_200 = arith.constant 0 : index
    %c11_201 = arith.constant 11 : index
    %601 = vector.load %arg2[%c0_200, %c11_201] : memref<4x36xf32, #tpu.memory_space<vmem>>, vector<4x1xf32>
    %602 = vector.extract_strided_slice %582 {offsets = [3, 0], sizes = [1, 256], strides = [1, 1]} : vector<4x256xf32> to vector<1x256xf32>
    %603 = vector.broadcast %601 : vector<4x1xf32> to vector<4x256xf32>
    %604 = vector.broadcast %602 : vector<1x256xf32> to vector<4x256xf32>
    %605 = arith.mulf %603, %604 : vector<4x256xf32>
    %606 = arith.addf %600, %605 : vector<4x256xf32>
    %c1_i32_202 = arith.constant 1 : i32
    %607 = tpu.dynamic_rotate %521 by %c1_i32_202 dim 1 : vector<4x256xf32>, i32 -> vector<4x256xf32>
    %c3_203 = arith.constant 3 : index
    %c0_204 = arith.constant 0 : index
    %608 = vector.load %arg6[%c3_203, %c0_204] : memref<9x256xf32, #tpu.memory_space<vmem>>, vector<1x256xf32>
    %609 = vector.broadcast %608 : vector<1x256xf32> to vector<4x256xf32>
    %610 = arith.mulf %607, %609 : vector<4x256xf32>
    %c0_205 = arith.constant 0 : index
    %c12_206 = arith.constant 12 : index
    %611 = vector.load %arg2[%c0_205, %c12_206] : memref<4x36xf32, #tpu.memory_space<vmem>>, vector<4x1xf32>
    %612 = vector.extract_strided_slice %610 {offsets = [0, 0], sizes = [1, 256], strides = [1, 1]} : vector<4x256xf32> to vector<1x256xf32>
    %613 = vector.broadcast %611 : vector<4x1xf32> to vector<4x256xf32>
    %614 = vector.broadcast %612 : vector<1x256xf32> to vector<4x256xf32>
    %615 = arith.mulf %613, %614 : vector<4x256xf32>
    %616 = arith.addf %606, %615 : vector<4x256xf32>
    %c0_207 = arith.constant 0 : index
    %c13_208 = arith.constant 13 : index
    %617 = vector.load %arg2[%c0_207, %c13_208] : memref<4x36xf32, #tpu.memory_space<vmem>>, vector<4x1xf32>
    %618 = vector.extract_strided_slice %610 {offsets = [1, 0], sizes = [1, 256], strides = [1, 1]} : vector<4x256xf32> to vector<1x256xf32>
    %619 = vector.broadcast %617 : vector<4x1xf32> to vector<4x256xf32>
    %620 = vector.broadcast %618 : vector<1x256xf32> to vector<4x256xf32>
    %621 = arith.mulf %619, %620 : vector<4x256xf32>
    %622 = arith.addf %616, %621 : vector<4x256xf32>
    %c0_209 = arith.constant 0 : index
    %c14_210 = arith.constant 14 : index
    %623 = vector.load %arg2[%c0_209, %c14_210] : memref<4x36xf32, #tpu.memory_space<vmem>>, vector<4x1xf32>
    %624 = vector.extract_strided_slice %610 {offsets = [2, 0], sizes = [1, 256], strides = [1, 1]} : vector<4x256xf32> to vector<1x256xf32>
    %625 = vector.broadcast %623 : vector<4x1xf32> to vector<4x256xf32>
    %626 = vector.broadcast %624 : vector<1x256xf32> to vector<4x256xf32>
    %627 = arith.mulf %625, %626 : vector<4x256xf32>
    %628 = arith.addf %622, %627 : vector<4x256xf32>
    %c0_211 = arith.constant 0 : index
    %c15_212 = arith.constant 15 : index
    %629 = vector.load %arg2[%c0_211, %c15_212] : memref<4x36xf32, #tpu.memory_space<vmem>>, vector<4x1xf32>
    %630 = vector.extract_strided_slice %610 {offsets = [3, 0], sizes = [1, 256], strides = [1, 1]} : vector<4x256xf32> to vector<1x256xf32>
    %631 = vector.broadcast %629 : vector<4x1xf32> to vector<4x256xf32>
    %632 = vector.broadcast %630 : vector<1x256xf32> to vector<4x256xf32>
    %633 = arith.mulf %631, %632 : vector<4x256xf32>
    %634 = arith.addf %628, %633 : vector<4x256xf32>
    %c4_213 = arith.constant 4 : index
    %c0_214 = arith.constant 0 : index
    %635 = vector.load %arg6[%c4_213, %c0_214] : memref<9x256xf32, #tpu.memory_space<vmem>>, vector<1x256xf32>
    %636 = vector.broadcast %635 : vector<1x256xf32> to vector<4x256xf32>
    %637 = arith.mulf %521, %636 : vector<4x256xf32>
    %c0_215 = arith.constant 0 : index
    %c16_216 = arith.constant 16 : index
    %638 = vector.load %arg2[%c0_215, %c16_216] : memref<4x36xf32, #tpu.memory_space<vmem>>, vector<4x1xf32>
    %639 = vector.extract_strided_slice %637 {offsets = [0, 0], sizes = [1, 256], strides = [1, 1]} : vector<4x256xf32> to vector<1x256xf32>
    %640 = vector.broadcast %638 : vector<4x1xf32> to vector<4x256xf32>
    %641 = vector.broadcast %639 : vector<1x256xf32> to vector<4x256xf32>
    %642 = arith.mulf %640, %641 : vector<4x256xf32>
    %643 = arith.addf %634, %642 : vector<4x256xf32>
    %c0_217 = arith.constant 0 : index
    %c17_218 = arith.constant 17 : index
    %644 = vector.load %arg2[%c0_217, %c17_218] : memref<4x36xf32, #tpu.memory_space<vmem>>, vector<4x1xf32>
    %645 = vector.extract_strided_slice %637 {offsets = [1, 0], sizes = [1, 256], strides = [1, 1]} : vector<4x256xf32> to vector<1x256xf32>
    %646 = vector.broadcast %644 : vector<4x1xf32> to vector<4x256xf32>
    %647 = vector.broadcast %645 : vector<1x256xf32> to vector<4x256xf32>
    %648 = arith.mulf %646, %647 : vector<4x256xf32>
    %649 = arith.addf %643, %648 : vector<4x256xf32>
    %c0_219 = arith.constant 0 : index
    %c18_220 = arith.constant 18 : index
    %650 = vector.load %arg2[%c0_219, %c18_220] : memref<4x36xf32, #tpu.memory_space<vmem>>, vector<4x1xf32>
    %651 = vector.extract_strided_slice %637 {offsets = [2, 0], sizes = [1, 256], strides = [1, 1]} : vector<4x256xf32> to vector<1x256xf32>
    %652 = vector.broadcast %650 : vector<4x1xf32> to vector<4x256xf32>
    %653 = vector.broadcast %651 : vector<1x256xf32> to vector<4x256xf32>
    %654 = arith.mulf %652, %653 : vector<4x256xf32>
    %655 = arith.addf %649, %654 : vector<4x256xf32>
    %c0_221 = arith.constant 0 : index
    %c19_222 = arith.constant 19 : index
    %656 = vector.load %arg2[%c0_221, %c19_222] : memref<4x36xf32, #tpu.memory_space<vmem>>, vector<4x1xf32>
    %657 = vector.extract_strided_slice %637 {offsets = [3, 0], sizes = [1, 256], strides = [1, 1]} : vector<4x256xf32> to vector<1x256xf32>
    %658 = vector.broadcast %656 : vector<4x1xf32> to vector<4x256xf32>
    %659 = vector.broadcast %657 : vector<1x256xf32> to vector<4x256xf32>
    %660 = arith.mulf %658, %659 : vector<4x256xf32>
    %661 = arith.addf %655, %660 : vector<4x256xf32>
    %c255_i32_223 = arith.constant 255 : i32
    %662 = tpu.dynamic_rotate %521 by %c255_i32_223 dim 1 : vector<4x256xf32>, i32 -> vector<4x256xf32>
    %c5_224 = arith.constant 5 : index
    %c0_225 = arith.constant 0 : index
    %663 = vector.load %arg6[%c5_224, %c0_225] : memref<9x256xf32, #tpu.memory_space<vmem>>, vector<1x256xf32>
    %664 = vector.broadcast %663 : vector<1x256xf32> to vector<4x256xf32>
    %665 = arith.mulf %662, %664 : vector<4x256xf32>
    %c0_226 = arith.constant 0 : index
    %c20_227 = arith.constant 20 : index
    %666 = vector.load %arg2[%c0_226, %c20_227] : memref<4x36xf32, #tpu.memory_space<vmem>>, vector<4x1xf32>
    %667 = vector.extract_strided_slice %665 {offsets = [0, 0], sizes = [1, 256], strides = [1, 1]} : vector<4x256xf32> to vector<1x256xf32>
    %668 = vector.broadcast %666 : vector<4x1xf32> to vector<4x256xf32>
    %669 = vector.broadcast %667 : vector<1x256xf32> to vector<4x256xf32>
    %670 = arith.mulf %668, %669 : vector<4x256xf32>
    %671 = arith.addf %661, %670 : vector<4x256xf32>
    %c0_228 = arith.constant 0 : index
    %c21_229 = arith.constant 21 : index
    %672 = vector.load %arg2[%c0_228, %c21_229] : memref<4x36xf32, #tpu.memory_space<vmem>>, vector<4x1xf32>
    %673 = vector.extract_strided_slice %665 {offsets = [1, 0], sizes = [1, 256], strides = [1, 1]} : vector<4x256xf32> to vector<1x256xf32>
    %674 = vector.broadcast %672 : vector<4x1xf32> to vector<4x256xf32>
    %675 = vector.broadcast %673 : vector<1x256xf32> to vector<4x256xf32>
    %676 = arith.mulf %674, %675 : vector<4x256xf32>
    %677 = arith.addf %671, %676 : vector<4x256xf32>
    %c0_230 = arith.constant 0 : index
    %c22_231 = arith.constant 22 : index
    %678 = vector.load %arg2[%c0_230, %c22_231] : memref<4x36xf32, #tpu.memory_space<vmem>>, vector<4x1xf32>
    %679 = vector.extract_strided_slice %665 {offsets = [2, 0], sizes = [1, 256], strides = [1, 1]} : vector<4x256xf32> to vector<1x256xf32>
    %680 = vector.broadcast %678 : vector<4x1xf32> to vector<4x256xf32>
    %681 = vector.broadcast %679 : vector<1x256xf32> to vector<4x256xf32>
    %682 = arith.mulf %680, %681 : vector<4x256xf32>
    %683 = arith.addf %677, %682 : vector<4x256xf32>
    %c0_232 = arith.constant 0 : index
    %c23_233 = arith.constant 23 : index
    %684 = vector.load %arg2[%c0_232, %c23_233] : memref<4x36xf32, #tpu.memory_space<vmem>>, vector<4x1xf32>
    %685 = vector.extract_strided_slice %665 {offsets = [3, 0], sizes = [1, 256], strides = [1, 1]} : vector<4x256xf32> to vector<1x256xf32>
    %686 = vector.broadcast %684 : vector<4x1xf32> to vector<4x256xf32>
    %687 = vector.broadcast %685 : vector<1x256xf32> to vector<4x256xf32>
    %688 = arith.mulf %686, %687 : vector<4x256xf32>
    %689 = arith.addf %683, %688 : vector<4x256xf32>
    %c241_i32_234 = arith.constant 241 : i32
    %690 = tpu.dynamic_rotate %521 by %c241_i32_234 dim 1 : vector<4x256xf32>, i32 -> vector<4x256xf32>
    %c6_235 = arith.constant 6 : index
    %c0_236 = arith.constant 0 : index
    %691 = vector.load %arg6[%c6_235, %c0_236] : memref<9x256xf32, #tpu.memory_space<vmem>>, vector<1x256xf32>
    %692 = vector.broadcast %691 : vector<1x256xf32> to vector<4x256xf32>
    %693 = arith.mulf %690, %692 : vector<4x256xf32>
    %c0_237 = arith.constant 0 : index
    %c24_238 = arith.constant 24 : index
    %694 = vector.load %arg2[%c0_237, %c24_238] : memref<4x36xf32, #tpu.memory_space<vmem>>, vector<4x1xf32>
    %695 = vector.extract_strided_slice %693 {offsets = [0, 0], sizes = [1, 256], strides = [1, 1]} : vector<4x256xf32> to vector<1x256xf32>
    %696 = vector.broadcast %694 : vector<4x1xf32> to vector<4x256xf32>
    %697 = vector.broadcast %695 : vector<1x256xf32> to vector<4x256xf32>
    %698 = arith.mulf %696, %697 : vector<4x256xf32>
    %699 = arith.addf %689, %698 : vector<4x256xf32>
    %c0_239 = arith.constant 0 : index
    %c25_240 = arith.constant 25 : index
    %700 = vector.load %arg2[%c0_239, %c25_240] : memref<4x36xf32, #tpu.memory_space<vmem>>, vector<4x1xf32>
    %701 = vector.extract_strided_slice %693 {offsets = [1, 0], sizes = [1, 256], strides = [1, 1]} : vector<4x256xf32> to vector<1x256xf32>
    %702 = vector.broadcast %700 : vector<4x1xf32> to vector<4x256xf32>
    %703 = vector.broadcast %701 : vector<1x256xf32> to vector<4x256xf32>
    %704 = arith.mulf %702, %703 : vector<4x256xf32>
    %705 = arith.addf %699, %704 : vector<4x256xf32>
    %c0_241 = arith.constant 0 : index
    %c26_242 = arith.constant 26 : index
    %706 = vector.load %arg2[%c0_241, %c26_242] : memref<4x36xf32, #tpu.memory_space<vmem>>, vector<4x1xf32>
    %707 = vector.extract_strided_slice %693 {offsets = [2, 0], sizes = [1, 256], strides = [1, 1]} : vector<4x256xf32> to vector<1x256xf32>
    %708 = vector.broadcast %706 : vector<4x1xf32> to vector<4x256xf32>
    %709 = vector.broadcast %707 : vector<1x256xf32> to vector<4x256xf32>
    %710 = arith.mulf %708, %709 : vector<4x256xf32>
    %711 = arith.addf %705, %710 : vector<4x256xf32>
    %c0_243 = arith.constant 0 : index
    %c27_244 = arith.constant 27 : index
    %712 = vector.load %arg2[%c0_243, %c27_244] : memref<4x36xf32, #tpu.memory_space<vmem>>, vector<4x1xf32>
    %713 = vector.extract_strided_slice %693 {offsets = [3, 0], sizes = [1, 256], strides = [1, 1]} : vector<4x256xf32> to vector<1x256xf32>
    %714 = vector.broadcast %712 : vector<4x1xf32> to vector<4x256xf32>
    %715 = vector.broadcast %713 : vector<1x256xf32> to vector<4x256xf32>
    %716 = arith.mulf %714, %715 : vector<4x256xf32>
    %717 = arith.addf %711, %716 : vector<4x256xf32>
    %c240_i32_245 = arith.constant 240 : i32
    %718 = tpu.dynamic_rotate %521 by %c240_i32_245 dim 1 : vector<4x256xf32>, i32 -> vector<4x256xf32>
    %c7_246 = arith.constant 7 : index
    %c0_247 = arith.constant 0 : index
    %719 = vector.load %arg6[%c7_246, %c0_247] : memref<9x256xf32, #tpu.memory_space<vmem>>, vector<1x256xf32>
    %720 = vector.broadcast %719 : vector<1x256xf32> to vector<4x256xf32>
    %721 = arith.mulf %718, %720 : vector<4x256xf32>
    %c0_248 = arith.constant 0 : index
    %c28_249 = arith.constant 28 : index
    %722 = vector.load %arg2[%c0_248, %c28_249] : memref<4x36xf32, #tpu.memory_space<vmem>>, vector<4x1xf32>
    %723 = vector.extract_strided_slice %721 {offsets = [0, 0], sizes = [1, 256], strides = [1, 1]} : vector<4x256xf32> to vector<1x256xf32>
    %724 = vector.broadcast %722 : vector<4x1xf32> to vector<4x256xf32>
    %725 = vector.broadcast %723 : vector<1x256xf32> to vector<4x256xf32>
    %726 = arith.mulf %724, %725 : vector<4x256xf32>
    %727 = arith.addf %717, %726 : vector<4x256xf32>
    %c0_250 = arith.constant 0 : index
    %c29_251 = arith.constant 29 : index
    %728 = vector.load %arg2[%c0_250, %c29_251] : memref<4x36xf32, #tpu.memory_space<vmem>>, vector<4x1xf32>
    %729 = vector.extract_strided_slice %721 {offsets = [1, 0], sizes = [1, 256], strides = [1, 1]} : vector<4x256xf32> to vector<1x256xf32>
    %730 = vector.broadcast %728 : vector<4x1xf32> to vector<4x256xf32>
    %731 = vector.broadcast %729 : vector<1x256xf32> to vector<4x256xf32>
    %732 = arith.mulf %730, %731 : vector<4x256xf32>
    %733 = arith.addf %727, %732 : vector<4x256xf32>
    %c0_252 = arith.constant 0 : index
    %c30_253 = arith.constant 30 : index
    %734 = vector.load %arg2[%c0_252, %c30_253] : memref<4x36xf32, #tpu.memory_space<vmem>>, vector<4x1xf32>
    %735 = vector.extract_strided_slice %721 {offsets = [2, 0], sizes = [1, 256], strides = [1, 1]} : vector<4x256xf32> to vector<1x256xf32>
    %736 = vector.broadcast %734 : vector<4x1xf32> to vector<4x256xf32>
    %737 = vector.broadcast %735 : vector<1x256xf32> to vector<4x256xf32>
    %738 = arith.mulf %736, %737 : vector<4x256xf32>
    %739 = arith.addf %733, %738 : vector<4x256xf32>
    %c0_254 = arith.constant 0 : index
    %c31_255 = arith.constant 31 : index
    %740 = vector.load %arg2[%c0_254, %c31_255] : memref<4x36xf32, #tpu.memory_space<vmem>>, vector<4x1xf32>
    %741 = vector.extract_strided_slice %721 {offsets = [3, 0], sizes = [1, 256], strides = [1, 1]} : vector<4x256xf32> to vector<1x256xf32>
    %742 = vector.broadcast %740 : vector<4x1xf32> to vector<4x256xf32>
    %743 = vector.broadcast %741 : vector<1x256xf32> to vector<4x256xf32>
    %744 = arith.mulf %742, %743 : vector<4x256xf32>
    %745 = arith.addf %739, %744 : vector<4x256xf32>
    %c239_i32_256 = arith.constant 239 : i32
    %746 = tpu.dynamic_rotate %521 by %c239_i32_256 dim 1 : vector<4x256xf32>, i32 -> vector<4x256xf32>
    %c8_257 = arith.constant 8 : index
    %c0_258 = arith.constant 0 : index
    %747 = vector.load %arg6[%c8_257, %c0_258] : memref<9x256xf32, #tpu.memory_space<vmem>>, vector<1x256xf32>
    %748 = vector.broadcast %747 : vector<1x256xf32> to vector<4x256xf32>
    %749 = arith.mulf %746, %748 : vector<4x256xf32>
    %c0_259 = arith.constant 0 : index
    %c32_260 = arith.constant 32 : index
    %750 = vector.load %arg2[%c0_259, %c32_260] : memref<4x36xf32, #tpu.memory_space<vmem>>, vector<4x1xf32>
    %751 = vector.extract_strided_slice %749 {offsets = [0, 0], sizes = [1, 256], strides = [1, 1]} : vector<4x256xf32> to vector<1x256xf32>
    %752 = vector.broadcast %750 : vector<4x1xf32> to vector<4x256xf32>
    %753 = vector.broadcast %751 : vector<1x256xf32> to vector<4x256xf32>
    %754 = arith.mulf %752, %753 : vector<4x256xf32>
    %755 = arith.addf %745, %754 : vector<4x256xf32>
    %c0_261 = arith.constant 0 : index
    %c33_262 = arith.constant 33 : index
    %756 = vector.load %arg2[%c0_261, %c33_262] : memref<4x36xf32, #tpu.memory_space<vmem>>, vector<4x1xf32>
    %757 = vector.extract_strided_slice %749 {offsets = [1, 0], sizes = [1, 256], strides = [1, 1]} : vector<4x256xf32> to vector<1x256xf32>
    %758 = vector.broadcast %756 : vector<4x1xf32> to vector<4x256xf32>
    %759 = vector.broadcast %757 : vector<1x256xf32> to vector<4x256xf32>
    %760 = arith.mulf %758, %759 : vector<4x256xf32>
    %761 = arith.addf %755, %760 : vector<4x256xf32>
    %c0_263 = arith.constant 0 : index
    %c34_264 = arith.constant 34 : index
    %762 = vector.load %arg2[%c0_263, %c34_264] : memref<4x36xf32, #tpu.memory_space<vmem>>, vector<4x1xf32>
    %763 = vector.extract_strided_slice %749 {offsets = [2, 0], sizes = [1, 256], strides = [1, 1]} : vector<4x256xf32> to vector<1x256xf32>
    %764 = vector.broadcast %762 : vector<4x1xf32> to vector<4x256xf32>
    %765 = vector.broadcast %763 : vector<1x256xf32> to vector<4x256xf32>
    %766 = arith.mulf %764, %765 : vector<4x256xf32>
    %767 = arith.addf %761, %766 : vector<4x256xf32>
    %c0_265 = arith.constant 0 : index
    %c35_266 = arith.constant 35 : index
    %768 = vector.load %arg2[%c0_265, %c35_266] : memref<4x36xf32, #tpu.memory_space<vmem>>, vector<4x1xf32>
    %769 = vector.extract_strided_slice %749 {offsets = [3, 0], sizes = [1, 256], strides = [1, 1]} : vector<4x256xf32> to vector<1x256xf32>
    %770 = vector.broadcast %768 : vector<4x1xf32> to vector<4x256xf32>
    %771 = vector.broadcast %769 : vector<1x256xf32> to vector<4x256xf32>
    %772 = arith.mulf %770, %771 : vector<4x256xf32>
    %773 = arith.addf %767, %772 : vector<4x256xf32>
    %c0_267 = arith.constant 0 : index
    %c0_268 = arith.constant 0 : index
    %774 = vector.load %arg3[%c0_267, %c0_268] : memref<4x1xf32, #tpu.memory_space<vmem>>, vector<4x1xf32>
    %775 = vector.broadcast %774 : vector<4x1xf32> to vector<4x256xf32>
    %776 = arith.addf %773, %775 : vector<4x256xf32>
    %cst_269 = arith.constant 0.000000e+00 : f32
    %777 = vector.broadcast %cst_269 : f32 to vector<4x256xf32>
    %778 = arith.maximumf %776, %777 : vector<4x256xf32>
    %cst_270 = arith.constant 0.000000e+00 : f32
    %779 = vector.broadcast %cst_270 : f32 to vector<4x256xf32>
    %c17_i32_271 = arith.constant 17 : i32
    %780 = tpu.dynamic_rotate %778 by %c17_i32_271 dim 1 : vector<4x256xf32>, i32 -> vector<4x256xf32>
    %c0_272 = arith.constant 0 : index
    %c0_273 = arith.constant 0 : index
    %781 = vector.load %arg6[%c0_272, %c0_273] : memref<9x256xf32, #tpu.memory_space<vmem>>, vector<1x256xf32>
    %782 = vector.broadcast %781 : vector<1x256xf32> to vector<4x256xf32>
    %783 = arith.mulf %780, %782 : vector<4x256xf32>
    %c0_274 = arith.constant 0 : index
    %c0_275 = arith.constant 0 : index
    %784 = vector.load %arg4[%c0_274, %c0_275] : memref<4x36xf32, #tpu.memory_space<vmem>>, vector<4x1xf32>
    %785 = vector.extract_strided_slice %783 {offsets = [0, 0], sizes = [1, 256], strides = [1, 1]} : vector<4x256xf32> to vector<1x256xf32>
    %786 = vector.broadcast %784 : vector<4x1xf32> to vector<4x256xf32>
    %787 = vector.broadcast %785 : vector<1x256xf32> to vector<4x256xf32>
    %788 = arith.mulf %786, %787 : vector<4x256xf32>
    %789 = arith.addf %779, %788 : vector<4x256xf32>
    %c0_276 = arith.constant 0 : index
    %c1_277 = arith.constant 1 : index
    %790 = vector.load %arg4[%c0_276, %c1_277] : memref<4x36xf32, #tpu.memory_space<vmem>>, vector<4x1xf32>
    %791 = vector.extract_strided_slice %783 {offsets = [1, 0], sizes = [1, 256], strides = [1, 1]} : vector<4x256xf32> to vector<1x256xf32>
    %792 = vector.broadcast %790 : vector<4x1xf32> to vector<4x256xf32>
    %793 = vector.broadcast %791 : vector<1x256xf32> to vector<4x256xf32>
    %794 = arith.mulf %792, %793 : vector<4x256xf32>
    %795 = arith.addf %789, %794 : vector<4x256xf32>
    %c0_278 = arith.constant 0 : index
    %c2_279 = arith.constant 2 : index
    %796 = vector.load %arg4[%c0_278, %c2_279] : memref<4x36xf32, #tpu.memory_space<vmem>>, vector<4x1xf32>
    %797 = vector.extract_strided_slice %783 {offsets = [2, 0], sizes = [1, 256], strides = [1, 1]} : vector<4x256xf32> to vector<1x256xf32>
    %798 = vector.broadcast %796 : vector<4x1xf32> to vector<4x256xf32>
    %799 = vector.broadcast %797 : vector<1x256xf32> to vector<4x256xf32>
    %800 = arith.mulf %798, %799 : vector<4x256xf32>
    %801 = arith.addf %795, %800 : vector<4x256xf32>
    %c0_280 = arith.constant 0 : index
    %c3_281 = arith.constant 3 : index
    %802 = vector.load %arg4[%c0_280, %c3_281] : memref<4x36xf32, #tpu.memory_space<vmem>>, vector<4x1xf32>
    %803 = vector.extract_strided_slice %783 {offsets = [3, 0], sizes = [1, 256], strides = [1, 1]} : vector<4x256xf32> to vector<1x256xf32>
    %804 = vector.broadcast %802 : vector<4x1xf32> to vector<4x256xf32>
    %805 = vector.broadcast %803 : vector<1x256xf32> to vector<4x256xf32>
    %806 = arith.mulf %804, %805 : vector<4x256xf32>
    %807 = arith.addf %801, %806 : vector<4x256xf32>
    %c16_i32_282 = arith.constant 16 : i32
    %808 = tpu.dynamic_rotate %778 by %c16_i32_282 dim 1 : vector<4x256xf32>, i32 -> vector<4x256xf32>
    %c1_283 = arith.constant 1 : index
    %c0_284 = arith.constant 0 : index
    %809 = vector.load %arg6[%c1_283, %c0_284] : memref<9x256xf32, #tpu.memory_space<vmem>>, vector<1x256xf32>
    %810 = vector.broadcast %809 : vector<1x256xf32> to vector<4x256xf32>
    %811 = arith.mulf %808, %810 : vector<4x256xf32>
    %c0_285 = arith.constant 0 : index
    %c4_286 = arith.constant 4 : index
    %812 = vector.load %arg4[%c0_285, %c4_286] : memref<4x36xf32, #tpu.memory_space<vmem>>, vector<4x1xf32>
    %813 = vector.extract_strided_slice %811 {offsets = [0, 0], sizes = [1, 256], strides = [1, 1]} : vector<4x256xf32> to vector<1x256xf32>
    %814 = vector.broadcast %812 : vector<4x1xf32> to vector<4x256xf32>
    %815 = vector.broadcast %813 : vector<1x256xf32> to vector<4x256xf32>
    %816 = arith.mulf %814, %815 : vector<4x256xf32>
    %817 = arith.addf %807, %816 : vector<4x256xf32>
    %c0_287 = arith.constant 0 : index
    %c5_288 = arith.constant 5 : index
    %818 = vector.load %arg4[%c0_287, %c5_288] : memref<4x36xf32, #tpu.memory_space<vmem>>, vector<4x1xf32>
    %819 = vector.extract_strided_slice %811 {offsets = [1, 0], sizes = [1, 256], strides = [1, 1]} : vector<4x256xf32> to vector<1x256xf32>
    %820 = vector.broadcast %818 : vector<4x1xf32> to vector<4x256xf32>
    %821 = vector.broadcast %819 : vector<1x256xf32> to vector<4x256xf32>
    %822 = arith.mulf %820, %821 : vector<4x256xf32>
    %823 = arith.addf %817, %822 : vector<4x256xf32>
    %c0_289 = arith.constant 0 : index
    %c6_290 = arith.constant 6 : index
    %824 = vector.load %arg4[%c0_289, %c6_290] : memref<4x36xf32, #tpu.memory_space<vmem>>, vector<4x1xf32>
    %825 = vector.extract_strided_slice %811 {offsets = [2, 0], sizes = [1, 256], strides = [1, 1]} : vector<4x256xf32> to vector<1x256xf32>
    %826 = vector.broadcast %824 : vector<4x1xf32> to vector<4x256xf32>
    %827 = vector.broadcast %825 : vector<1x256xf32> to vector<4x256xf32>
    %828 = arith.mulf %826, %827 : vector<4x256xf32>
    %829 = arith.addf %823, %828 : vector<4x256xf32>
    %c0_291 = arith.constant 0 : index
    %c7_292 = arith.constant 7 : index
    %830 = vector.load %arg4[%c0_291, %c7_292] : memref<4x36xf32, #tpu.memory_space<vmem>>, vector<4x1xf32>
    %831 = vector.extract_strided_slice %811 {offsets = [3, 0], sizes = [1, 256], strides = [1, 1]} : vector<4x256xf32> to vector<1x256xf32>
    %832 = vector.broadcast %830 : vector<4x1xf32> to vector<4x256xf32>
    %833 = vector.broadcast %831 : vector<1x256xf32> to vector<4x256xf32>
    %834 = arith.mulf %832, %833 : vector<4x256xf32>
    %835 = arith.addf %829, %834 : vector<4x256xf32>
    %c15_i32_293 = arith.constant 15 : i32
    %836 = tpu.dynamic_rotate %778 by %c15_i32_293 dim 1 : vector<4x256xf32>, i32 -> vector<4x256xf32>
    %c2_294 = arith.constant 2 : index
    %c0_295 = arith.constant 0 : index
    %837 = vector.load %arg6[%c2_294, %c0_295] : memref<9x256xf32, #tpu.memory_space<vmem>>, vector<1x256xf32>
    %838 = vector.broadcast %837 : vector<1x256xf32> to vector<4x256xf32>
    %839 = arith.mulf %836, %838 : vector<4x256xf32>
    %c0_296 = arith.constant 0 : index
    %c8_297 = arith.constant 8 : index
    %840 = vector.load %arg4[%c0_296, %c8_297] : memref<4x36xf32, #tpu.memory_space<vmem>>, vector<4x1xf32>
    %841 = vector.extract_strided_slice %839 {offsets = [0, 0], sizes = [1, 256], strides = [1, 1]} : vector<4x256xf32> to vector<1x256xf32>
    %842 = vector.broadcast %840 : vector<4x1xf32> to vector<4x256xf32>
    %843 = vector.broadcast %841 : vector<1x256xf32> to vector<4x256xf32>
    %844 = arith.mulf %842, %843 : vector<4x256xf32>
    %845 = arith.addf %835, %844 : vector<4x256xf32>
    %c0_298 = arith.constant 0 : index
    %c9_299 = arith.constant 9 : index
    %846 = vector.load %arg4[%c0_298, %c9_299] : memref<4x36xf32, #tpu.memory_space<vmem>>, vector<4x1xf32>
    %847 = vector.extract_strided_slice %839 {offsets = [1, 0], sizes = [1, 256], strides = [1, 1]} : vector<4x256xf32> to vector<1x256xf32>
    %848 = vector.broadcast %846 : vector<4x1xf32> to vector<4x256xf32>
    %849 = vector.broadcast %847 : vector<1x256xf32> to vector<4x256xf32>
    %850 = arith.mulf %848, %849 : vector<4x256xf32>
    %851 = arith.addf %845, %850 : vector<4x256xf32>
    %c0_300 = arith.constant 0 : index
    %c10_301 = arith.constant 10 : index
    %852 = vector.load %arg4[%c0_300, %c10_301] : memref<4x36xf32, #tpu.memory_space<vmem>>, vector<4x1xf32>
    %853 = vector.extract_strided_slice %839 {offsets = [2, 0], sizes = [1, 256], strides = [1, 1]} : vector<4x256xf32> to vector<1x256xf32>
    %854 = vector.broadcast %852 : vector<4x1xf32> to vector<4x256xf32>
    %855 = vector.broadcast %853 : vector<1x256xf32> to vector<4x256xf32>
    %856 = arith.mulf %854, %855 : vector<4x256xf32>
    %857 = arith.addf %851, %856 : vector<4x256xf32>
    %c0_302 = arith.constant 0 : index
    %c11_303 = arith.constant 11 : index
    %858 = vector.load %arg4[%c0_302, %c11_303] : memref<4x36xf32, #tpu.memory_space<vmem>>, vector<4x1xf32>
    %859 = vector.extract_strided_slice %839 {offsets = [3, 0], sizes = [1, 256], strides = [1, 1]} : vector<4x256xf32> to vector<1x256xf32>
    %860 = vector.broadcast %858 : vector<4x1xf32> to vector<4x256xf32>
    %861 = vector.broadcast %859 : vector<1x256xf32> to vector<4x256xf32>
    %862 = arith.mulf %860, %861 : vector<4x256xf32>
    %863 = arith.addf %857, %862 : vector<4x256xf32>
    %c1_i32_304 = arith.constant 1 : i32
    %864 = tpu.dynamic_rotate %778 by %c1_i32_304 dim 1 : vector<4x256xf32>, i32 -> vector<4x256xf32>
    %c3_305 = arith.constant 3 : index
    %c0_306 = arith.constant 0 : index
    %865 = vector.load %arg6[%c3_305, %c0_306] : memref<9x256xf32, #tpu.memory_space<vmem>>, vector<1x256xf32>
    %866 = vector.broadcast %865 : vector<1x256xf32> to vector<4x256xf32>
    %867 = arith.mulf %864, %866 : vector<4x256xf32>
    %c0_307 = arith.constant 0 : index
    %c12_308 = arith.constant 12 : index
    %868 = vector.load %arg4[%c0_307, %c12_308] : memref<4x36xf32, #tpu.memory_space<vmem>>, vector<4x1xf32>
    %869 = vector.extract_strided_slice %867 {offsets = [0, 0], sizes = [1, 256], strides = [1, 1]} : vector<4x256xf32> to vector<1x256xf32>
    %870 = vector.broadcast %868 : vector<4x1xf32> to vector<4x256xf32>
    %871 = vector.broadcast %869 : vector<1x256xf32> to vector<4x256xf32>
    %872 = arith.mulf %870, %871 : vector<4x256xf32>
    %873 = arith.addf %863, %872 : vector<4x256xf32>
    %c0_309 = arith.constant 0 : index
    %c13_310 = arith.constant 13 : index
    %874 = vector.load %arg4[%c0_309, %c13_310] : memref<4x36xf32, #tpu.memory_space<vmem>>, vector<4x1xf32>
    %875 = vector.extract_strided_slice %867 {offsets = [1, 0], sizes = [1, 256], strides = [1, 1]} : vector<4x256xf32> to vector<1x256xf32>
    %876 = vector.broadcast %874 : vector<4x1xf32> to vector<4x256xf32>
    %877 = vector.broadcast %875 : vector<1x256xf32> to vector<4x256xf32>
    %878 = arith.mulf %876, %877 : vector<4x256xf32>
    %879 = arith.addf %873, %878 : vector<4x256xf32>
    %c0_311 = arith.constant 0 : index
    %c14_312 = arith.constant 14 : index
    %880 = vector.load %arg4[%c0_311, %c14_312] : memref<4x36xf32, #tpu.memory_space<vmem>>, vector<4x1xf32>
    %881 = vector.extract_strided_slice %867 {offsets = [2, 0], sizes = [1, 256], strides = [1, 1]} : vector<4x256xf32> to vector<1x256xf32>
    %882 = vector.broadcast %880 : vector<4x1xf32> to vector<4x256xf32>
    %883 = vector.broadcast %881 : vector<1x256xf32> to vector<4x256xf32>
    %884 = arith.mulf %882, %883 : vector<4x256xf32>
    %885 = arith.addf %879, %884 : vector<4x256xf32>
    %c0_313 = arith.constant 0 : index
    %c15_314 = arith.constant 15 : index
    %886 = vector.load %arg4[%c0_313, %c15_314] : memref<4x36xf32, #tpu.memory_space<vmem>>, vector<4x1xf32>
    %887 = vector.extract_strided_slice %867 {offsets = [3, 0], sizes = [1, 256], strides = [1, 1]} : vector<4x256xf32> to vector<1x256xf32>
    %888 = vector.broadcast %886 : vector<4x1xf32> to vector<4x256xf32>
    %889 = vector.broadcast %887 : vector<1x256xf32> to vector<4x256xf32>
    %890 = arith.mulf %888, %889 : vector<4x256xf32>
    %891 = arith.addf %885, %890 : vector<4x256xf32>
    %c4_315 = arith.constant 4 : index
    %c0_316 = arith.constant 0 : index
    %892 = vector.load %arg6[%c4_315, %c0_316] : memref<9x256xf32, #tpu.memory_space<vmem>>, vector<1x256xf32>
    %893 = vector.broadcast %892 : vector<1x256xf32> to vector<4x256xf32>
    %894 = arith.mulf %778, %893 : vector<4x256xf32>
    %c0_317 = arith.constant 0 : index
    %c16_318 = arith.constant 16 : index
    %895 = vector.load %arg4[%c0_317, %c16_318] : memref<4x36xf32, #tpu.memory_space<vmem>>, vector<4x1xf32>
    %896 = vector.extract_strided_slice %894 {offsets = [0, 0], sizes = [1, 256], strides = [1, 1]} : vector<4x256xf32> to vector<1x256xf32>
    %897 = vector.broadcast %895 : vector<4x1xf32> to vector<4x256xf32>
    %898 = vector.broadcast %896 : vector<1x256xf32> to vector<4x256xf32>
    %899 = arith.mulf %897, %898 : vector<4x256xf32>
    %900 = arith.addf %891, %899 : vector<4x256xf32>
    %c0_319 = arith.constant 0 : index
    %c17_320 = arith.constant 17 : index
    %901 = vector.load %arg4[%c0_319, %c17_320] : memref<4x36xf32, #tpu.memory_space<vmem>>, vector<4x1xf32>
    %902 = vector.extract_strided_slice %894 {offsets = [1, 0], sizes = [1, 256], strides = [1, 1]} : vector<4x256xf32> to vector<1x256xf32>
    %903 = vector.broadcast %901 : vector<4x1xf32> to vector<4x256xf32>
    %904 = vector.broadcast %902 : vector<1x256xf32> to vector<4x256xf32>
    %905 = arith.mulf %903, %904 : vector<4x256xf32>
    %906 = arith.addf %900, %905 : vector<4x256xf32>
    %c0_321 = arith.constant 0 : index
    %c18_322 = arith.constant 18 : index
    %907 = vector.load %arg4[%c0_321, %c18_322] : memref<4x36xf32, #tpu.memory_space<vmem>>, vector<4x1xf32>
    %908 = vector.extract_strided_slice %894 {offsets = [2, 0], sizes = [1, 256], strides = [1, 1]} : vector<4x256xf32> to vector<1x256xf32>
    %909 = vector.broadcast %907 : vector<4x1xf32> to vector<4x256xf32>
    %910 = vector.broadcast %908 : vector<1x256xf32> to vector<4x256xf32>
    %911 = arith.mulf %909, %910 : vector<4x256xf32>
    %912 = arith.addf %906, %911 : vector<4x256xf32>
    %c0_323 = arith.constant 0 : index
    %c19_324 = arith.constant 19 : index
    %913 = vector.load %arg4[%c0_323, %c19_324] : memref<4x36xf32, #tpu.memory_space<vmem>>, vector<4x1xf32>
    %914 = vector.extract_strided_slice %894 {offsets = [3, 0], sizes = [1, 256], strides = [1, 1]} : vector<4x256xf32> to vector<1x256xf32>
    %915 = vector.broadcast %913 : vector<4x1xf32> to vector<4x256xf32>
    %916 = vector.broadcast %914 : vector<1x256xf32> to vector<4x256xf32>
    %917 = arith.mulf %915, %916 : vector<4x256xf32>
    %918 = arith.addf %912, %917 : vector<4x256xf32>
    %c255_i32_325 = arith.constant 255 : i32
    %919 = tpu.dynamic_rotate %778 by %c255_i32_325 dim 1 : vector<4x256xf32>, i32 -> vector<4x256xf32>
    %c5_326 = arith.constant 5 : index
    %c0_327 = arith.constant 0 : index
    %920 = vector.load %arg6[%c5_326, %c0_327] : memref<9x256xf32, #tpu.memory_space<vmem>>, vector<1x256xf32>
    %921 = vector.broadcast %920 : vector<1x256xf32> to vector<4x256xf32>
    %922 = arith.mulf %919, %921 : vector<4x256xf32>
    %c0_328 = arith.constant 0 : index
    %c20_329 = arith.constant 20 : index
    %923 = vector.load %arg4[%c0_328, %c20_329] : memref<4x36xf32, #tpu.memory_space<vmem>>, vector<4x1xf32>
    %924 = vector.extract_strided_slice %922 {offsets = [0, 0], sizes = [1, 256], strides = [1, 1]} : vector<4x256xf32> to vector<1x256xf32>
    %925 = vector.broadcast %923 : vector<4x1xf32> to vector<4x256xf32>
    %926 = vector.broadcast %924 : vector<1x256xf32> to vector<4x256xf32>
    %927 = arith.mulf %925, %926 : vector<4x256xf32>
    %928 = arith.addf %918, %927 : vector<4x256xf32>
    %c0_330 = arith.constant 0 : index
    %c21_331 = arith.constant 21 : index
    %929 = vector.load %arg4[%c0_330, %c21_331] : memref<4x36xf32, #tpu.memory_space<vmem>>, vector<4x1xf32>
    %930 = vector.extract_strided_slice %922 {offsets = [1, 0], sizes = [1, 256], strides = [1, 1]} : vector<4x256xf32> to vector<1x256xf32>
    %931 = vector.broadcast %929 : vector<4x1xf32> to vector<4x256xf32>
    %932 = vector.broadcast %930 : vector<1x256xf32> to vector<4x256xf32>
    %933 = arith.mulf %931, %932 : vector<4x256xf32>
    %934 = arith.addf %928, %933 : vector<4x256xf32>
    %c0_332 = arith.constant 0 : index
    %c22_333 = arith.constant 22 : index
    %935 = vector.load %arg4[%c0_332, %c22_333] : memref<4x36xf32, #tpu.memory_space<vmem>>, vector<4x1xf32>
    %936 = vector.extract_strided_slice %922 {offsets = [2, 0], sizes = [1, 256], strides = [1, 1]} : vector<4x256xf32> to vector<1x256xf32>
    %937 = vector.broadcast %935 : vector<4x1xf32> to vector<4x256xf32>
    %938 = vector.broadcast %936 : vector<1x256xf32> to vector<4x256xf32>
    %939 = arith.mulf %937, %938 : vector<4x256xf32>
    %940 = arith.addf %934, %939 : vector<4x256xf32>
    %c0_334 = arith.constant 0 : index
    %c23_335 = arith.constant 23 : index
    %941 = vector.load %arg4[%c0_334, %c23_335] : memref<4x36xf32, #tpu.memory_space<vmem>>, vector<4x1xf32>
    %942 = vector.extract_strided_slice %922 {offsets = [3, 0], sizes = [1, 256], strides = [1, 1]} : vector<4x256xf32> to vector<1x256xf32>
    %943 = vector.broadcast %941 : vector<4x1xf32> to vector<4x256xf32>
    %944 = vector.broadcast %942 : vector<1x256xf32> to vector<4x256xf32>
    %945 = arith.mulf %943, %944 : vector<4x256xf32>
    %946 = arith.addf %940, %945 : vector<4x256xf32>
    %c241_i32_336 = arith.constant 241 : i32
    %947 = tpu.dynamic_rotate %778 by %c241_i32_336 dim 1 : vector<4x256xf32>, i32 -> vector<4x256xf32>
    %c6_337 = arith.constant 6 : index
    %c0_338 = arith.constant 0 : index
    %948 = vector.load %arg6[%c6_337, %c0_338] : memref<9x256xf32, #tpu.memory_space<vmem>>, vector<1x256xf32>
    %949 = vector.broadcast %948 : vector<1x256xf32> to vector<4x256xf32>
    %950 = arith.mulf %947, %949 : vector<4x256xf32>
    %c0_339 = arith.constant 0 : index
    %c24_340 = arith.constant 24 : index
    %951 = vector.load %arg4[%c0_339, %c24_340] : memref<4x36xf32, #tpu.memory_space<vmem>>, vector<4x1xf32>
    %952 = vector.extract_strided_slice %950 {offsets = [0, 0], sizes = [1, 256], strides = [1, 1]} : vector<4x256xf32> to vector<1x256xf32>
    %953 = vector.broadcast %951 : vector<4x1xf32> to vector<4x256xf32>
    %954 = vector.broadcast %952 : vector<1x256xf32> to vector<4x256xf32>
    %955 = arith.mulf %953, %954 : vector<4x256xf32>
    %956 = arith.addf %946, %955 : vector<4x256xf32>
    %c0_341 = arith.constant 0 : index
    %c25_342 = arith.constant 25 : index
    %957 = vector.load %arg4[%c0_341, %c25_342] : memref<4x36xf32, #tpu.memory_space<vmem>>, vector<4x1xf32>
    %958 = vector.extract_strided_slice %950 {offsets = [1, 0], sizes = [1, 256], strides = [1, 1]} : vector<4x256xf32> to vector<1x256xf32>
    %959 = vector.broadcast %957 : vector<4x1xf32> to vector<4x256xf32>
    %960 = vector.broadcast %958 : vector<1x256xf32> to vector<4x256xf32>
    %961 = arith.mulf %959, %960 : vector<4x256xf32>
    %962 = arith.addf %956, %961 : vector<4x256xf32>
    %c0_343 = arith.constant 0 : index
    %c26_344 = arith.constant 26 : index
    %963 = vector.load %arg4[%c0_343, %c26_344] : memref<4x36xf32, #tpu.memory_space<vmem>>, vector<4x1xf32>
    %964 = vector.extract_strided_slice %950 {offsets = [2, 0], sizes = [1, 256], strides = [1, 1]} : vector<4x256xf32> to vector<1x256xf32>
    %965 = vector.broadcast %963 : vector<4x1xf32> to vector<4x256xf32>
    %966 = vector.broadcast %964 : vector<1x256xf32> to vector<4x256xf32>
    %967 = arith.mulf %965, %966 : vector<4x256xf32>
    %968 = arith.addf %962, %967 : vector<4x256xf32>
    %c0_345 = arith.constant 0 : index
    %c27_346 = arith.constant 27 : index
    %969 = vector.load %arg4[%c0_345, %c27_346] : memref<4x36xf32, #tpu.memory_space<vmem>>, vector<4x1xf32>
    %970 = vector.extract_strided_slice %950 {offsets = [3, 0], sizes = [1, 256], strides = [1, 1]} : vector<4x256xf32> to vector<1x256xf32>
    %971 = vector.broadcast %969 : vector<4x1xf32> to vector<4x256xf32>
    %972 = vector.broadcast %970 : vector<1x256xf32> to vector<4x256xf32>
    %973 = arith.mulf %971, %972 : vector<4x256xf32>
    %974 = arith.addf %968, %973 : vector<4x256xf32>
    %c240_i32_347 = arith.constant 240 : i32
    %975 = tpu.dynamic_rotate %778 by %c240_i32_347 dim 1 : vector<4x256xf32>, i32 -> vector<4x256xf32>
    %c7_348 = arith.constant 7 : index
    %c0_349 = arith.constant 0 : index
    %976 = vector.load %arg6[%c7_348, %c0_349] : memref<9x256xf32, #tpu.memory_space<vmem>>, vector<1x256xf32>
    %977 = vector.broadcast %976 : vector<1x256xf32> to vector<4x256xf32>
    %978 = arith.mulf %975, %977 : vector<4x256xf32>
    %c0_350 = arith.constant 0 : index
    %c28_351 = arith.constant 28 : index
    %979 = vector.load %arg4[%c0_350, %c28_351] : memref<4x36xf32, #tpu.memory_space<vmem>>, vector<4x1xf32>
    %980 = vector.extract_strided_slice %978 {offsets = [0, 0], sizes = [1, 256], strides = [1, 1]} : vector<4x256xf32> to vector<1x256xf32>
    %981 = vector.broadcast %979 : vector<4x1xf32> to vector<4x256xf32>
    %982 = vector.broadcast %980 : vector<1x256xf32> to vector<4x256xf32>
    %983 = arith.mulf %981, %982 : vector<4x256xf32>
    %984 = arith.addf %974, %983 : vector<4x256xf32>
    %c0_352 = arith.constant 0 : index
    %c29_353 = arith.constant 29 : index
    %985 = vector.load %arg4[%c0_352, %c29_353] : memref<4x36xf32, #tpu.memory_space<vmem>>, vector<4x1xf32>
    %986 = vector.extract_strided_slice %978 {offsets = [1, 0], sizes = [1, 256], strides = [1, 1]} : vector<4x256xf32> to vector<1x256xf32>
    %987 = vector.broadcast %985 : vector<4x1xf32> to vector<4x256xf32>
    %988 = vector.broadcast %986 : vector<1x256xf32> to vector<4x256xf32>
    %989 = arith.mulf %987, %988 : vector<4x256xf32>
    %990 = arith.addf %984, %989 : vector<4x256xf32>
    %c0_354 = arith.constant 0 : index
    %c30_355 = arith.constant 30 : index
    %991 = vector.load %arg4[%c0_354, %c30_355] : memref<4x36xf32, #tpu.memory_space<vmem>>, vector<4x1xf32>
    %992 = vector.extract_strided_slice %978 {offsets = [2, 0], sizes = [1, 256], strides = [1, 1]} : vector<4x256xf32> to vector<1x256xf32>
    %993 = vector.broadcast %991 : vector<4x1xf32> to vector<4x256xf32>
    %994 = vector.broadcast %992 : vector<1x256xf32> to vector<4x256xf32>
    %995 = arith.mulf %993, %994 : vector<4x256xf32>
    %996 = arith.addf %990, %995 : vector<4x256xf32>
    %c0_356 = arith.constant 0 : index
    %c31_357 = arith.constant 31 : index
    %997 = vector.load %arg4[%c0_356, %c31_357] : memref<4x36xf32, #tpu.memory_space<vmem>>, vector<4x1xf32>
    %998 = vector.extract_strided_slice %978 {offsets = [3, 0], sizes = [1, 256], strides = [1, 1]} : vector<4x256xf32> to vector<1x256xf32>
    %999 = vector.broadcast %997 : vector<4x1xf32> to vector<4x256xf32>
    %1000 = vector.broadcast %998 : vector<1x256xf32> to vector<4x256xf32>
    %1001 = arith.mulf %999, %1000 : vector<4x256xf32>
    %1002 = arith.addf %996, %1001 : vector<4x256xf32>
    %c239_i32_358 = arith.constant 239 : i32
    %1003 = tpu.dynamic_rotate %778 by %c239_i32_358 dim 1 : vector<4x256xf32>, i32 -> vector<4x256xf32>
    %c8_359 = arith.constant 8 : index
    %c0_360 = arith.constant 0 : index
    %1004 = vector.load %arg6[%c8_359, %c0_360] : memref<9x256xf32, #tpu.memory_space<vmem>>, vector<1x256xf32>
    %1005 = vector.broadcast %1004 : vector<1x256xf32> to vector<4x256xf32>
    %1006 = arith.mulf %1003, %1005 : vector<4x256xf32>
    %c0_361 = arith.constant 0 : index
    %c32_362 = arith.constant 32 : index
    %1007 = vector.load %arg4[%c0_361, %c32_362] : memref<4x36xf32, #tpu.memory_space<vmem>>, vector<4x1xf32>
    %1008 = vector.extract_strided_slice %1006 {offsets = [0, 0], sizes = [1, 256], strides = [1, 1]} : vector<4x256xf32> to vector<1x256xf32>
    %1009 = vector.broadcast %1007 : vector<4x1xf32> to vector<4x256xf32>
    %1010 = vector.broadcast %1008 : vector<1x256xf32> to vector<4x256xf32>
    %1011 = arith.mulf %1009, %1010 : vector<4x256xf32>
    %1012 = arith.addf %1002, %1011 : vector<4x256xf32>
    %c0_363 = arith.constant 0 : index
    %c33_364 = arith.constant 33 : index
    %1013 = vector.load %arg4[%c0_363, %c33_364] : memref<4x36xf32, #tpu.memory_space<vmem>>, vector<4x1xf32>
    %1014 = vector.extract_strided_slice %1006 {offsets = [1, 0], sizes = [1, 256], strides = [1, 1]} : vector<4x256xf32> to vector<1x256xf32>
    %1015 = vector.broadcast %1013 : vector<4x1xf32> to vector<4x256xf32>
    %1016 = vector.broadcast %1014 : vector<1x256xf32> to vector<4x256xf32>
    %1017 = arith.mulf %1015, %1016 : vector<4x256xf32>
    %1018 = arith.addf %1012, %1017 : vector<4x256xf32>
    %c0_365 = arith.constant 0 : index
    %c34_366 = arith.constant 34 : index
    %1019 = vector.load %arg4[%c0_365, %c34_366] : memref<4x36xf32, #tpu.memory_space<vmem>>, vector<4x1xf32>
    %1020 = vector.extract_strided_slice %1006 {offsets = [2, 0], sizes = [1, 256], strides = [1, 1]} : vector<4x256xf32> to vector<1x256xf32>
    %1021 = vector.broadcast %1019 : vector<4x1xf32> to vector<4x256xf32>
    %1022 = vector.broadcast %1020 : vector<1x256xf32> to vector<4x256xf32>
    %1023 = arith.mulf %1021, %1022 : vector<4x256xf32>
    %1024 = arith.addf %1018, %1023 : vector<4x256xf32>
    %c0_367 = arith.constant 0 : index
    %c35_368 = arith.constant 35 : index
    %1025 = vector.load %arg4[%c0_367, %c35_368] : memref<4x36xf32, #tpu.memory_space<vmem>>, vector<4x1xf32>
    %1026 = vector.extract_strided_slice %1006 {offsets = [3, 0], sizes = [1, 256], strides = [1, 1]} : vector<4x256xf32> to vector<1x256xf32>
    %1027 = vector.broadcast %1025 : vector<4x1xf32> to vector<4x256xf32>
    %1028 = vector.broadcast %1026 : vector<1x256xf32> to vector<4x256xf32>
    %1029 = arith.mulf %1027, %1028 : vector<4x256xf32>
    %1030 = arith.addf %1024, %1029 : vector<4x256xf32>
    %c0_369 = arith.constant 0 : index
    %c0_370 = arith.constant 0 : index
    %1031 = vector.load %arg5[%c0_369, %c0_370] : memref<4x1xf32, #tpu.memory_space<vmem>>, vector<4x1xf32>
    %1032 = vector.broadcast %1031 : vector<4x1xf32> to vector<4x256xf32>
    %1033 = arith.addf %1030, %1032 : vector<4x256xf32>
    %1034 = arith.addf %1033, %521 : vector<4x256xf32>
    %cst_371 = arith.constant 0.000000e+00 : f32
    %1035 = vector.broadcast %cst_371 : f32 to vector<4x256xf32>
    %1036 = arith.maximumf %1034, %1035 : vector<4x256xf32>
    %c1_372 = arith.constant 1 : index
    %c0_373 = arith.constant 0 : index
    %c0_374 = arith.constant 0 : index
    %1037 = vector.load %arg7[%c1_372, %c0_373, %c0_374] : memref<2x4x256xf32, #tpu.memory_space<vmem>>, vector<1x4x256xf32>
    %1038 = vector.shape_cast %1037 : vector<1x4x256xf32> to vector<4x256xf32>
    %1039 = vector.shape_cast %1036 : vector<4x256xf32> to vector<1x4x256xf32>
    tpu.vector_store %arg7[%c1_372, %c0_373, %c0_374], %1039 {strides = array<i32>} : memref<2x4x256xf32, #tpu.memory_space<vmem>>, vector<1x4x256xf32>,
    return
  }
  func.func @transform_0(%arg0: i32) -> (i32, i32, i32) {
    %c0_i32 = arith.constant 0 : i32
    %c0_i32_0 = arith.constant 0 : i32
    %c0_i32_1 = arith.constant 0 : i32
    return %arg0, %c0_i32, %c0_i32_0 : i32, i32, i32
  }
  func.func @transform_1(%arg0: i32) -> (i32, i32) {
    %c0_i32 = arith.constant 0 : i32
    %c0_i32_0 = arith.constant 0 : i32
    %c0_i32_1 = arith.constant 0 : i32
    return %c0_i32, %c0_i32_0 : i32, i32
  }
  func.func @transform_2(%arg0: i32) -> (i32, i32) {
    %c0_i32 = arith.constant 0 : i32
    %c0_i32_0 = arith.constant 0 : i32
    %c0_i32_1 = arith.constant 0 : i32
    return %c0_i32, %c0_i32_0 : i32, i32
  }
  func.func @transform_3(%arg0: i32) -> (i32, i32) {
    %c0_i32 = arith.constant 0 : i32
    %c0_i32_0 = arith.constant 0 : i32
    %c0_i32_1 = arith.constant 0 : i32
    return %c0_i32, %c0_i32_0 : i32, i32
  }
  func.func @transform_4(%arg0: i32) -> (i32, i32) {
    %c0_i32 = arith.constant 0 : i32
    %c0_i32_0 = arith.constant 0 : i32
    %c0_i32_1 = arith.constant 0 : i32
    return %c0_i32, %c0_i32_0 : i32, i32
  }
  func.func @transform_5(%arg0: i32) -> (i32, i32) {
    %c0_i32 = arith.constant 0 : i32
    %c0_i32_0 = arith.constant 0 : i32
    %c0_i32_1 = arith.constant 0 : i32
    return %c0_i32, %c0_i32_0 : i32, i32
  }
  func.func @transform_6(%arg0: i32) -> (i32, i32, i32) {
    %c0_i32 = arith.constant 0 : i32
    %c0_i32_0 = arith.constant 0 : i32
    %c0_i32_1 = arith.constant 0 : i32
    return %arg0, %c0_i32, %c0_i32_0 : i32, i32, i32
  }
}

</mosaic_0001>

<bundles_post_ra>
// kernel: basic_block_forward.1
= control target key start
LH: loop header
LB: loop body
LE: loop exit
PB: predicated region body
PF: predicated region fallthrough
CT: control target
= control target key end

     0   :  { %v4897_v0 = vmov 0   ;;  %v4903_v3 = vmov 2   ;;  %s3219_s25 = smov 17   ;;  %v4948_v5 = vmov 1   ;;  %v4933_v6 = vmov 3   ;;  %s3222_s26 = smov 16   ;;  %s4876_s1 = inlined_call_operand.vmem [shape: f32[4,36], index: 1, kind: input, shape index: {}]   ;;  %s4877_s0 = inlined_call_operand.vmem [shape: f32[2,4,256], index: 0, kind: input, shape index: {}]   ;;  %s4878_s5 = inlined_call_operand.vmem [shape: f32[9,256], index: 5, kind: input, shape index: {}]   ;;  %s4879_s2 = inlined_call_operand.vmem [shape: f32[4,1], index: 2, kind: input, shape index: {}]   ;;  %s4880_s3 = inlined_call_operand.vmem [shape: f32[4,36], index: 3, kind: input, shape index: {}]   ;;  %s4881_s4 = inlined_call_operand.vmem [shape: f32[4,1], index: 4, kind: input, shape index: {}]   ;;  %s4882_s6 = inlined_call_operand.vmem [shape: f32[2,4,256], index: 6, kind: output, shape index: {}]  }
   0x1   :  { %3079 = vset.pattern.permute.xlu1 %v4897_v0  ;;  %v50_v1 = vld [vmem:[%s4876_s1] sm:$0xf]  ;;  %3081 = vset.pattern.permute.xlu0 %v4903_v3  ;;  %v4931_v8 = vmov 5   ;;  %v4947_v9 = vmov 4   ;;  %s3225_s29 = smov 15   ;;  %v4939_v10 = vmov 8   ;;  %v31_v47 = vlaneseq }
   0x2   :  { %v3303_v2 = vld [vmem:[%s4877_s0] sm:$0xff]  ;;  %53 = vperm.xlu1 %3079, %v50_v1   ;;  %v4929_v12 = vmov 6   ;;  %v4943_v13 = vmov 7   ;;  %v4935_v14 = vmov 11   ;;  %v4927_v16 = vmov 9   ;;  %s3235_s12 = smov 1  }
   0x3   :  { %27 = vrot.lane.b32.xlu0 %v3303_v2, %s3219_s25  ;;  %v3310_v4 = vcombine.high %v3303_v2, %v3303_v2  ;;  %v138_v7 = vld [vmem:[%s4876_s1] sm:$0xf]  ;;  %v4905_v17 = vmov 12   ;;  %v4899_v18 = vmov 15   ;;  %v4911_v19 = vmov 10   ;;  %s3237_s13 = smov 127  }
   0x4   :  { %v226_v11 = vld [vmem:[%s4876_s1] sm:$0xf]  ;;  %v4895_v21 = vmov 18   ;;  %v4909_v22 = vmov 13   ;;  %v4893_v24 = vmov 21   ;;  %s3239_s16 = smov 113  }
   0x5   :  { %4991 = vst [vmem:[#allocation2_spill] sm:$0xff] %v3310_v4  ;;  %v314_v15 = vld [vmem:[%s4876_s1] sm:$0xf]  ;;  %v4913_v25 = vmov 14   ;;  %v4891_v26 = vmov 24   ;;  %v4921_v28 = vmov 16  }
   0x6   :  { %3080 = vset.pattern.permute.xlu1 %v4948_v5  ;;  %v396_v20 = vld [vmem:[%s4876_s1] sm:$0xf]  ;;  %v4889_v29 = vmov 27   ;;  %v4919_v30 = vmov 17   ;;  %v4887_v32 = vmov 28   ;;  %v4917_v33 = vmov 19  }
   0x7   :  { %29 = vrot.lane.b32.xlu0 %v3310_v4, %s3219_s25  ;;  %69 = vperm.xlu1 %3080, %v50_v1   ;;  %v525_v23 = vld [vmem:[%s4876_s1] sm:$0xf]  ;;  %v4883_v35 = vmov 32   ;;  %v4924_v36 = vmov 20   ;;  %v4949_v37 = vmov 35   ;;  %v4885_v38 = vmov 31  }
   0x8   :  { %v613_v27 = vld [vmem:[%s4876_s1] sm:$0xf]  ;;  %v4955_v39 = vmov 22   ;;  %v4953_v40 = vmov 23   ;;  %v4951_v41 = vmov 25   ;;  %v4945_v42 = vmov 26  }
   0x9   :  { %v701_v31 = vld [vmem:[%s4876_s1] sm:$0xf]  ;;  %s3255_s23 = smov 112   ;;  %v4941_v43 = vmov 29   ;;  %v4937_v44 = vmov 30   ;;  %s3258_s24 = smov 111  }
   0xa   :  { %v789_v34 = vld [vmem:[%s4876_s1] sm:$0xf]  ;;  %v4907_v45 = vmov 33   ;;  %v3399_v50 = vshrl.u32 %v31_v47, 7  ;;  %v3401_v51 = vand.u32 127, %v31_v47  ;;  %v4901_v53 = vmov 34  }
   0xb   :  { %85 = vperm.xlu0 %3081, %v50_v1   ;;  %3082 = vset.pattern.permute.xlu1 %v4933_v6  ;;  %v36_v56 = vld [vmem:[%s4878_s5] ss:$8 sm:$0x3] }
   0xc   :  { %101 = vperm.xlu1 %3082, %v50_v1   ;;  %4992 = vst [vmem:[#allocation3_spill] sm:$0xff] %v3399_v50  ;;  %v3407_v54 = vsub.s32 0, %v3399_v50  ;;  %v3410_v55 = vsub.s32 1, %v3399_v50  ;;  %vm33_vm0 = vcmp.lt.s32.totalorder %v3401_v51, 17  ;;  %v855_v58 = vld [vmem:[%s4879_s2] sm:$0xf] }
   0xd   :  { %v3433_v1 = vld [vmem:[%s4880_s3] sm:$0xf]  ;;  %vm120_vm1 = vcmp.lt.s32.totalorder %v3401_v51, 16  ;;  %vm208_vm2 = vcmp.lt.s32.totalorder %v3401_v51, 15  ;;  %vm296_vm3 = vcmp.lt.s32.totalorder %v3401_v51, 1  ;;  %vm507_vm4 = vcmp.lt.s32.totalorder %v3401_v51, 127 }
   0xe   :  { %v3420_v60 = vrot.slane %v36_v56, %v3407_v54  ;;  %v3423_v61 = vrot.slane %v36_v56, %v3410_v55  ;;  %vm595_vm5 = vcmp.lt.s32.totalorder %v3401_v51, 113  ;;  %vm683_vm6 = vcmp.lt.s32.totalorder %v3401_v51, 112 }
   0xf   :  { %118 = vrot.lane.b32.xlu0 %v3310_v4, %s3222_s26  ;;  %vm771_vm7 = vcmp.lt.s32.totalorder %v3401_v51, 111 }
  0x10   :  { %3084 = vset.pattern.permute.xlu0 %v4931_v8  ;;  %116 = vrot.lane.b32.xlu1 %v3303_v2, %s3222_s26 }
  0x11   :  { %3083 = vset.pattern.permute.xlu1 %v4947_v9 }
  0x13   :  { %157 = vperm.xlu0 %3084, %v138_v7  }
  0x14   :  { %141 = vperm.xlu1 %3083, %v138_v7  }
  0x17   :  { %204 = vrot.lane.b32.xlu0 %v3303_v2, %s3225_s29 }
  0x18   :  { %3087 = vset.pattern.permute.xlu0 %v4939_v10  ;;  %3085 = vset.pattern.permute.xlu1 %v4929_v12 }
  0x19   :  { %173 = vperm.xlu1 %3085, %v138_v7  }
  0x1b   :  { %229 = vperm.xlu0 %3087, %v226_v11  }
  0x1d   :  { %3086 = vset.pattern.permute.xlu1 %v4943_v13 }
  0x1e   :  { %189 = vperm.xlu1 %3086, %v138_v7  }
  0x1f   :  { %3090 = vset.pattern.permute.xlu0 %v4935_v14 }
  0x20   :  { %277 = vperm.xlu0 %3090, %v226_v11  }
  0x22   :  { %206 = vrot.lane.b32.xlu1 %v3310_v4, %s3225_s29 }
  0x23   :  { %3088 = vset.pattern.permute.xlu1 %v4927_v16 }
  0x24   :  { %3091 = vset.pattern.permute.xlu0 %v4905_v17 }
  0x25   :  { %317 = vperm.xlu0 %3091, %v314_v15  }
  0x26   :  { %245 = vperm.xlu1 %3088, %v226_v11  }
  0x29   :  { %3094 = vset.pattern.permute.xlu0 %v4899_v18 }
  0x2a   :  { %365 = vperm.xlu0 %3094, %v314_v15   ;;  %3089 = vset.pattern.permute.xlu1 %v4911_v19 }
  0x2b   :  { %261 = vperm.xlu1 %3089, %v226_v11  }
  0x2e   :  { %3097 = vset.pattern.permute.xlu0 %v4895_v21 }
  0x2f   :  { %452 = vperm.xlu0 %3097, %v396_v20   ;;  %292 = vrot.lane.b32.xlu1 %v3303_v2, %s3235_s12 }
  0x30   :  { %3092 = vset.pattern.permute.xlu1 %v4909_v22 }
  0x33   :  { %505 = vrot.lane.b32.xlu0 %v3310_v4, %s3237_s13  ;;  %294 = vrot.lane.b32.xlu1 %v3310_v4, %s3235_s12 }
  0x34   :  { %3100 = vset.pattern.permute.xlu0 %v4893_v24 }
  0x37   :  { %544 = vperm.xlu0 %3100, %v525_v23   ;;  %333 = vperm.xlu1 %3092, %v314_v15  }
  0x3b   :  { %591 = vrot.lane.b32.xlu0 %v3303_v2, %s3239_s16  ;;  %3093 = vset.pattern.permute.xlu1 %v4913_v25 }
  0x3c   :  { %3103 = vset.pattern.permute.xlu0 %v4891_v26  ;;  %349 = vperm.xlu1 %3093, %v314_v15  }
  0x3f   :  { %616 = vperm.xlu0 %3103, %v613_v27  }
  0x40   :  { %3095 = vset.pattern.permute.xlu1 %v4921_v28 }
  0x41   :  { %399 = vperm.xlu1 %3095, %v396_v20  }
  0x43   :  { %3106 = vset.pattern.permute.xlu0 %v4889_v29 }
  0x44   :  { %664 = vperm.xlu0 %3106, %v613_v27  }
  0x45   :  { %3096 = vset.pattern.permute.xlu1 %v4919_v30 }
  0x46   :  { %426 = vperm.xlu1 %3096, %v396_v20  }
  0x48   :  { %3107 = vset.pattern.permute.xlu0 %v4887_v32 }
  0x49   :  { %704 = vperm.xlu0 %3107, %v701_v31  }
  0x4a   :  { %3098 = vset.pattern.permute.xlu1 %v4917_v33 }
  0x4b   :  { %478 = vperm.xlu1 %3098, %v396_v20  }
  0x4d   :  { %3110 = vset.pattern.permute.xlu0 %v4883_v35 }
  0x4e   :  { %792 = vperm.xlu0 %3110, %v789_v34  }
  0x4f   :  { %503 = vrot.lane.b32.xlu1 %v3303_v2, %s3237_s13 }
  0x50   :  { %3099 = vset.pattern.permute.xlu1 %v4924_v36 }
  0x52   :  { %3113 = vset.pattern.permute.xlu0 %v4949_v37 }
  0x53   :  { %840 = vperm.xlu0 %3113, %v789_v34   ;;  %528 = vperm.xlu1 %3099, %v525_v23  }
  0x57   :  { %3114 = vset.pattern.permute.xlu0 %v4885_v38  ;;  %3101 = vset.pattern.permute.xlu1 %v4955_v39 }
  0x58   :  { %752 = vperm.xlu0 %3114, %v701_v31   ;;  %560 = vperm.xlu1 %3101, %v525_v23  }
  0x5c   :  { %3102 = vset.pattern.permute.xlu1 %v4953_v40 }
  0x5d   :  { %576 = vperm.xlu1 %3102, %v525_v23   ;;  %v3438_v23 = vsub.s32 2, %v3399_v50 }
  0x61   :  { %593 = vrot.lane.b32.xlu1 %v3310_v4, %s3239_s16 }
  0x62   :  { %3104 = vset.pattern.permute.xlu1 %v4951_v41 }
  0x65   :  { %632 = vperm.xlu1 %3104, %v613_v27  }
  0x69   :  { %3105 = vset.pattern.permute.xlu1 %v4945_v42 }
  0x6a   :  { %648 = vperm.xlu1 %3105, %v613_v27  }
  0x6e   :  { %679 = vrot.lane.b32.xlu1 %v3303_v2, %s3255_s23 }
  0x6f   :  { %3108 = vset.pattern.permute.xlu1 %v4941_v43 }
  0x72   :  { %681 = vrot.lane.b32.xlu1 %v3310_v4, %s3255_s23 }
  0x75   :  { %v28_v49 = vpop.permute.xlu0 %27 }
  0x76   :  { %720 = vperm.xlu1 %3108, %v701_v31  }
  0x79   :  { %v30_v57 = vpop.permute.xlu0 %29 }
  0x7a   :  { %3109 = vset.pattern.permute.xlu1 %v4937_v44  ;;  %v34_v62 = vsel %vm33_vm0, %v28_v49, %v30_v57  ;;  %v35_v63 = vsel %vm33_vm0, %v30_v57, %v28_v49  ;;  %v3450_v57 = vsub.s32 3, %v3399_v50 }
  0x7b   :  { %736 = vperm.xlu1 %3109, %v701_v31   ;;  %v48_v15 = vmul.f32 %v3420_v60, %v35_v63  ;;  %v49_v20 = vmul.f32 %v3423_v61, %v34_v62 }
  0x7d   :  { %v75_v27 = vrot.slane %v48_v15, %v3410_v55  ;;  %v79_v31 = vrot.slane %v49_v20, %v3410_v55  ;;  %v59_v49 = vrot.slane %v48_v15, %v3407_v54  ;;  %v63_v56 = vrot.slane %v49_v20, %v3407_v54 }
  0x7e   :  { %v91_v62 = vrot.slane %v48_v15, %v3438_v23  ;;  %v95_v63 = vrot.slane %v49_v20, %v3438_v23  ;;  %v107_v18 = vrot.slane %v48_v15, %v3450_v57 }
  0x7f   :  { %767 = vrot.lane.b32.xlu1 %v3303_v2, %s3258_s24 }
  0x80   :  { %3111 = vset.pattern.permute.xlu1 %v4907_v45 }
  0x81   :  { %v54_v46 = vpop.permute.xlu1 %53 }
  0x82   :  { %v64_v21 = vmul.f32 %v59_v49, %v54_v46 }
  0x83   :  { %769 = vrot.lane.b32.xlu1 %v3310_v4, %s3258_s24 }
  0x86   :  { %v70_v48 = vpop.permute.xlu1 %69 }
  0x87   :  { %808 = vperm.xlu1 %3111, %v789_v34   ;;  %v80_v32 = vmul.f32 %v75_v27, %v70_v48  ;;  %v81_v29 = vmul.f32 %v79_v31, %v70_v48 }
  0x89   :  { %v82_v48 = vadd.f32 %v80_v32, %v64_v21 }
  0x8a   :  { %v86_v7 = vpop.permute.xlu0 %85 }
  0x8b   :  { %v3403_v52 = vpop.permute.xlu1 %101  ;;  %3112 = vset.pattern.permute.xlu1 %v4901_v53  ;;  %v111_v53 = vrot.slane %v49_v20, %v3450_v57  ;;  %v96_v17 = vmul.f32 %v91_v62, %v86_v7  ;;  %v97_v45 = vmul.f32 %v95_v63, %v86_v7 }
  0x8c   :  { %824 = vperm.xlu1 %3112, %v789_v34   ;;  %v3017_v34 = vld [vmem:[%s4878_s5 + $0x1] ss:$8 sm:$0x3] }
  0x8d   :  { %v3457_v35 = vrot.slane %v3017_v34, %v3407_v54  ;;  %v3460_v38 = vrot.slane %v3017_v34, %v3410_v55 }
  0x8e   :  { %v119_v47 = vpop.permute.xlu0 %118 }
  0x8f   :  { %v117_v59 = vpop.permute.xlu1 %116 }
  0x90   :  { %3115 = vset.pattern.permute.xlu1 %v4897_v0  ;;  %v121_v26 = vsel %vm120_vm1, %v117_v59, %v119_v47  ;;  %v122_v24 = vsel %vm120_vm1, %v119_v47, %v117_v59  ;;  %v65_v0 = vmul.f32 %v63_v56, %v54_v46  ;;  %v98_v47 = vadd.f32 %v96_v17, %v82_v48 }
  0x91   :  { %858 = vperm.xlu1 %3115, %v855_v58   ;;  %v136_v34 = vmul.f32 %v3457_v35, %v122_v24  ;;  %v112_v24 = vmul.f32 %v107_v18, %v3403_v52 }
  0x92   :  { %v83_v31 = vadd.f32 %v81_v29, %v65_v0  ;;  %v158_v49 = vpop.permute.xlu0 %157  ;;  %v3018_v0 = vld [vmem:[%s4878_s5 + $0x2] ss:$8 sm:$0x3] }
  0x93   :  { %v142_v11 = vpop.permute.xlu1 %141  ;;  %v147_v59 = vrot.slane %v136_v34, %v3407_v54  ;;  %v114_v17 = vadd.f32 %v112_v24, %v98_v47  ;;  %v3485_v18 = vrot.slane %v3018_v0, %v3407_v54  ;;  %v179_v24 = vrot.slane %v136_v34, %v3438_v23 }
  0x94   :  { %v99_v20 = vadd.f32 %v97_v45, %v83_v31 }
  0x95   :  { %876 = vperm.xlu1 %3115, %v3433_v1   ;;  %v152_v21 = vmul.f32 %v147_v59, %v142_v11 }
  0x96   :  { %v205_v7 = vpop.permute.xlu0 %204 }
  0x97   :  { %v154_v63 = vadd.f32 %v152_v21, %v114_v17  ;;  %v195_v21 = vrot.slane %v136_v34, %v3450_v57 }
  0x98   :  { %v3452_v58 = vpop.permute.xlu1 %173 }
  0x99   :  { %3116 = vset.pattern.permute.xlu1 %v4903_v3  ;;  %v137_v3 = vmul.f32 %v3460_v38, %v121_v26  ;;  %v113_v26 = vmul.f32 %v111_v53, %v3403_v52  ;;  %v3488_v52 = vrot.slane %v3018_v0, %v3410_v55  ;;  %v163_v53 = vrot.slane %v136_v34, %v3410_v55 }
  0x9a   :  { %908 = vperm.xlu1 %3116, %v3433_v1   ;;  %v184_v17 = vmul.f32 %v179_v24, %v3452_v58  ;;  %v230_v34 = vpop.permute.xlu0 %229 }
  0x9b   :  { %v151_v46 = vrot.slane %v137_v3, %v3407_v54  ;;  %v115_v45 = vadd.f32 %v113_v26, %v99_v20  ;;  %v167_v56 = vrot.slane %v137_v3, %v3410_v55  ;;  %v168_v47 = vmul.f32 %v163_v53, %v158_v49 }
  0x9c   :  { %v183_v26 = vrot.slane %v137_v3, %v3438_v23 }
  0x9d   :  { %v190_v27 = vpop.permute.xlu1 %189  ;;  %v153_v29 = vmul.f32 %v151_v46, %v142_v11  ;;  %v169_v20 = vmul.f32 %v167_v56, %v158_v49 }
  0x9e   :  { %3117 = vset.pattern.permute.xlu1 %v4933_v6  ;;  %v200_v56 = vmul.f32 %v195_v21, %v190_v27 }
  0x9f   :  { %924 = vperm.xlu1 %3117, %v3433_v1   ;;  %v155_v48 = vadd.f32 %v153_v29, %v115_v45  ;;  %v199_v29 = vrot.slane %v137_v3, %v3450_v57  ;;  %v185_v45 = vmul.f32 %v183_v26, %v3452_v58  ;;  %v3019_v3 = vld [vmem:[%s4878_s5 + $0x3] ss:$8 sm:$0x3] }
  0xa0   :  { %v3525_v24 = vrot.slane %v3019_v3, %v3410_v55 }
  0xa1   :  { %v207_v15 = vpop.permute.xlu1 %206  ;;  %v171_v0 = vadd.f32 %v169_v20, %v155_v48  ;;  %v3522_v20 = vrot.slane %v3019_v3, %v3407_v54 }
  0xa2   :  { %v209_v62 = vsel %vm208_vm2, %v205_v7, %v207_v15  ;;  %v210_v11 = vsel %vm208_vm2, %v207_v15, %v205_v7  ;;  %v170_v15 = vadd.f32 %v168_v47, %v154_v63 }
  0xa3   :  { %3118 = vset.pattern.permute.xlu1 %v4931_v8  ;;  %v3499_v31 = vmul.f32 %v3485_v18, %v210_v11  ;;  %v3502_v59 = vmul.f32 %v3488_v52, %v209_v62  ;;  %v201_v62 = vmul.f32 %v199_v29, %v190_v27  ;;  %v187_v58 = vadd.f32 %v185_v45, %v171_v0 }
  0xa4   :  { %964 = vperm.xlu1 %3118, %v3433_v1   ;;  %v186_v11 = vadd.f32 %v184_v17, %v170_v15 }
  0xa5   :  { %v246_v32 = vpop.permute.xlu1 %245  ;;  %v235_v7 = vrot.slane %v3499_v31, %v3407_v54  ;;  %v239_v49 = vrot.slane %v3502_v59, %v3407_v54  ;;  %v203_v26 = vadd.f32 %v201_v62, %v187_v58  ;;  %v251_v21 = vrot.slane %v3499_v31, %v3410_v55 }
  0xa6   :  { %v202_v27 = vadd.f32 %v200_v56, %v186_v11  ;;  %v255_v15 = vrot.slane %v3502_v59, %v3410_v55  ;;  %v271_v56 = vrot.slane %v3502_v59, %v3438_v23 }
  0xa7   :  { %v240_v63 = vmul.f32 %v235_v7, %v230_v34  ;;  %v241_v48 = vmul.f32 %v239_v49, %v230_v34  ;;  %v267_v49 = vrot.slane %v3499_v31, %v3438_v23  ;;  %v256_v62 = vmul.f32 %v251_v21, %v246_v32 }
  0xa8   :  { %3119 = vset.pattern.permute.xlu1 %v4929_v12  ;;  %v257_v3 = vmul.f32 %v255_v15, %v246_v32  ;;  %v283_v15 = vrot.slane %v3499_v31, %v3450_v57 }
  0xa9   :  { %980 = vperm.xlu1 %3119, %v3433_v1   ;;  %v242_v17 = vadd.f32 %v240_v63, %v202_v27  ;;  %v243_v45 = vadd.f32 %v241_v48, %v203_v26  ;;  %v278_v27 = vpop.permute.xlu0 %277 }
  0xaa   :  { %v262_v46 = vpop.permute.xlu1 %261  ;;  %v288_v31 = vmul.f32 %v283_v15, %v278_v27  ;;  %v4916_v15 = vsub.s32 5, %v3399_v50 }
  0xab   :  { %v258_v58 = vadd.f32 %v256_v62, %v242_v17  ;;  %v259_v63 = vadd.f32 %v257_v3, %v243_v45  ;;  %v272_v48 = vmul.f32 %v267_v49, %v262_v46 }
  0xad   :  { %3120 = vset.pattern.permute.xlu1 %v4927_v16  ;;  %v274_v17 = vadd.f32 %v272_v48, %v258_v58  ;;  %v318_v49 = vpop.permute.xlu0 %317  ;;  %v4915_v48 = vsub.s32 4, %v3399_v50 }
  0xae   :  { %1036 = vperm.xlu1 %3120, %v3433_v1   ;;  %v293_v53 = vpop.permute.xlu1 %292 }
  0xb2   :  { %3121 = vset.pattern.permute.xlu1 %v4911_v19  ;;  %v295_v47 = vpop.permute.xlu1 %294 }
  0xb3   :  { %1052 = vperm.xlu1 %3121, %v3433_v1   ;;  %v297_v0 = vsel %vm296_vm3, %v293_v53, %v295_v47  ;;  %v298_v29 = vsel %vm296_vm3, %v295_v47, %v293_v53  ;;  %v3020_v53 = vld [vmem:[%s4878_s5 + $0x4] ss:$8 sm:$0x3]  ;;  %v273_v47 = vmul.f32 %v271_v56, %v262_v46 }
  0xb4   :  { %v3542_v34 = vmul.f32 %v3522_v20, %v298_v29  ;;  %v3545_v11 = vmul.f32 %v3525_v24, %v297_v0  ;;  %v3552_v32 = vrot.slane %v3020_v53, %v3407_v54  ;;  %v3555_v21 = vrot.slane %v3020_v53, %v3410_v55 }
  0xb5   :  { %v287_v0 = vrot.slane %v3502_v59, %v3450_v57  ;;  %v275_v45 = vadd.f32 %v273_v47, %v259_v63 }
  0xb6   :  { %v334_v7 = vpop.permute.xlu1 %333  ;;  %v323_v29 = vrot.slane %v3542_v34, %v3407_v54  ;;  %v327_v46 = vrot.slane %v3545_v11, %v3407_v54  ;;  %v393_v56 = vcombine.low %v3552_v32, %v3555_v21  ;;  %v343_v58 = vrot.slane %v3545_v11, %v3410_v55 }
  0xb7   :  { %3122 = vset.pattern.permute.xlu1 %v4909_v22  ;;  %v289_v62 = vmul.f32 %v287_v0, %v278_v27  ;;  %v290_v22 = vadd.f32 %v288_v31, %v274_v17  ;;  %v366_v17 = vpop.permute.xlu0 %365 }
  0xb8   :  { %1108 = vperm.xlu1 %3122, %v3433_v1   ;;  %v328_v3 = vmul.f32 %v323_v29, %v318_v49  ;;  %v329_v59 = vmul.f32 %v327_v46, %v318_v49  ;;  %v3576_v63 = vmul.f32 %v393_v56, %v3303_v2  ;;  %v345_v46 = vmul.f32 %v343_v58, %v334_v7 }
  0xb9   :  { %v291_v19 = vadd.f32 %v289_v62, %v275_v45  ;;  %v355_v45 = vrot.slane %v3542_v34, %v3438_v23  ;;  %v359_v49 = vrot.slane %v3545_v11, %v3438_v23  ;;  %v4923_v58 = vsub.s32 6, %v3399_v50 }
  0xba   :  { %v330_v47 = vadd.f32 %v328_v3, %v290_v22  ;;  %v406_v2 = vrot.slane %v3576_v63, %v3407_v54  ;;  %v432_v31 = vrot.slane %v3576_v63, %v3410_v55  ;;  %v436_v62 = vrot.slane %v3576_v63, %v4916_v15 }
  0xbb   :  { %v350_v26 = vpop.permute.xlu1 %349  ;;  %v331_v27 = vadd.f32 %v329_v59, %v291_v19  ;;  %v410_v19 = vrot.slane %v3576_v63, %v4915_v48  ;;  %v371_v3 = vrot.slane %v3542_v34, %v3450_v57  ;;  %v375_v59 = vrot.slane %v3545_v11, %v3450_v57  ;;  %v453_v48 = vpop.permute.xlu0 %452 }
  0xbc   :  { %3123 = vset.pattern.permute.xlu1 %v4913_v25  ;;  %v339_v25 = vrot.slane %v3542_v34, %v3410_v55  ;;  %v361_v56 = vmul.f32 %v359_v49, %v350_v26  ;;  %v3021_v34 = vld [vmem:[%s4878_s5 + $0x5] ss:$8 sm:$0x3]  ;;  %v442_v11 = vrot.slane %v432_v31, %v3410_v55  ;;  %v458_v49 = vrot.slane %v3576_v63, %v3438_v23 }
  0xbd   :  { %1124 = vperm.xlu1 %3123, %v3433_v1   ;;  %v3618_v15 = vrot.slane %v3021_v34, %v3407_v54  ;;  %v3621_v31 = vrot.slane %v3021_v34, %v3410_v55 }
  0xbe   :  { %v344_v29 = vmul.f32 %v339_v25, %v334_v7  ;;  %v347_v25 = vadd.f32 %v345_v46, %v331_v27  ;;  %v360_v7 = vmul.f32 %v355_v45, %v350_v26  ;;  %v420_v46 = vrot.slane %v410_v19, %v3407_v54 }
  0xbf   :  { %v446_v45 = vrot.slane %v436_v62, %v3410_v55  ;;  %4993 = vst [vmem:[#allocation4_spill] sm:$0xff] %v3618_v15  ;;  %4994 = vst [vmem:[#allocation5_spill] sm:$0xff] %v3621_v31 }
  0xc0   :  { %v400_v53 = vpop.permute.xlu1 %399  ;;  %v346_v22 = vadd.f32 %v344_v29, %v330_v47  ;;  %v363_v27 = vadd.f32 %v361_v56, %v347_v25  ;;  %v416_v29 = vrot.slane %v406_v2, %v3407_v54  ;;  %v376_v25 = vmul.f32 %v371_v3, %v366_v17  ;;  %v506_v56 = vpop.permute.xlu0 %505 }
  0xc1   :  { %3124 = vset.pattern.permute.xlu1 %v4921_v28  ;;  %v462_v2 = vrot.slane %v3576_v63, %v4923_v58  ;;  %v422_v28 = vmul.f32 %v420_v46, %v400_v53 }
  0xc2   :  { %1158 = vperm.xlu1 %3124, %v3433_v1   ;;  %v362_v26 = vadd.f32 %v360_v7, %v346_v22  ;;  %v4926_v22 = vsub.s32 7, %v3399_v50  ;;  %v377_v7 = vmul.f32 %v375_v59, %v366_v17  ;;  %v484_v17 = vrot.slane %v3576_v63, %v3450_v57 }
  0xc4   :  { %v378_v62 = vadd.f32 %v376_v25, %v362_v26  ;;  %v488_v3 = vrot.slane %v3576_v63, %v4926_v22  ;;  %v494_v63 = vrot.slane %v484_v17, %v3450_v57 }
  0xc5   :  { %v427_v0 = vpop.permute.xlu1 %426 }
  0xc6   :  { %3125 = vset.pattern.permute.xlu1 %v4919_v30  ;;  %v421_v30 = vmul.f32 %v416_v29, %v400_v53  ;;  %v447_v58 = vmul.f32 %v442_v11, %v427_v0  ;;  %v448_v26 = vmul.f32 %v446_v45, %v427_v0  ;;  %v472_v53 = vrot.slane %v462_v2, %v3438_v23 }
  0xc7   :  { %1174 = vperm.xlu1 %3125, %v3433_v1   ;;  %v498_v22 = vrot.slane %v488_v3, %v3450_v57  ;;  %v545_v3 = vpop.permute.xlu0 %544 }
  0xc8   :  { %v423_v46 = vadd.f32 %v421_v30, %v378_v62  ;;  %v474_v11 = vmul.f32 %v472_v53, %v453_v48 }
  0xca   :  { %v479_v47 = vpop.permute.xlu1 %478  ;;  %v449_v16 = vadd.f32 %v447_v58, %v423_v46 }
  0xcb   :  { %3126 = vset.pattern.permute.xlu1 %v4917_v33  ;;  %v379_v33 = vadd.f32 %v377_v7, %v363_v27  ;;  %v468_v27 = vrot.slane %v458_v49, %v3438_v23 }
  0xcc   :  { %1206 = vperm.xlu1 %3126, %v3433_v1  }
  0xcd   :  { %v424_v25 = vadd.f32 %v422_v28, %v379_v33  ;;  %v499_v28 = vmul.f32 %v494_v63, %v479_v47  ;;  %v500_v33 = vmul.f32 %v498_v22, %v479_v47 }
  0xce   :  { %v504_v19 = vpop.permute.xlu1 %503 }
  0xcf   :  { %v508_v59 = vsel %vm507_vm4, %v504_v19, %v506_v56  ;;  %v509_v34 = vsel %vm507_vm4, %v506_v56, %v504_v19  ;;  %v450_v12 = vadd.f32 %v448_v26, %v424_v25  ;;  %v473_v19 = vmul.f32 %v468_v27, %v453_v48  ;;  %v3022_v56 = vld [vmem:[%s4878_s5 + $0x6] ss:$8 sm:$0x3]  ;;  %v592_v27 = vpop.permute.xlu0 %591 }
  0xd0   :  { %3127 = vset.pattern.permute.xlu1 %v4924_v36  ;;  %v523_v7 = vmul.f32 %v3618_v15, %v508_v59  ;;  %v524_v36 = vmul.f32 %v3621_v31, %v509_v34  ;;  %v3646_v48 = vrot.slane %v3022_v56, %v3407_v54  ;;  %v3649_v59 = vrot.slane %v3022_v56, %v3410_v55 }
  0xd1   :  { %v475_v2 = vadd.f32 %v473_v19, %v449_v16  ;;  %v476_v30 = vadd.f32 %v474_v11, %v450_v12 }
  0xd2   :  { %v529_v29 = vpop.permute.xlu1 %528  ;;  %v534_v45 = vrot.slane %v523_v7, %v3407_v54  ;;  %v538_v49 = vrot.slane %v524_v36, %v3407_v54  ;;  %4995 = vst [vmem:[#allocation6_spill] sm:$0xff] %v3646_v48  ;;  %4996 = vst [vmem:[#allocation7_spill] sm:$0xff] %v3649_v59  ;;  %v550_v47 = vrot.slane %v523_v7, %v3410_v55 }
  0xd3   :  { %v501_v16 = vadd.f32 %v499_v28, %v475_v2  ;;  %v502_v12 = vadd.f32 %v500_v33, %v476_v30  ;;  %v554_v22 = vrot.slane %v524_v36, %v3410_v55  ;;  %v582_v28 = vrot.slane %v523_v7, %v3450_v57  ;;  %v617_v56 = vpop.permute.xlu0 %616 }
  0xd4   :  { %v539_v62 = vmul.f32 %v534_v45, %v529_v29  ;;  %v540_v17 = vmul.f32 %v538_v49, %v529_v29  ;;  %v555_v25 = vmul.f32 %v550_v47, %v545_v3  ;;  %v566_v45 = vrot.slane %v523_v7, %v3438_v23 }
  0xd5   :  { %v556_v63 = vmul.f32 %v554_v22, %v545_v3  ;;  %v570_v49 = vrot.slane %v524_v36, %v3438_v23  ;;  %v586_v33 = vrot.slane %v524_v36, %v3450_v57 }
  0xd6   :  { %v541_v34 = vadd.f32 %v539_v62, %v501_v16  ;;  %v542_v26 = vadd.f32 %v540_v17, %v502_v12 }
  0xd7   :  { %v561_v0 = vpop.permute.xlu1 %560 }
  0xd8   :  { %v557_v2 = vadd.f32 %v555_v25, %v541_v34  ;;  %v558_v30 = vadd.f32 %v556_v63, %v542_v26  ;;  %v571_v17 = vmul.f32 %v566_v45, %v561_v0  ;;  %v572_v16 = vmul.f32 %v570_v49, %v561_v0  ;;  %v665_v26 = vpop.permute.xlu0 %664  ;;  %v3023_v0 = vld [vmem:[%s4878_s5 + $0x7] ss:$8 sm:$0x3] }
  0xdc   :  { %v577_v58 = vpop.permute.xlu1 %576 }
  0xdd   :  { %v587_v47 = vmul.f32 %v582_v28, %v577_v58  ;;  %v588_v22 = vmul.f32 %v586_v33, %v577_v58  ;;  %v3675_v33 = vrot.slane %v3023_v0, %v3410_v55 }
  0xdf   :  { %4998 = vst [vmem:[#allocation9_spill] sm:$0xff] %v3675_v33 }
  0xe0   :  { %v594_v53 = vpop.permute.xlu1 %593 }
  0xe1   :  { %v596_v29 = vsel %vm595_vm5, %v592_v27, %v594_v53  ;;  %v597_v46 = vsel %vm595_vm5, %v594_v53, %v592_v27  ;;  %v573_v27 = vadd.f32 %v571_v17, %v557_v2  ;;  %v574_v53 = vadd.f32 %v572_v16, %v558_v30  ;;  %v705_v16 = vpop.permute.xlu0 %704 }
  0xe2   :  { %v611_v19 = vmul.f32 %v3646_v48, %v596_v29  ;;  %v612_v11 = vmul.f32 %v3649_v59, %v597_v46  ;;  %v3672_v30 = vrot.slane %v3023_v0, %v3407_v54  ;;  %v5028_v59 = vmov 14  }
  0xe3   :  { %v589_v25 = vadd.f32 %v587_v47, %v573_v27  ;;  %v590_v7 = vadd.f32 %v588_v22, %v574_v53 }
  0xe4   :  { %v633_v62 = vpop.permute.xlu1 %632  ;;  %v622_v3 = vrot.slane %v611_v19, %v3407_v54  ;;  %v626_v12 = vrot.slane %v612_v11, %v3407_v54  ;;  %v638_v36 = vrot.slane %v611_v19, %v3410_v55  ;;  %v642_v63 = vrot.slane %v612_v11, %v3410_v55  ;;  %4997 = vst [vmem:[#allocation8_spill] sm:$0xff] %v3672_v30 }
  0xe5   :  { %v658_v17 = vrot.slane %v612_v11, %v3438_v23 }
  0xe6   :  { %v627_v29 = vmul.f32 %v622_v3, %v617_v56  ;;  %v628_v46 = vmul.f32 %v626_v12, %v617_v56  ;;  %v643_v58 = vmul.f32 %v638_v36, %v633_v62  ;;  %v644_v2 = vmul.f32 %v642_v63, %v633_v62 }
  0xe7   :  { %v654_v56 = vrot.slane %v611_v19, %v3438_v23 }
  0xe8   :  { %v629_v45 = vadd.f32 %v627_v29, %v589_v25  ;;  %v630_v49 = vadd.f32 %v628_v46, %v590_v7  ;;  %v670_v25 = vrot.slane %v611_v19, %v3450_v57  ;;  %v674_v7 = vrot.slane %v612_v11, %v3450_v57 }
  0xe9   :  { %v649_v34 = vpop.permute.xlu1 %648 }
  0xea   :  { %v645_v3 = vadd.f32 %v643_v58, %v629_v45  ;;  %v646_v12 = vadd.f32 %v644_v2, %v630_v49  ;;  %v659_v22 = vmul.f32 %v654_v56, %v649_v34  ;;  %v660_v27 = vmul.f32 %v658_v17, %v649_v34  ;;  %v793_v49 = vpop.permute.xlu0 %792 }
  0xeb   :  { %v675_v58 = vmul.f32 %v670_v25, %v665_v26  ;;  %v676_v2 = vmul.f32 %v674_v7, %v665_v26 }
  0xec   :  { %v661_v34 = vadd.f32 %v659_v22, %v645_v3  ;;  %v662_v45 = vadd.f32 %v660_v27, %v646_v12  ;;  %v3024_v3 = vld [vmem:[%s4878_s5 + $0x10] ss:$8 sm:$0x3] }
  0xed   :  { %v680_v28 = vpop.permute.xlu1 %679  ;;  %v3698_v25 = vrot.slane %v3024_v3, %v3407_v54  ;;  %v3701_v7 = vrot.slane %v3024_v3, %v3410_v55 }
  0xee   :  { %v677_v17 = vadd.f32 %v675_v58, %v661_v34  ;;  %v841_v11 = vpop.permute.xlu0 %840 }
  0xef   :  { %4999 = vst [vmem:[#allocation10_spill] sm:$0xff] %v3698_v25  ;;  %5000 = vst [vmem:[#allocation11_spill] sm:$0xff] %v3701_v7 }
  0xf1   :  { %v682_v47 = vpop.permute.xlu1 %681 }
  0xf2   :  { %v684_v53 = vsel %vm683_vm6, %v680_v28, %v682_v47  ;;  %v685_v62 = vsel %vm683_vm6, %v682_v47, %v680_v28  ;;  %v678_v47 = vadd.f32 %v676_v2, %v662_v45  ;;  %v753_v2 = vpop.permute.xlu0 %752 }
  0xf3   :  { %v699_v29 = vmul.f32 %v3672_v30, %v684_v53  ;;  %v700_v46 = vmul.f32 %v3675_v33, %v685_v62  ;;  %v3895_v30 = vld [vmem:[%s4876_s1] sm:$0xf] }
  0xf5   :  { %v710_v36 = vrot.slane %v699_v29, %v3407_v54  ;;  %v714_v63 = vrot.slane %v700_v46, %v3407_v54  ;;  %v721_v0 = vpop.permute.xlu1 %720  ;;  %v726_v53 = vrot.slane %v699_v29, %v3410_v55  ;;  %v730_v19 = vrot.slane %v700_v46, %v3410_v55 }
  0xf6   :  { %v742_v26 = vrot.slane %v699_v29, %v3438_v23  ;;  %v758_v58 = vrot.slane %v699_v29, %v3450_v57 }
  0xf7   :  { %v715_v56 = vmul.f32 %v710_v36, %v705_v16  ;;  %v716_v28 = vmul.f32 %v714_v63, %v705_v16  ;;  %v731_v12 = vmul.f32 %v726_v53, %v721_v0  ;;  %v732_v22 = vmul.f32 %v730_v19, %v721_v0 }
  0xf8   :  { %v746_v16 = vrot.slane %v700_v46, %v3438_v23  ;;  %v762_v0 = vrot.slane %v700_v46, %v3450_v57 }
  0xf9   :  { %v717_v8 = vadd.f32 %v715_v56, %v677_v17  ;;  %v718_v6 = vadd.f32 %v716_v28, %v678_v47 }
  0xfa   :  { %v737_v62 = vpop.permute.xlu1 %736 }
  0xfb   :  { %v733_v36 = vadd.f32 %v731_v12, %v717_v8  ;;  %v734_v63 = vadd.f32 %v732_v22, %v718_v6  ;;  %v747_v34 = vmul.f32 %v742_v26, %v737_v62  ;;  %v748_v45 = vmul.f32 %v746_v16, %v737_v62 }
  0xfc   :  { %v763_v8 = vmul.f32 %v758_v58, %v753_v2  ;;  %v764_v62 = vmul.f32 %v762_v0, %v753_v2 }
  0xfd   :  { %v749_v47 = vadd.f32 %v747_v34, %v733_v36  ;;  %v750_v53 = vadd.f32 %v748_v45, %v734_v63 }
  0xfe   :  { %v768_v27 = vpop.permute.xlu1 %767 }
  0xff   :  { %v765_v26 = vadd.f32 %v763_v8, %v749_v47  ;;  %v766_v16 = vadd.f32 %v764_v62, %v750_v53 }
 0x102   :  { %v770_v56 = vpop.permute.xlu1 %769 }
 0x103   :  { %v772_v28 = vsel %vm771_vm7, %v768_v27, %v770_v56  ;;  %v773_v17 = vsel %vm771_vm7, %v770_v56, %v768_v27 }
 0x104   :  { %v787_v19 = vmul.f32 %v3698_v25, %v772_v28  ;;  %v788_v6 = vmul.f32 %v3701_v7, %v773_v17  ;;  %v5020_v7 = vmov 6  }
 0x106   :  { %v798_v29 = vrot.slane %v787_v19, %v3407_v54  ;;  %v802_v46 = vrot.slane %v788_v6, %v3407_v54  ;;  %v814_v3 = vrot.slane %v787_v19, %v3410_v55  ;;  %v818_v12 = vrot.slane %v788_v6, %v3410_v55  ;;  %v809_v22 = vpop.permute.xlu1 %808 }
 0x107   :  { %v830_v63 = vrot.slane %v787_v19, %v3438_v23  ;;  %v834_v34 = vrot.slane %v788_v6, %v3438_v23  ;;  %v846_v45 = vrot.slane %v787_v19, %v3450_v57  ;;  %v850_v58 = vrot.slane %v788_v6, %v3450_v57 }
 0x108   :  { %v803_v27 = vmul.f32 %v798_v29, %v793_v49  ;;  %v804_v36 = vmul.f32 %v802_v46, %v793_v49  ;;  %v819_v56 = vmul.f32 %v814_v3, %v809_v22  ;;  %v820_v28 = vmul.f32 %v818_v12, %v809_v22 }
 0x109   :  { %v851_v49 = vmul.f32 %v846_v45, %v841_v11  ;;  %v852_v62 = vmul.f32 %v850_v58, %v841_v11  ;;  %v5002_v11 = vmov 26   ;;  %v5003_v12 = vmov 7  }
 0x10a   :  { %v805_v0 = vadd.f32 %v803_v27, %v765_v26  ;;  %v806_v2 = vadd.f32 %v804_v36, %v766_v16  ;;  %v5004_v22 = vmov 29   ;;  %v5005_v16 = vmov 8   ;;  %v3807_v27 = vld [vmem:[%s4876_s1] sm:$0xf] }
 0x10b   :  { %v825_v17 = vpop.permute.xlu1 %824  ;;  %v5007_v45 = vmov 11   ;;  %v5008_v58 = vmov 33  }
 0x10c   :  { %v821_v14 = vadd.f32 %v819_v56, %v805_v0  ;;  %v822_v44 = vadd.f32 %v820_v28, %v806_v2  ;;  %v835_v10 = vmul.f32 %v830_v63, %v825_v17  ;;  %v836_v47 = vmul.f32 %v834_v34, %v825_v17  ;;  %v3833_v56 = vld [vmem:[%s4876_s1] sm:$0xf] }
 0x10d   :  { %v5006_v63 = vmov 30   ;;  %v5009_v2 = vmov 12   ;;  %v5010_v17 = vmov 34  }
 0x10e   :  { %v837_v53 = vadd.f32 %v835_v10, %v821_v14  ;;  %v838_v8 = vadd.f32 %v836_v47, %v822_v44  ;;  %v3749_v10 = vld [vmem:[%s4877_s0 + $0x8] sm:$0xff]  ;;  %v3765_v14 = vld [vmem:[%s4876_s1] sm:$0xf] }
 0x110   :  { %v859_v29 = vpop.permute.xlu1 %858  ;;  %v853_v46 = vadd.f32 %v851_v49, %v837_v53  ;;  %v854_v43 = vadd.f32 %v852_v62, %v838_v8  ;;  %v5011_v53 = vmov 15   ;;  %v1509_v8 = vld [vmem:[%s4881_s4] sm:$0xf]  ;;  %v5012_v49 = vmov 0  }
 0x112   :  { %v861_v13 = vadd.f32 %v859_v29, %v853_v46  ;;  %v862_v19 = vadd.f32 %v859_v29, %v854_v43  ;;  %v3782_v43 = vld [vmem:[%s4876_s1] sm:$0xf]  ;;  %v5013_v29 = vmov 18  }
 0x113   :  { %v3859_v46 = vld [vmem:[%s4876_s1] sm:$0xf] }
 0x114   :  { %v3719_v42 = vmax.f32 %v861_v13, 0.0  ;;  %v3721_v6 = vmax.f32 %v862_v19, 0.0  ;;  %v3757_v13 = vcombine.high %v3749_v10, %v3749_v10  ;;  %v3785_v44 = vpop.permute.xlu1 %876 }
 0x116   :  { %867 = vrot.lane.b32.xlu0 %v3721_v6, %s3219_s25  ;;  %865 = vrot.lane.b32.xlu1 %v3719_v42, %s3219_s25  ;;  %5001 = vst [vmem:[#allocation12_spill] sm:$0xff] %v3757_v13 }
 0x119   :  { %v3789_v3 = vpop.permute.xlu1 %908 }
 0x11a   :  { %939 = vrot.lane.b32.xlu0 %v3719_v42, %s3222_s26  ;;  %941 = vrot.lane.b32.xlu1 %v3721_v6, %s3222_s26 }
 0x11e   :  { %1223 = vrot.lane.b32.xlu0 %v3721_v6, %s3237_s13  ;;  %1011 = vrot.lane.b32.xlu1 %v3719_v42, %s3225_s29  ;;  %v3798_v26 = vpop.permute.xlu1 %924 }
 0x122   :  { %1293 = vrot.lane.b32.xlu0 %v3719_v42, %s3239_s16  ;;  %1013 = vrot.lane.b32.xlu1 %v3721_v6, %s3225_s29 }
 0x123   :  { %v3809_v36 = vpop.permute.xlu1 %964 }
 0x126   :  { %1422 = vperm.xlu0 %3114, %v3433_v1   ;;  %1083 = vrot.lane.b32.xlu1 %v3719_v42, %s3235_s12 }
 0x128   :  { %v3815_v34 = vpop.permute.xlu1 %980 }
 0x12a   :  { %3136 = vset.pattern.permute.xlu0 %v4949_v37  ;;  %1085 = vrot.lane.b32.xlu1 %v3721_v6, %s3235_s12  ;;  %v5016_v37 = vmov 3  }
 0x12b   :  { %1494 = vperm.xlu0 %3136, %v3433_v1  }
 0x12d   :  { %v3823_v0 = vpop.permute.xlu1 %1036 }
 0x12e   :  { %1221 = vrot.lane.b32.xlu1 %v3719_v42, %s3237_s13 }
 0x12f   :  { %3137 = vset.pattern.permute.xlu0 %v4948_v5  ;;  %v5015_v5 = vmov 21  }
 0x130   :  { %892 = vperm.xlu0 %3137, %v3433_v1  }
 0x132   :  { %1230 = vperm.xlu1 %3127, %v3433_v1   ;;  %v3835_v28 = vpop.permute.xlu1 %1052 }
 0x134   :  { %1533 = vrot.lane.b32.xlu0 %v3757_v13, %s3219_s25 }
 0x136   :  { %3128 = vset.pattern.permute.xlu1 %v4955_v39  ;;  %v5018_v39 = vmov 5  }
 0x137   :  { %1262 = vperm.xlu1 %3128, %v3433_v1   ;;  %v3840_v47 = vpop.permute.xlu1 %1108 }
 0x138   :  { %1570 = vperm.xlu0 %3137, %v3765_v14  }
 0x13b   :  { %3129 = vset.pattern.permute.xlu1 %v4953_v40  ;;  %v3879_v40 = vld [vmem:[%s4876_s1] sm:$0xf] }
 0x13c   :  { %3139 = vset.pattern.permute.xlu0 %v4947_v9  ;;  %1278 = vperm.xlu1 %3129, %v3433_v1   ;;  %v3849_v62 = vpop.permute.xlu1 %1124 }
 0x13d   :  { %948 = vperm.xlu0 %3139, %v3433_v1  }
 0x140   :  { %1295 = vrot.lane.b32.xlu1 %v3721_v6, %s3239_s16 }
 0x141   :  { %1617 = vrot.lane.b32.xlu0 %v3749_v10, %s3222_s26  ;;  %3130 = vset.pattern.permute.xlu1 %v4951_v41  ;;  %v3861_v19 = vpop.permute.xlu1 %1158 }
 0x144   :  { %1318 = vperm.xlu1 %3130, %v3433_v1  }
 0x145   :  { %1640 = vperm.xlu0 %3139, %v3782_v43  }
 0x146   :  { %v3866_v9 = vpop.permute.xlu1 %1174 }
 0x148   :  { %3131 = vset.pattern.permute.xlu1 %v5002_v11 }
 0x149   :  { %3142 = vset.pattern.permute.xlu0 %v5003_v12  ;;  %1334 = vperm.xlu1 %3131, %v3433_v1  }
 0x14a   :  { %996 = vperm.xlu0 %3142, %v3433_v1  }
 0x14b   :  { %v3874_v41 = vpop.permute.xlu1 %1206 }
 0x14c   :  { %5017 = vst [vmem:[#allocation13_spill] sm:$0xff] %v3874_v41 }
 0x14d   :  { %1365 = vrot.lane.b32.xlu1 %v3719_v42, %s3255_s23 }
 0x14e   :  { %1688 = vperm.xlu0 %3142, %v3782_v43   ;;  %3132 = vset.pattern.permute.xlu1 %v5004_v22 }
 0x151   :  { %1367 = vrot.lane.b32.xlu1 %v3721_v6, %s3255_s23 }
 0x152   :  { %3145 = vset.pattern.permute.xlu0 %v5005_v16 }
 0x153   :  { %1020 = vperm.xlu0 %3145, %v3433_v1  }
 0x155   :  { %1390 = vperm.xlu1 %3132, %v3433_v1  }
 0x157   :  { %1726 = vperm.xlu0 %3145, %v3807_v27  }
 0x159   :  { %3133 = vset.pattern.permute.xlu1 %v5006_v63 }
 0x15a   :  { %1406 = vperm.xlu1 %3133, %v3433_v1  }
 0x15b   :  { %3146 = vset.pattern.permute.xlu0 %v5007_v45 }
 0x15c   :  { %1068 = vperm.xlu0 %3146, %v3433_v1  }
 0x15e   :  { %1437 = vrot.lane.b32.xlu1 %v3719_v42, %s3258_s24 }
 0x15f   :  { %3134 = vset.pattern.permute.xlu1 %v5008_v58 }
 0x160   :  { %1774 = vperm.xlu0 %3146, %v3807_v27  }
 0x162   :  { %1439 = vrot.lane.b32.xlu1 %v3721_v6, %s3258_s24 }
 0x164   :  { %3149 = vset.pattern.permute.xlu0 %v5009_v2 }
 0x165   :  { %1092 = vperm.xlu0 %3149, %v3433_v1  }
 0x166   :  { %1462 = vperm.xlu1 %3134, %v3433_v1  }
 0x169   :  { %1812 = vperm.xlu0 %3149, %v3833_v56  }
 0x16a   :  { %3135 = vset.pattern.permute.xlu1 %v5010_v17  ;;  %v5031_v17 = vmov 16  }
 0x16b   :  { %1478 = vperm.xlu1 %3135, %v3433_v1  }
 0x16d   :  { %3150 = vset.pattern.permute.xlu0 %v5011_v53 }
 0x16e   :  { %1140 = vperm.xlu0 %3150, %v3433_v1  }
 0x16f   :  { %3138 = vset.pattern.permute.xlu1 %v5012_v49 }
 0x170   :  { %1512 = vperm.xlu1 %3138, %v1509_v8   ;;  %v5014_v8 = vmov 2  }
 0x172   :  { %1860 = vperm.xlu0 %3150, %v3833_v56  }
 0x174   :  { %1531 = vrot.lane.b32.xlu1 %v3749_v10, %s3219_s25 }
 0x176   :  { %3153 = vset.pattern.permute.xlu0 %v5013_v29  ;;  %v5021_v29 = vmov 9  }
 0x177   :  { %1190 = vperm.xlu0 %3153, %v3433_v1  }
 0x178   :  { %1554 = vperm.xlu1 %3138, %v3765_v14  }
 0x17b   :  { %1946 = vperm.xlu0 %3153, %v3859_v46  }
 0x17c   :  { %3140 = vset.pattern.permute.xlu1 %v5014_v8 }
 0x17d   :  { %1586 = vperm.xlu1 %3140, %v3765_v14  }
 0x17f   :  { %3156 = vset.pattern.permute.xlu0 %v5015_v5 }
 0x180   :  { %1246 = vperm.xlu0 %3156, %v3433_v1  }
 0x181   :  { %3141 = vset.pattern.permute.xlu1 %v5016_v37  ;;  %v3952_v37 = vld [vmem:[%s4876_s1] sm:$0xf] }
 0x182   :  { %1602 = vperm.xlu1 %3141, %v3765_v14   ;;  %v5019_v14 = vmov 24  }
 0x184   :  { %1999 = vrot.lane.b32.xlu0 %v3757_v13, %s3237_s13 }
 0x186   :  { %1619 = vrot.lane.b32.xlu1 %v3757_v13, %s3222_s26 }
 0x187   :  { %3143 = vset.pattern.permute.xlu1 %v5018_v39 }
 0x188   :  { %2036 = vperm.xlu0 %3156, %v3879_v40   ;;  %v866_v4 = vpop.permute.xlu1 %865  ;;  %v868_v33 = vpop.permute.xlu0 %867 }
 0x189   :  { %v870_v45 = vsel %vm33_vm0, %v868_v33, %v866_v4 }
 0x18a   :  { %1656 = vperm.xlu1 %3143, %v3782_v43  }
 0x18c   :  { %3159 = vset.pattern.permute.xlu0 %v5019_v14  ;;  %v942_v25 = vpop.permute.xlu1 %941  ;;  %v940_v2 = vpop.permute.xlu0 %939 }
 0x18d   :  { %1302 = vperm.xlu0 %3159, %v3433_v1  }
 0x18e   :  { %3144 = vset.pattern.permute.xlu1 %v5020_v7 }
 0x18f   :  { %1672 = vperm.xlu1 %3144, %v3782_v43   ;;  %v5022_v43 = vmov 27  }
 0x190   :  { %v3900_v53 = vpop.permute.xlu1 %1011  ;;  %v3910_v5 = vpop.permute.xlu0 %1223 }
 0x191   :  { %2083 = vrot.lane.b32.xlu0 %v3749_v10, %s3239_s16 }
 0x193   :  { %1703 = vrot.lane.b32.xlu1 %v3749_v10, %s3225_s29 }
 0x194   :  { %3147 = vset.pattern.permute.xlu1 %v5021_v29  ;;  %v3907_v14 = vpop.permute.xlu1 %1013  ;;  %v5023_v29 = vmov 10   ;;  %v3917_v7 = vpop.permute.xlu0 %1293 }
 0x195   :  { %2106 = vperm.xlu0 %3159, %v3895_v30   ;;  %5024 = vst [vmem:[#allocation14_spill] sm:$0xff] %v3917_v7  ;;  %v943_v7 = vsel %vm120_vm1, %v940_v2, %v942_v25 }
 0x197   :  { %1705 = vrot.lane.b32.xlu1 %v3757_v13, %s3225_s29 }
 0x198   :  { %v3915_v12 = vpop.permute.xlu1 %1083 }
 0x199   :  { %3162 = vset.pattern.permute.xlu0 %v5022_v43  ;;  %v3928_v43 = vld [vmem:[%s4876_s1] sm:$0xf] }
 0x19a   :  { %1350 = vperm.xlu0 %3162, %v3433_v1   ;;  %v5025_v1 = vmov 13  }
 0x19b   :  { %1742 = vperm.xlu1 %3147, %v3807_v27  }
 0x19e   :  { %2154 = vperm.xlu0 %3162, %v3895_v30  }
 0x19f   :  { %3148 = vset.pattern.permute.xlu1 %v5023_v29  ;;  %v3933_v29 = vpop.permute.xlu1 %1085 }
 0x1a0   :  { %1758 = vperm.xlu1 %3148, %v3807_v27  }
 0x1a2   :  { %2171 = vrot.lane.b32.xlu0 %v3757_v13, %s3255_s23 }
 0x1a3   :  { %3167 = vset.pattern.permute.xlu0 %v5006_v63 }
 0x1a4   :  { %1789 = vrot.lane.b32.xlu1 %v3749_v10, %s3235_s12 }
 0x1a5   :  { %3151 = vset.pattern.permute.xlu1 %v5025_v1  ;;  %v3930_v27 = vpop.permute.xlu0 %1422  ;;  %v869_v1 = vsel %vm33_vm0, %v866_v4, %v868_v33  ;;  %v2341_v4 = vld [vmem:[%s4879_s2] sm:$0xf] }
 0x1a6   :  { %5026 = vst [vmem:[#allocation15_spill] sm:$0xff] %v3930_v27  ;;  %2224 = vperm.xlu0 %3167, %v3928_v43   ;;  %v3947_v27 = vpop.permute.xlu1 %1221  ;;  %v872_v16 = vmul.f32 %v869_v1, %v3423_v61 }
 0x1a8   :  { %1791 = vrot.lane.b32.xlu1 %v3757_v13, %s3235_s12  ;;  %v886_v48 = vrot.slane %v872_v16, %v3407_v54  ;;  %v902_v61 = vrot.slane %v872_v16, %v3410_v55  ;;  %v934_v15 = vrot.slane %v872_v16, %v3450_v57 }
 0x1aa   :  { %v3937_v63 = vpop.permute.xlu0 %1494  ;;  %2255 = vrot.lane.b32.xlu0 %v3749_v10, %s3258_s24 }
 0x1ab   :  { %5027 = vst [vmem:[#allocation16_spill] sm:$0xff] %v3937_v63  ;;  %3170 = vset.pattern.permute.xlu0 %v5008_v58  ;;  %v871_v63 = vmul.f32 %v870_v45, %v3420_v60 }
 0x1ac   :  { %1828 = vperm.xlu1 %3151, %v3833_v56  }
 0x1ad   :  { %v882_v58 = vrot.slane %v871_v63, %v3407_v54  ;;  %v898_v60 = vrot.slane %v871_v63, %v3410_v55  ;;  %v930_v31 = vrot.slane %v871_v63, %v3450_v57 }
 0x1ae   :  { %2294 = vperm.xlu0 %3170, %v3952_v37  }
 0x1af   :  { %v893_v50 = vpop.permute.xlu0 %892  ;;  %v887_v41 = vmul.f32 %v882_v58, %v3785_v44 }
 0x1b0   :  { %3152 = vset.pattern.permute.xlu1 %v5028_v59  ;;  %v903_v1 = vmul.f32 %v898_v60, %v893_v50  ;;  %v904_v59 = vmul.f32 %v902_v61, %v893_v50  ;;  %v918_v50 = vrot.slane %v872_v16, %v3438_v23 }
 0x1b1   :  { %1844 = vperm.xlu1 %3152, %v3833_v56   ;;  %v3962_v33 = vpop.permute.xlu1 %1230  ;;  %v2359_v56 = vld [vmem:[%s4880_s3] sm:$0xf] }
 0x1b2   :  { %5029 = vst [vmem:[#allocation17_spill] sm:$0xff] %v3962_v33  ;;  %3173 = vset.pattern.permute.xlu0 %v5012_v49  ;;  %v944_v33 = vsel %vm120_vm1, %v942_v25, %v940_v2  ;;  %v888_v49 = vmul.f32 %v886_v48, %v3785_v44  ;;  %v946_v25 = vmul.f32 %v943_v7, %v3460_v38  ;;  %v5033_v44 = vmov 17  }
 0x1b3   :  { %v3969_v45 = vpop.permute.xlu0 %1533  ;;  %2344 = vperm.xlu0 %3173, %v2341_v4   ;;  %v914_v4 = vrot.slane %v871_v63, %v3438_v23  ;;  %v905_v2 = vadd.f32 %v903_v1, %v887_v41  ;;  %v920_v48 = vmul.f32 %v918_v50, %v3789_v3  ;;  %v936_v63 = vmul.f32 %v934_v15, %v3798_v26 }
 0x1b4   :  { %5030 = vst [vmem:[#allocation18_spill] sm:$0xff] %v3969_v45  ;;  %v945_v45 = vmul.f32 %v944_v33, %v3457_v35  ;;  %v958_v7 = vrot.slane %v946_v25, %v3407_v54  ;;  %v5034_v1 = vmov 19   ;;  %v974_v50 = vrot.slane %v946_v25, %v3410_v55 }
 0x1b5   :  { %3154 = vset.pattern.permute.xlu1 %v5031_v17  ;;  %v906_v17 = vadd.f32 %v904_v59, %v888_v49  ;;  %v919_v58 = vmul.f32 %v914_v4, %v3789_v3  ;;  %v935_v3 = vmul.f32 %v930_v31, %v3798_v26 }
 0x1b6   :  { %1893 = vperm.xlu1 %3154, %v3859_v46   ;;  %v3984_v60 = vpop.permute.xlu1 %1262  ;;  %v954_v59 = vrot.slane %v945_v45, %v3407_v54  ;;  %v970_v33 = vrot.slane %v945_v45, %v3410_v55 }
 0x1b7   :  { %v3986_v61 = vpop.permute.xlu0 %1570  ;;  %2362 = vperm.xlu0 %3173, %v2359_v56   ;;  %v921_v35 = vadd.f32 %v919_v58, %v905_v2  ;;  %v922_v38 = vadd.f32 %v920_v48, %v906_v17  ;;  %v976_v58 = vmul.f32 %v974_v50, %v3809_v36 }
 0x1b8   :  { %5032 = vst [vmem:[#allocation19_spill] sm:$0xff] %v3986_v61 }
 0x1b9   :  { %v938_v17 = vadd.f32 %v936_v63, %v922_v38  ;;  %v5035_v38 = vmov 20   ;;  %v1006_v63 = vrot.slane %v946_v25, %v3450_v57 }
 0x1ba   :  { %3155 = vset.pattern.permute.xlu1 %v5033_v44 }
 0x1bb   :  { %1920 = vperm.xlu1 %3155, %v3859_v46   ;;  %v3996_v61 = vpop.permute.xlu1 %1278  ;;  %3175 = vset.pattern.permute.xlu0 %v5014_v8  ;;  %v937_v8 = vadd.f32 %v935_v3, %v921_v35  ;;  %v986_v35 = vrot.slane %v945_v45, %v3438_v23  ;;  %v1002_v3 = vrot.slane %v945_v45, %v3450_v57  ;;  %v5036_v45 = vmov 22  }
 0x1bc   :  { %v949_v41 = vpop.permute.xlu0 %948  ;;  %2394 = vperm.xlu0 %3175, %v2359_v56   ;;  %v975_v56 = vmul.f32 %v970_v33, %v3809_v36 }
 0x1bd   :  { %v959_v49 = vmul.f32 %v954_v59, %v949_v41  ;;  %v960_v16 = vmul.f32 %v958_v7, %v949_v41  ;;  %v991_v7 = vmul.f32 %v986_v35, %v3815_v34 }
 0x1bf   :  { %3157 = vset.pattern.permute.xlu1 %v5034_v1  ;;  %v4005_v4 = vpop.permute.xlu1 %1295  ;;  %v961_v31 = vadd.f32 %v959_v49, %v937_v8  ;;  %v962_v15 = vadd.f32 %v960_v16, %v938_v17  ;;  %v1015_v49 = vsel %vm208_vm2, %v3900_v53, %v3907_v14  ;;  %v1016_v16 = vsel %vm208_vm2, %v3907_v14, %v3900_v53 }
 0x1c0   :  { %1972 = vperm.xlu1 %3157, %v3859_v46   ;;  %v4009_v2 = vpop.permute.xlu0 %1617  ;;  %3178 = vset.pattern.permute.xlu0 %v5018_v39  ;;  %v990_v46 = vrot.slane %v946_v25, %v3438_v23  ;;  %v5039_v14 = vmov 23  }
 0x1c1   :  { %v977_v39 = vadd.f32 %v975_v56, %v961_v31  ;;  %v978_v41 = vadd.f32 %v976_v58, %v962_v15  ;;  %v1017_v56 = vmul.f32 %v1016_v16, %v3485_v18  ;;  %v1018_v58 = vmul.f32 %v1015_v49, %v3488_v52 }
 0x1c2   :  { %v992_v36 = vmul.f32 %v990_v46, %v3815_v34 }
 0x1c3   :  { %v4012_v26 = vpop.permute.xlu1 %1318  ;;  %v993_v8 = vadd.f32 %v991_v7, %v977_v39  ;;  %v1026_v46 = vrot.slane %v1017_v56, %v3407_v54  ;;  %v1030_v39 = vrot.slane %v1018_v58, %v3407_v54  ;;  %v1042_v7 = vrot.slane %v1017_v56, %v3410_v55 }
 0x1c4   :  { %1997 = vrot.lane.b32.xlu1 %v3749_v10, %s3237_s13  ;;  %v4018_v48 = vpop.permute.xlu0 %1640  ;;  %v994_v17 = vadd.f32 %v992_v36, %v978_v41  ;;  %v1046_v36 = vrot.slane %v1018_v58, %v3410_v55 }
 0x1c5   :  { %3158 = vset.pattern.permute.xlu1 %v5035_v38  ;;  %v1047_v16 = vmul.f32 %v1042_v7, %v3823_v0  ;;  %v1087_v7 = vsel %vm296_vm3, %v3915_v12, %v3933_v29 }
 0x1c8   :  { %2020 = vperm.xlu1 %3158, %v3879_v40   ;;  %v4024_v59 = vpop.permute.xlu1 %1334 }
 0x1c9   :  { %v997_v33 = vpop.permute.xlu0 %996 }
 0x1ca   :  { %v1007_v50 = vmul.f32 %v1002_v3, %v997_v33  ;;  %v1008_v31 = vmul.f32 %v1006_v63, %v997_v33  ;;  %v1048_v33 = vmul.f32 %v1046_v36, %v3823_v0  ;;  %v1088_v36 = vsel %vm296_vm3, %v3933_v29, %v3915_v12 }
 0x1cb   :  { %v5045_v29 = vmov 28  }
 0x1cc   :  { %v1009_v34 = vadd.f32 %v1007_v50, %v993_v8  ;;  %v1010_v15 = vadd.f32 %v1008_v31, %v994_v17  ;;  %3160 = vset.pattern.permute.xlu1 %v5036_v45  ;;  %v4039_v25 = vpop.permute.xlu1 %1365  ;;  %v1058_v17 = vrot.slane %v1017_v56, %v3438_v23  ;;  %v1062_v50 = vrot.slane %v1018_v58, %v3438_v23 }
 0x1cd   :  { %5037 = vst [vmem:[#allocation20_spill] sm:$0xff] %v4039_v25  ;;  %2052 = vperm.xlu1 %3160, %v3879_v40   ;;  %v4044_v35 = vpop.permute.xlu0 %1688 }
 0x1ce   :  { %v1064_v0 = vmul.f32 %v1062_v50, %v3835_v28 }
 0x1d0   :  { %v4046_v53 = vpop.permute.xlu1 %1367 }
 0x1d1   :  { %5038 = vst [vmem:[#allocation21_spill] sm:$0xff] %v4046_v53  ;;  %3161 = vset.pattern.permute.xlu1 %v5039_v14 }
 0x1d2   :  { %v1021_v41 = vpop.permute.xlu0 %1020  ;;  %2068 = vperm.xlu1 %3161, %v3879_v40   ;;  %v5041_v40 = vmov 25  }
 0x1d3   :  { %v1031_v18 = vmul.f32 %v1026_v46, %v1021_v41  ;;  %v1032_v52 = vmul.f32 %v1030_v39, %v1021_v41  ;;  %v1078_v41 = vrot.slane %v1018_v58, %v3450_v57  ;;  %v1089_v58 = vmul.f32 %v1088_v36, %v3522_v20 }
 0x1d4   :  { %v4054_v3 = vpop.permute.xlu1 %1390 }
 0x1d5   :  { %5040 = vst [vmem:[#allocation22_spill] sm:$0xff] %v4054_v3  ;;  %v1033_v63 = vadd.f32 %v1031_v18, %v1009_v34  ;;  %v1034_v49 = vadd.f32 %v1032_v52, %v1010_v15  ;;  %v1063_v34 = vmul.f32 %v1058_v17, %v3835_v28  ;;  %v1074_v15 = vrot.slane %v1017_v56, %v3450_v57 }
 0x1d6   :  { %2085 = vrot.lane.b32.xlu1 %v3757_v13, %s3239_s16  ;;  %v4060_v8 = vpop.permute.xlu0 %1726  ;;  %v1090_v17 = vmul.f32 %v1087_v7, %v3525_v24 }
 0x1d7   :  { %3163 = vset.pattern.permute.xlu1 %v5041_v40  ;;  %v1049_v31 = vadd.f32 %v1047_v16, %v1033_v63  ;;  %v1050_v46 = vadd.f32 %v1048_v33, %v1034_v49 }
 0x1d9   :  { %v4065_v39 = vpop.permute.xlu1 %1406  ;;  %v1065_v52 = vadd.f32 %v1063_v34, %v1049_v31  ;;  %v1066_v63 = vadd.f32 %v1064_v0, %v1050_v46  ;;  %v1098_v31 = vrot.slane %v1089_v58, %v3407_v54  ;;  %v1102_v46 = vrot.slane %v1090_v17, %v3407_v54 }
 0x1da   :  { %5042 = vst [vmem:[#allocation23_spill] sm:$0xff] %v4065_v39  ;;  %2122 = vperm.xlu1 %3163, %v3895_v30   ;;  %v1114_v0 = vrot.slane %v1089_v58, %v3410_v55 }
 0x1db   :  { %v1069_v18 = vpop.permute.xlu0 %1068 }
 0x1dc   :  { %v1079_v49 = vmul.f32 %v1074_v15, %v1069_v18  ;;  %v1080_v16 = vmul.f32 %v1078_v41, %v1069_v18  ;;  %v1118_v15 = vrot.slane %v1090_v17, %v3410_v55  ;;  %v1119_v36 = vmul.f32 %v1114_v0, %v3840_v47 }
 0x1dd   :  { %v4080_v28 = vpop.permute.xlu1 %1437  ;;  %v1150_v0 = vrot.slane %v1090_v17, %v3450_v57 }
 0x1de   :  { %5043 = vst [vmem:[#allocation24_spill] sm:$0xff] %v4080_v28  ;;  %v1081_v56 = vadd.f32 %v1079_v49, %v1065_v52  ;;  %v1082_v33 = vadd.f32 %v1080_v16, %v1066_v63  ;;  %3164 = vset.pattern.permute.xlu1 %v5002_v11  ;;  %v1120_v18 = vmul.f32 %v1118_v15, %v3840_v47 }
 0x1df   :  { %2138 = vperm.xlu1 %3164, %v3895_v30   ;;  %v4086_v50 = vpop.permute.xlu0 %1774  ;;  %v1130_v63 = vrot.slane %v1089_v58, %v3438_v23  ;;  %v1134_v49 = vrot.slane %v1090_v17, %v3438_v23  ;;  %v1156_v47 = vmul.f32 %v3721_v6, %v3555_v21 }
 0x1e1   :  { %v4088_v12 = vpop.permute.xlu1 %1439 }
 0x1e2   :  { %5044 = vst [vmem:[#allocation25_spill] sm:$0xff] %v4088_v12 }
 0x1e3   :  { %3165 = vset.pattern.permute.xlu1 %v5045_v29 }
 0x1e4   :  { %v1093_v34 = vpop.permute.xlu0 %1092  ;;  %2192 = vperm.xlu1 %3165, %v3928_v43  }
 0x1e5   :  { %v1103_v20 = vmul.f32 %v1098_v31, %v1093_v34  ;;  %v1104_v24 = vmul.f32 %v1102_v46, %v1093_v34  ;;  %v4096_v30 = vpop.permute.xlu1 %1462  ;;  %v1146_v34 = vrot.slane %v1089_v58, %v3450_v57 }
 0x1e6   :  { %5046 = vst [vmem:[#allocation26_spill] sm:$0xff] %v4096_v30 }
 0x1e7   :  { %v1105_v41 = vadd.f32 %v1103_v20, %v1081_v56  ;;  %v1106_v7 = vadd.f32 %v1104_v24, %v1082_v33  ;;  %v1155_v56 = vmul.f32 %v3719_v42, %v3552_v32  ;;  %v1136_v33 = vmul.f32 %v1134_v49, %v3849_v62 }
 0x1e8   :  { %2169 = vrot.lane.b32.xlu1 %v3749_v10, %s3255_s23  ;;  %v4102_v52 = vpop.permute.xlu0 %1812  ;;  %v1135_v10 = vmul.f32 %v1130_v63, %v3849_v62  ;;  %v1168_v32 = vrot.slane %v1156_v47, %v3407_v54  ;;  %v1184_v49 = vrot.slane %v1156_v47, %v3410_v55 }
 0x1e9   :  { %3166 = vset.pattern.permute.xlu1 %v5004_v22  ;;  %v1121_v16 = vadd.f32 %v1119_v36, %v1105_v41  ;;  %v1122_v31 = vadd.f32 %v1120_v18, %v1106_v7  ;;  %v1164_v42 = vrot.slane %v1155_v56, %v3407_v54  ;;  %v5049_v18 = vmov 31  }
 0x1ea   :  { %v4107_v46 = vpop.permute.xlu1 %1478  ;;  %v1170_v58 = vmul.f32 %v1168_v32, %v3861_v19  ;;  %v1180_v63 = vrot.slane %v1155_v56, %v3410_v55 }
 0x1eb   :  { %5047 = vst [vmem:[#allocation27_spill] sm:$0xff] %v4107_v46  ;;  %v1137_v20 = vadd.f32 %v1135_v10, %v1121_v16  ;;  %v1138_v24 = vadd.f32 %v1136_v33, %v1122_v31  ;;  %v1169_v62 = vmul.f32 %v1164_v42, %v3861_v19  ;;  %v1200_v33 = vrot.slane %v1156_v47, %v3438_v23 }
 0x1ec   :  { %2208 = vperm.xlu1 %3166, %v3928_v43   ;;  %v1225_v19 = vsel %vm507_vm4, %v3947_v27, %v3910_v5 }
 0x1ed   :  { %v1141_v15 = vpop.permute.xlu0 %1140 }
 0x1ee   :  { %v1151_v41 = vmul.f32 %v1146_v34, %v1141_v15  ;;  %v1152_v7 = vmul.f32 %v1150_v0, %v1141_v15  ;;  %v1196_v34 = vrot.slane %v1155_v56, %v3438_v23  ;;  %v1185_v0 = vmul.f32 %v1180_v63, %v3866_v9  ;;  %v5052_v63 = vld [vmem:[#allocation5_spill] sm:$0xff] }
 0x1ef   :  { %v4120_v21 = vpop.permute.xlu1 %1512  ;;  %v1186_v15 = vmul.f32 %v1184_v49, %v3866_v9 }
 0x1f0   :  { %5048 = vst [vmem:[#allocation28_spill] sm:$0xff] %v4120_v21  ;;  %v1153_v6 = vadd.f32 %v1151_v41, %v1137_v20  ;;  %v1154_v36 = vadd.f32 %v1152_v7, %v1138_v24  ;;  %3168 = vset.pattern.permute.xlu1 %v5049_v18  ;;  %v5050_v20 = vmov 32   ;;  %v5053_v21 = vld [vmem:[#allocation13_spill] sm:$0xff] }
 0x1f1   :  { %2240 = vperm.xlu1 %3168, %v3928_v43   ;;  %v4126_v17 = vpop.permute.xlu0 %1860  ;;  %v1226_v43 = vsel %vm507_vm4, %v3910_v5, %v3947_v27 }
 0x1f2   :  { %v1171_v16 = vadd.f32 %v1169_v62, %v1153_v6  ;;  %v1172_v31 = vadd.f32 %v1170_v58, %v1154_v36  ;;  %v1212_v6 = vrot.slane %v1155_v56, %v3450_v57  ;;  %v1216_v36 = vrot.slane %v1156_v47, %v3450_v57  ;;  %v5051_v62 = vld [vmem:[#allocation4_spill] sm:$0xff] }
 0x1f3   :  { %v1532_v10 = vpop.permute.xlu1 %1531  ;;  %v1227_v58 = vmul.f32 %v1225_v19, %v5051_v62  ;;  %v1228_v49 = vmul.f32 %v1226_v43, %v5052_v63  ;;  %v5056_v62 = vmov 35   ;;  %v1537_v63 = vld [vmem:[%s4878_s5] ss:$8 sm:$0x3] }
 0x1f4   :  { %v1187_v41 = vadd.f32 %v1185_v0, %v1171_v16  ;;  %v1188_v7 = vadd.f32 %v1186_v15, %v1172_v31  ;;  %v1217_v46 = vmul.f32 %v1212_v6, %v5053_v21  ;;  %v1218_v30 = vmul.f32 %v1216_v36, %v5053_v21  ;;  %v5055_v15 = vld [vmem:[#allocation17_spill] sm:$0xff] }
 0x1f5   :  { %3169 = vset.pattern.permute.xlu1 %v5050_v20  ;;  %v5054_v31 = vmov 34   ;;  %v1236_v56 = vrot.slane %v1227_v58, %v3407_v54  ;;  %v1240_v47 = vrot.slane %v1228_v49, %v3407_v54  ;;  %v1252_v21 = vrot.slane %v1227_v58, %v3410_v55 }
 0x1f6   :  { %v1191_v24 = vpop.permute.xlu0 %1190  ;;  %2278 = vperm.xlu1 %3169, %v3952_v37  }
 0x1f7   :  { %v1201_v42 = vmul.f32 %v1196_v34, %v1191_v24  ;;  %v1202_v32 = vmul.f32 %v1200_v33, %v1191_v24  ;;  %v4144_v9 = vpop.permute.xlu1 %1554  ;;  %v1241_v19 = vmul.f32 %v1236_v56, %v5055_v15  ;;  %v1242_v43 = vmul.f32 %v1240_v47, %v5055_v15  ;;  %v5057_v47 = vld [vmem:[#allocation14_spill] sm:$0xff] }
 0x1f8   :  { %v1256_v24 = vrot.slane %v1228_v49, %v3410_v55  ;;  %v1272_v56 = vrot.slane %v1228_v49, %v3438_v23 }
 0x1f9   :  { %v1203_v5 = vadd.f32 %v1201_v42, %v1187_v41  ;;  %v1204_v27 = vadd.f32 %v1202_v32, %v1188_v7 }
 0x1fa   :  { %2257 = vrot.lane.b32.xlu1 %v3757_v13, %s3258_s24  ;;  %v4154_v16 = vpop.permute.xlu0 %1946 }
 0x1fb   :  { %3171 = vset.pattern.permute.xlu1 %v5054_v31  ;;  %v1219_v33 = vadd.f32 %v1217_v46, %v1203_v5  ;;  %v1220_v34 = vadd.f32 %v1218_v30, %v1204_v27  ;;  %v1268_v27 = vrot.slane %v1227_v58, %v3438_v23  ;;  %v3027_v31 = vld [vmem:[%s4878_s5 + $0x2] ss:$8 sm:$0x3] }
 0x1fc   :  { %v4159_v0 = vpop.permute.xlu1 %1586 }
 0x1fd   :  { %v1243_v7 = vadd.f32 %v1241_v19, %v1219_v33  ;;  %v1244_v42 = vadd.f32 %v1242_v43, %v1220_v34  ;;  %v1297_v33 = vsel %vm595_vm5, %v5057_v47, %v4005_v4  ;;  %v1298_v34 = vsel %vm595_vm5, %v4005_v4, %v5057_v47 }
 0x1fe   :  { %2310 = vperm.xlu1 %3171, %v3952_v37   ;;  %v1273_v19 = vmul.f32 %v1268_v27, %v3984_v60  ;;  %v4188_v43 = vrot.slane %v1537_v63, %v3407_v54  ;;  %v5062_v27 = vmov 1  }
 0x1ff   :  { %v1247_v41 = vpop.permute.xlu0 %1246 }
 0x200   :  { %v1257_v32 = vmul.f32 %v1252_v21, %v1247_v41  ;;  %v1258_v6 = vmul.f32 %v1256_v24, %v1247_v41  ;;  %v4191_v21 = vrot.slane %v1537_v63, %v3410_v55  ;;  %v5059_v24 = vld [vmem:[#allocation6_spill] sm:$0xff]  ;;  %v1284_v63 = vrot.slane %v1227_v58, %v3450_v57 }
 0x201   :  { %v4166_v36 = vpop.permute.xlu1 %1602  ;;  %v4194_v41 = vmul.f32 %v1297_v33, %v5059_v24 }
 0x202   :  { %v1259_v30 = vadd.f32 %v1257_v32, %v1243_v7  ;;  %v1260_v46 = vadd.f32 %v1258_v6, %v1244_v42  ;;  %3172 = vset.pattern.permute.xlu1 %v5056_v62  ;;  %5058 = vst [vmem:[#allocation4_spill] sm:$0xff] %v4191_v21  ;;  %v5060_v7 = vld [vmem:[#allocation7_spill] sm:$0xff]  ;;  %v5061_v32 = vld [vmem:[#allocation18_spill] sm:$0xff] }
 0x203   :  { %2326 = vperm.xlu1 %3172, %v3952_v37   ;;  %v4173_v5 = vpop.permute.xlu0 %1999  ;;  %v1274_v37 = vmul.f32 %v1272_v56, %v3984_v60  ;;  %v4197_v42 = vmul.f32 %v1298_v34, %v5060_v7  ;;  %v1535_v4 = vsel %vm33_vm0, %v1532_v10, %v5061_v32  ;;  %v1536_v60 = vsel %vm33_vm0, %v5061_v32, %v1532_v10  ;;  %v3026_v34 = vld [vmem:[%s4878_s5 + $0x1] ss:$8 sm:$0x3] }
 0x204   :  { %v1288_v56 = vrot.slane %v1228_v49, %v3450_v57  ;;  %v1275_v47 = vadd.f32 %v1273_v19, %v1259_v30  ;;  %v1549_v7 = vmul.f32 %v4188_v43, %v1536_v60  ;;  %v1550_v10 = vmul.f32 %v4191_v21, %v1535_v4 }
 0x205   :  { %v1620_v15 = vpop.permute.xlu1 %1619  ;;  %v1276_v33 = vadd.f32 %v1274_v37, %v1260_v46  ;;  %v1289_v32 = vmul.f32 %v1284_v63, %v3996_v61  ;;  %v1308_v58 = vrot.slane %v4194_v41, %v3407_v54  ;;  %v1312_v49 = vrot.slane %v4197_v42, %v3407_v54 }
 0x206   :  { %v4224_v30 = vrot.slane %v3026_v34, %v3407_v54  ;;  %v4227_v46 = vrot.slane %v3026_v34, %v3410_v55  ;;  %v1560_v63 = vrot.slane %v1549_v7, %v3407_v54  ;;  %v1622_v39 = vsel %vm120_vm1, %v1620_v15, %v4009_v2 }
 0x207   :  { %v4205_v6 = vpop.permute.xlu0 %2036  ;;  %3174 = vset.pattern.permute.xlu1 %v5062_v27  ;;  %v1290_v27 = vmul.f32 %v1288_v56, %v3996_v61  ;;  %v1291_v37 = vadd.f32 %v1289_v32, %v1275_v47  ;;  %v1564_v61 = vrot.slane %v1550_v10, %v3407_v54  ;;  %v1621_v56 = vsel %vm120_vm1, %v4009_v2, %v1620_v15 }
 0x208   :  { %5063 = vst [vmem:[#allocation5_spill] sm:$0xff] %v4224_v30  ;;  %5064 = vst [vmem:[#allocation13_spill] sm:$0xff] %v4227_v46  ;;  %v1576_v34 = vrot.slane %v1549_v7, %v3410_v55  ;;  %v1580_v47 = vrot.slane %v1550_v10, %v3410_v55  ;;  %v4251_v2 = vmul.f32 %v4227_v46, %v1621_v56 }
 0x209   :  { %v4213_v24 = vpop.permute.xlu1 %1656  ;;  %v1292_v60 = vadd.f32 %v1290_v27, %v1276_v33  ;;  %v1324_v27 = vrot.slane %v4194_v41, %v3410_v55  ;;  %v1592_v15 = vrot.slane %v1549_v7, %v3438_v23  ;;  %v1596_v12 = vrot.slane %v1550_v10, %v3438_v23 }
 0x20a   :  { %v1565_v3 = vmul.f32 %v1560_v63, %v4144_v9  ;;  %v1566_v25 = vmul.f32 %v1564_v61, %v4144_v9  ;;  %v1608_v56 = vrot.slane %v1549_v7, %v3450_v57  ;;  %v1612_v46 = vrot.slane %v1550_v10, %v3450_v57 }
 0x20b   :  { %v1329_v53 = vmul.f32 %v1324_v27, %v4012_v26  ;;  %v1597_v62 = vmul.f32 %v1592_v15, %v4159_v0  ;;  %v1650_v9 = vrot.slane %v4251_v2, %v3407_v54  ;;  %v1340_v63 = vrot.slane %v4194_v41, %v3438_v23 }
 0x20c   :  { %v1303_v19 = vpop.permute.xlu0 %1302  ;;  %v1613_v15 = vmul.f32 %v1608_v56, %v4166_v36  ;;  %v1356_v21 = vrot.slane %v4194_v41, %v3450_v57  ;;  %v4292_v41 = vrot.slane %v3027_v31, %v3410_v55 }
 0x20d   :  { %v1313_v4 = vmul.f32 %v1308_v58, %v1303_v19  ;;  %v1314_v13 = vmul.f32 %v1312_v49, %v1303_v19  ;;  %v1328_v58 = vrot.slane %v4197_v42, %v3410_v55  ;;  %v4248_v19 = vmul.f32 %v4224_v30, %v1622_v39 }
 0x20e   :  { %v4237_v28 = vpop.permute.xlu1 %1672 }
 0x20f   :  { %v1315_v33 = vadd.f32 %v1313_v4, %v1291_v37  ;;  %v1316_v32 = vadd.f32 %v1314_v13, %v1292_v60  ;;  %v5065_v13 = vld [vmem:[#allocation19_spill] sm:$0xff]  ;;  %v1330_v39 = vmul.f32 %v1328_v58, %v4012_v26  ;;  %v1344_v26 = vrot.slane %v4197_v42, %v3438_v23 }
 0x210   :  { %v4245_v49 = vpop.permute.xlu0 %2083  ;;  %v1581_v60 = vmul.f32 %v1576_v34, %v5065_v13  ;;  %v1582_v4 = vmul.f32 %v1580_v47, %v5065_v13  ;;  %v1598_v34 = vmul.f32 %v1596_v12, %v4159_v0  ;;  %v1646_v47 = vrot.slane %v4248_v19, %v3407_v54 }
 0x211   :  { %v1331_v7 = vadd.f32 %v1329_v53, %v1315_v33  ;;  %v1332_v10 = vadd.f32 %v1330_v39, %v1316_v32  ;;  %v1614_v12 = vmul.f32 %v1612_v46, %v4166_v36  ;;  %v1345_v0 = vmul.f32 %v1340_v63, %v4024_v59 }
 0x212   :  { %v1704_v37 = vpop.permute.xlu1 %1703  ;;  %v1583_v27 = vadd.f32 %v1581_v60, %v1565_v3  ;;  %v1584_v58 = vadd.f32 %v1582_v4, %v1566_v25  ;;  %v1346_v13 = vmul.f32 %v1344_v26, %v4024_v59  ;;  %v1360_v53 = vrot.slane %v4197_v42, %v3450_v57 }
 0x213   :  { %v1651_v33 = vmul.f32 %v1646_v47, %v4018_v48  ;;  %v1652_v36 = vmul.f32 %v1650_v9, %v4018_v48  ;;  %v1347_v32 = vadd.f32 %v1345_v0, %v1331_v7  ;;  %v4289_v26 = vrot.slane %v3027_v31, %v3407_v54 }
 0x214   :  { %v4263_v30 = vpop.permute.xlu0 %2106  ;;  %v1599_v3 = vadd.f32 %v1597_v62, %v1583_v27  ;;  %v1600_v25 = vadd.f32 %v1598_v34, %v1584_v58  ;;  %v1348_v60 = vadd.f32 %v1346_v13, %v1332_v10  ;;  %v1662_v62 = vrot.slane %v4248_v19, %v3410_v55 }
 0x215   :  { %v1666_v48 = vrot.slane %v4251_v2, %v3410_v55  ;;  %v1678_v31 = vrot.slane %v4248_v19, %v3438_v23  ;;  %v1682_v10 = vrot.slane %v4251_v2, %v3438_v23 }
 0x216   :  { %v1706_v61 = vpop.permute.xlu1 %1705  ;;  %v1615_v56 = vadd.f32 %v1613_v15, %v1599_v3  ;;  %v1616_v63 = vadd.f32 %v1614_v12, %v1600_v25  ;;  %v1667_v58 = vmul.f32 %v1662_v62, %v4213_v24  ;;  %v1694_v25 = vrot.slane %v4248_v19, %v3450_v57 }
 0x217   :  { %v1708_v47 = vsel %vm208_vm2, %v1706_v61, %v1704_v37  ;;  %v1668_v15 = vmul.f32 %v1666_v48, %v4213_v24 }
 0x218   :  { %v1653_v9 = vadd.f32 %v1651_v33, %v1615_v56  ;;  %v1654_v7 = vadd.f32 %v1652_v36, %v1616_v63  ;;  %v1721_v12 = vmul.f32 %v4289_v26, %v1708_v47  ;;  %v1698_v33 = vrot.slane %v4251_v2, %v3450_v57 }
 0x219   :  { %v1351_v46 = vpop.permute.xlu0 %1350 }
 0x21a   :  { %v1361_v59 = vmul.f32 %v1356_v21, %v1351_v46  ;;  %v1362_v4 = vmul.f32 %v1360_v53, %v1351_v46  ;;  %v1743_v39 = vpop.permute.xlu1 %1742  ;;  %v1707_v21 = vsel %vm208_vm2, %v1704_v37, %v1706_v61  ;;  %v1669_v13 = vadd.f32 %v1667_v58, %v1653_v9 }
 0x21b   :  { %v1722_v0 = vmul.f32 %v4292_v41, %v1707_v21  ;;  %v1670_v53 = vadd.f32 %v1668_v15, %v1654_v7  ;;  %v1683_v37 = vmul.f32 %v1678_v31, %v4237_v28  ;;  %v1684_v61 = vmul.f32 %v1682_v10, %v4237_v28  ;;  %v3029_v15 = vld [vmem:[%s4878_s5 + $0x4] ss:$8 sm:$0x3] }
 0x21c   :  { %v4298_v42 = vadd.f32 %v1361_v59, %v1347_v32  ;;  %v4300_v34 = vadd.f32 %v1362_v4, %v1348_v60  ;;  %v1732_v36 = vrot.slane %v1721_v12, %v3407_v54  ;;  %v3028_v60 = vld [vmem:[%s4878_s5 + $0x3] ss:$8 sm:$0x3]  ;;  %v1699_v28 = vmul.f32 %v1694_v25, %v4044_v35 }
 0x21d   :  { %v1736_v24 = vrot.slane %v1722_v0, %v3407_v54  ;;  %v1685_v46 = vadd.f32 %v1683_v37, %v1669_v13  ;;  %v1686_v32 = vadd.f32 %v1684_v61, %v1670_v53  ;;  %v1700_v4 = vmul.f32 %v1698_v33, %v4044_v35 }
 0x21e   :  { %v1737_v19 = vmul.f32 %v1732_v36, %v4060_v8  ;;  %v4330_v2 = vrot.slane %v3028_v60, %v3407_v54  ;;  %v4333_v63 = vrot.slane %v3028_v60, %v3410_v55  ;;  %v1748_v21 = vrot.slane %v1721_v12, %v3410_v55 }
 0x21f   :  { %v1759_v27 = vpop.permute.xlu1 %1758  ;;  %v1738_v56 = vmul.f32 %v1736_v24, %v4060_v8  ;;  %v1701_v62 = vadd.f32 %v1699_v28, %v1685_v46  ;;  %v1702_v48 = vadd.f32 %v1700_v4, %v1686_v32  ;;  %v1752_v47 = vrot.slane %v1722_v0, %v3410_v55 }
 0x220   :  { %v1764_v10 = vrot.slane %v1721_v12, %v3438_v23  ;;  %v1768_v58 = vrot.slane %v1722_v0, %v3438_v23  ;;  %v1753_v13 = vmul.f32 %v1748_v21, %v1743_v39  ;;  %v4349_v46 = vrot.slane %v3029_v15, %v3407_v54 }
 0x221   :  { %v1739_v8 = vadd.f32 %v1737_v19, %v1701_v62  ;;  %v1740_v31 = vadd.f32 %v1738_v56, %v1702_v48  ;;  %v1754_v53 = vmul.f32 %v1752_v47, %v1743_v39  ;;  %v4352_v32 = vrot.slane %v3029_v15, %v3410_v55 }
 0x222   :  { %v1770_v36 = vmul.f32 %v1768_v58, %v1759_v27  ;;  %v1780_v60 = vrot.slane %v1721_v12, %v3450_v57 }
 0x223   :  { %v1790_v3 = vpop.permute.xlu1 %1789  ;;  %v1755_v25 = vadd.f32 %v1753_v13, %v1739_v8  ;;  %v1756_v33 = vadd.f32 %v1754_v53, %v1740_v31  ;;  %v3212_v8 = vld [vmem:[%s4877_s0 + $0x8] sm:$0xff] }
 0x224   :  { %v1785_v62 = vmul.f32 %v1780_v60, %v4086_v50 }
 0x225   :  { %v1772_v19 = vadd.f32 %v1770_v36, %v1756_v33  ;;  %v5066_v33 = vld [vmem:[#allocation3_spill] sm:$0xff] }
 0x227   :  { %v1792_v59 = vpop.permute.xlu1 %1791 }
 0x228   :  { %v1793_v9 = vsel %vm296_vm3, %v1790_v3, %v1792_v59  ;;  %v1794_v35 = vsel %vm296_vm3, %v1792_v59, %v1790_v3  ;;  %v1769_v3 = vmul.f32 %v1764_v10, %v1759_v27  ;;  %v1784_v59 = vrot.slane %v1722_v0, %v3450_v57 }
 0x229   :  { %v1807_v37 = vmul.f32 %v4330_v2, %v1794_v35  ;;  %v1808_v61 = vmul.f32 %v4333_v63, %v1793_v9  ;;  %v1887_v27 = vcombine.low %v4349_v46, %v4352_v32 }
 0x22a   :  { %v1771_v4 = vadd.f32 %v1769_v3, %v1755_v25  ;;  %v1786_v48 = vmul.f32 %v1784_v59, %v4086_v50  ;;  %v5067_v3 = vsub.s32 4, %v5066_v33 }
 0x22b   :  { %v1829_v7 = vpop.permute.xlu1 %1828  ;;  %v1818_v39 = vrot.slane %v1807_v37, %v3407_v54  ;;  %v1822_v28 = vrot.slane %v1808_v61, %v3407_v54  ;;  %v1834_v9 = vrot.slane %v1807_v37, %v3410_v55  ;;  %v1838_v35 = vrot.slane %v1808_v61, %v3410_v55 }
 0x22c   :  { %v1787_v47 = vadd.f32 %v1785_v62, %v1771_v4  ;;  %v1788_v0 = vadd.f32 %v1786_v48, %v1772_v19  ;;  %v1889_v31 = vmul.f32 %v3212_v8, %v1887_v27  ;;  %v1850_v53 = vrot.slane %v1807_v37, %v3438_v23 }
 0x22d   :  { %v1823_v21 = vmul.f32 %v1818_v39, %v4102_v52  ;;  %v1824_v12 = vmul.f32 %v1822_v28, %v4102_v52  ;;  %v1839_v13 = vmul.f32 %v1834_v9, %v1829_v7  ;;  %v1840_v50 = vmul.f32 %v1838_v35, %v1829_v7 }
 0x22e   :  { %v1854_v52 = vrot.slane %v1808_v61, %v3438_v23  ;;  %v1900_v25 = vrot.slane %v1889_v31, %v3407_v54  ;;  %v1904_v36 = vrot.slane %v1889_v31, %v5067_v3  ;;  %v1866_v19 = vrot.slane %v1807_v37, %v3450_v57 }
 0x22f   :  { %v1825_v10 = vadd.f32 %v1823_v21, %v1787_v47  ;;  %v1826_v58 = vadd.f32 %v1824_v12, %v1788_v0  ;;  %v1870_v27 = vrot.slane %v1808_v61, %v3450_v57  ;;  %v1926_v7 = vrot.slane %v1889_v31, %v3410_v55 }
 0x230   :  { %v1845_v24 = vpop.permute.xlu1 %1844  ;;  %v5068_v62 = vsub.s32 5, %v5066_v33  ;;  %v1910_v47 = vrot.slane %v1900_v25, %v3407_v54  ;;  %v1914_v0 = vrot.slane %v1904_v36, %v3407_v54  ;;  %v1952_v9 = vrot.slane %v1889_v31, %v3438_v23 }
 0x231   :  { %v1841_v60 = vadd.f32 %v1839_v13, %v1825_v10  ;;  %v1842_v59 = vadd.f32 %v1840_v50, %v1826_v58  ;;  %v1855_v39 = vmul.f32 %v1850_v53, %v1845_v24  ;;  %v1856_v28 = vmul.f32 %v1854_v52, %v1845_v24  ;;  %v3030_v24 = vld [vmem:[%s4878_s5 + $0x5] ss:$8 sm:$0x3] }
 0x232   :  { %v1930_v48 = vrot.slane %v1889_v31, %v5068_v62  ;;  %v5069_v37 = vsub.s32 6, %v5066_v33  ;;  %v1871_v8 = vmul.f32 %v1866_v19, %v4126_v17  ;;  %v1872_v10 = vmul.f32 %v1870_v27, %v4126_v17 }
 0x233   :  { %v1857_v21 = vadd.f32 %v1855_v39, %v1841_v60  ;;  %v1858_v12 = vadd.f32 %v1856_v28, %v1842_v59  ;;  %v1936_v58 = vrot.slane %v1926_v7, %v3410_v55  ;;  %v4392_v50 = vrot.slane %v3030_v24, %v3407_v54 }
 0x234   :  { %v1956_v61 = vrot.slane %v1889_v31, %v5069_v37  ;;  %v1940_v13 = vrot.slane %v1930_v48, %v3410_v55  ;;  %v4395_v53 = vrot.slane %v3030_v24, %v3410_v55  ;;  %v1978_v60 = vrot.slane %v1889_v31, %v3450_v57 }
 0x235   :  { %v1894_v56 = vpop.permute.xlu1 %1893  ;;  %v1873_v52 = vadd.f32 %v1871_v8, %v1857_v21  ;;  %v1874_v25 = vadd.f32 %v1872_v10, %v1858_v12  ;;  %v5070_v59 = vsub.s32 7, %v5066_v33  ;;  %v1962_v27 = vrot.slane %v1952_v9, %v3438_v23 }
 0x236   :  { %v1915_v3 = vmul.f32 %v1910_v47, %v1894_v56  ;;  %v1916_v36 = vmul.f32 %v1914_v0, %v1894_v56  ;;  %v1966_v7 = vrot.slane %v1956_v61, %v3438_v23  ;;  %v1988_v12 = vrot.slane %v1978_v60, %v3450_v57 }
 0x237   :  { %v1982_v39 = vrot.slane %v1889_v31, %v5070_v59  ;;  %v1967_v0 = vmul.f32 %v1962_v27, %v4154_v16 }
 0x238   :  { %v1917_v48 = vadd.f32 %v1915_v3, %v1873_v52  ;;  %v1918_v21 = vadd.f32 %v1916_v36, %v1874_v25 }
 0x239   :  { %v1992_v47 = vrot.slane %v1982_v39, %v3450_v57 }
 0x23a   :  { %v1921_v15 = vpop.permute.xlu1 %1920 }
 0x23b   :  { %v1941_v62 = vmul.f32 %v1936_v58, %v1921_v15  ;;  %v1942_v56 = vmul.f32 %v1940_v13, %v1921_v15  ;;  %v3031_v13 = vld [vmem:[%s4878_s5 + $0x6] ss:$8 sm:$0x3] }
 0x23c   :  { %v4423_v36 = vrot.slane %v3031_v13, %v3410_v55 }
 0x23d   :  { %v1943_v24 = vadd.f32 %v1941_v62, %v1917_v48  ;;  %v1944_v9 = vadd.f32 %v1942_v56, %v1918_v21 }
 0x23f   :  { %v1973_v4 = vpop.permute.xlu1 %1972 }
 0x240   :  { %v1993_v10 = vmul.f32 %v1988_v12, %v1973_v4  ;;  %v1994_v58 = vmul.f32 %v1992_v47, %v1973_v4 }
 0x243   :  { %v1998_v35 = vpop.permute.xlu1 %1997 }
 0x244   :  { %v2001_v17 = vsel %vm507_vm4, %v1998_v35, %v4173_v5  ;;  %v2002_v28 = vsel %vm507_vm4, %v4173_v5, %v1998_v35  ;;  %v1968_v5 = vmul.f32 %v1966_v7, %v4154_v16  ;;  %v1969_v35 = vadd.f32 %v1967_v0, %v1943_v24 }
 0x245   :  { %v2015_v33 = vmul.f32 %v4392_v50, %v2001_v17  ;;  %v2016_v31 = vmul.f32 %v4395_v53, %v2002_v28  ;;  %v4420_v16 = vrot.slane %v3031_v13, %v3407_v54 }
 0x246   :  { %v1970_v8 = vadd.f32 %v1968_v5, %v1944_v9  ;;  %v1995_v60 = vadd.f32 %v1993_v10, %v1969_v35 }
 0x247   :  { %v2021_v19 = vpop.permute.xlu1 %2020  ;;  %v2026_v61 = vrot.slane %v2015_v33, %v3407_v54  ;;  %v2030_v15 = vrot.slane %v2016_v31, %v3407_v54  ;;  %v2042_v39 = vrot.slane %v2015_v33, %v3410_v55  ;;  %v2046_v17 = vrot.slane %v2016_v31, %v3410_v55 }
 0x248   :  { %v1996_v59 = vadd.f32 %v1994_v58, %v1970_v8  ;;  %v2058_v12 = vrot.slane %v2015_v33, %v3438_v23  ;;  %v2062_v47 = vrot.slane %v2016_v31, %v3438_v23  ;;  %v2074_v9 = vrot.slane %v2015_v33, %v3450_v57 }
 0x249   :  { %v2031_v25 = vmul.f32 %v2026_v61, %v2021_v19  ;;  %v2032_v3 = vmul.f32 %v2030_v15, %v2021_v19  ;;  %v2047_v48 = vmul.f32 %v2042_v39, %v4205_v6  ;;  %v2048_v21 = vmul.f32 %v2046_v17, %v4205_v6 }
 0x24a   :  { %v2078_v61 = vrot.slane %v2016_v31, %v3450_v57 }
 0x24b   :  { %v2033_v28 = vadd.f32 %v2031_v25, %v1995_v60  ;;  %v2034_v27 = vadd.f32 %v2032_v3, %v1996_v59 }
 0x24c   :  { %v2053_v37 = vpop.permute.xlu1 %2052 }
 0x24d   :  { %v2049_v5 = vadd.f32 %v2047_v48, %v2033_v28  ;;  %v2050_v24 = vadd.f32 %v2048_v21, %v2034_v27  ;;  %v2064_v15 = vmul.f32 %v2062_v47, %v2053_v37 }
 0x24f   :  { %v2066_v25 = vadd.f32 %v2064_v15, %v2050_v24 }
 0x251   :  { %v2069_v52 = vpop.permute.xlu1 %2068 }
 0x252   :  { %v2079_v10 = vmul.f32 %v2074_v9, %v2069_v52  ;;  %v2080_v58 = vmul.f32 %v2078_v61, %v2069_v52  ;;  %v2155_v52 = vpop.permute.xlu0 %2154 }
 0x254   :  { %v2082_v39 = vadd.f32 %v2080_v58, %v2066_v25 }
 0x255   :  { %v2086_v4 = vpop.permute.xlu1 %2085 }
 0x256   :  { %v2087_v7 = vsel %vm595_vm5, %v4245_v49, %v2086_v4  ;;  %v2088_v19 = vsel %vm595_vm5, %v2086_v4, %v4245_v49  ;;  %v2063_v49 = vmul.f32 %v2058_v12, %v2053_v37  ;;  %v3032_v37 = vld [vmem:[%s4878_s5 + $0x7] ss:$8 sm:$0x3] }
 0x257   :  { %v2101_v62 = vmul.f32 %v4420_v16, %v2087_v7  ;;  %v2102_v56 = vmul.f32 %v4423_v36, %v2088_v19  ;;  %v4451_v19 = vrot.slane %v3032_v37, %v3407_v54 }
 0x258   :  { %v2065_v13 = vadd.f32 %v2063_v49, %v2049_v5  ;;  %v2172_v5 = vpop.permute.xlu0 %2171 }
 0x259   :  { %v2123_v0 = vpop.permute.xlu1 %2122  ;;  %v2112_v35 = vrot.slane %v2101_v62, %v3407_v54  ;;  %v2116_v8 = vrot.slane %v2102_v56, %v3407_v54  ;;  %v2128_v33 = vrot.slane %v2101_v62, %v3410_v55  ;;  %v2132_v31 = vrot.slane %v2102_v56, %v3410_v55 }
 0x25a   :  { %v2081_v59 = vadd.f32 %v2079_v10, %v2065_v13  ;;  %v2144_v48 = vrot.slane %v2101_v62, %v3438_v23  ;;  %v2148_v21 = vrot.slane %v2102_v56, %v3438_v23  ;;  %v2164_v10 = vrot.slane %v2102_v56, %v3450_v57 }
 0x25b   :  { %v2117_v3 = vmul.f32 %v2112_v35, %v4263_v30  ;;  %v2118_v60 = vmul.f32 %v2116_v8, %v4263_v30  ;;  %v2133_v27 = vmul.f32 %v2128_v33, %v2123_v0  ;;  %v2134_v7 = vmul.f32 %v2132_v31, %v2123_v0 }
 0x25c   :  { %v4454_v30 = vrot.slane %v3032_v37, %v3410_v55  ;;  %v2160_v8 = vrot.slane %v2101_v62, %v3450_v57 }
 0x25d   :  { %v2119_v17 = vadd.f32 %v2117_v3, %v2081_v59  ;;  %v2120_v4 = vadd.f32 %v2118_v60, %v2082_v39  ;;  %v2166_v59 = vmul.f32 %v2164_v10, %v2155_v52 }
 0x25e   :  { %v2139_v6 = vpop.permute.xlu1 %2138  ;;  %v2165_v60 = vmul.f32 %v2160_v8, %v2155_v52  ;;  %v3033_v52 = vld [vmem:[%s4878_s5 + $0x10] ss:$8 sm:$0x3] }
 0x25f   :  { %v2135_v12 = vadd.f32 %v2133_v27, %v2119_v17  ;;  %v2136_v47 = vadd.f32 %v2134_v7, %v2120_v4  ;;  %v2149_v9 = vmul.f32 %v2144_v48, %v2139_v6  ;;  %v2150_v61 = vmul.f32 %v2148_v21, %v2139_v6  ;;  %v2225_v7 = vpop.permute.xlu0 %2224 }
 0x261   :  { %v2151_v6 = vadd.f32 %v2149_v9, %v2135_v12  ;;  %v2152_v3 = vadd.f32 %v2150_v61, %v2136_v47  ;;  %v4476_v9 = vrot.slane %v3033_v52, %v3407_v54  ;;  %v4479_v61 = vrot.slane %v3033_v52, %v3410_v55 }
 0x263   :  { %v2193_v28 = vpop.permute.xlu1 %2192  ;;  %v2167_v31 = vadd.f32 %v2165_v60, %v2151_v6  ;;  %v2168_v37 = vadd.f32 %v2166_v59, %v2152_v3  ;;  %v2256_v8 = vpop.permute.xlu0 %2255 }
 0x267   :  { %v2170_v24 = vpop.permute.xlu1 %2169 }
 0x268   :  { %v2173_v49 = vsel %vm683_vm6, %v2170_v24, %v2172_v5  ;;  %v2174_v0 = vsel %vm683_vm6, %v2172_v5, %v2170_v24 }
 0x269   :  { %v2187_v15 = vmul.f32 %v4451_v19, %v2173_v49  ;;  %v2188_v35 = vmul.f32 %v4454_v30, %v2174_v0 }
 0x26b   :  { %v2198_v58 = vrot.slane %v2187_v15, %v3407_v54  ;;  %v2202_v13 = vrot.slane %v2188_v35, %v3407_v54  ;;  %v2209_v25 = vpop.permute.xlu1 %2208  ;;  %v2214_v17 = vrot.slane %v2187_v15, %v3410_v55  ;;  %v2218_v4 = vrot.slane %v2188_v35, %v3410_v55 }
 0x26c   :  { %v2230_v48 = vrot.slane %v2187_v15, %v3438_v23  ;;  %v2234_v21 = vrot.slane %v2188_v35, %v3438_v23  ;;  %v2246_v10 = vrot.slane %v2187_v15, %v3450_v57 }
 0x26d   :  { %v2203_v39 = vmul.f32 %v2198_v58, %v2193_v28  ;;  %v2204_v33 = vmul.f32 %v2202_v13, %v2193_v28  ;;  %v2219_v12 = vmul.f32 %v2214_v17, %v2209_v25  ;;  %v2220_v47 = vmul.f32 %v2218_v4, %v2209_v25 }
 0x26e   :  { %v2235_v49 = vmul.f32 %v2230_v48, %v2225_v7  ;;  %v2236_v0 = vmul.f32 %v2234_v21, %v2225_v7  ;;  %v2250_v58 = vrot.slane %v2188_v35, %v3450_v57  ;;  %v2295_v7 = vpop.permute.xlu0 %2294 }
 0x26f   :  { %v2205_v27 = vadd.f32 %v2203_v39, %v2167_v31  ;;  %v2206_v56 = vadd.f32 %v2204_v33, %v2168_v37 }
 0x270   :  { %v2241_v62 = vpop.permute.xlu1 %2240 }
 0x271   :  { %v2221_v5 = vadd.f32 %v2219_v12, %v2205_v27  ;;  %v2222_v24 = vadd.f32 %v2220_v47, %v2206_v56  ;;  %v2251_v33 = vmul.f32 %v2246_v10, %v2241_v62  ;;  %v2252_v31 = vmul.f32 %v2250_v58, %v2241_v62 }
 0x273   :  { %v2237_v25 = vadd.f32 %v2235_v49, %v2221_v5  ;;  %v2238_v6 = vadd.f32 %v2236_v0, %v2222_v24 }
 0x275   :  { %v2279_v28 = vpop.permute.xlu1 %2278  ;;  %v2253_v27 = vadd.f32 %v2251_v33, %v2237_v25  ;;  %v2254_v56 = vadd.f32 %v2252_v31, %v2238_v6 }
 0x279   :  { %v2258_v13 = vpop.permute.xlu1 %2257 }
 0x27a   :  { %v2259_v3 = vsel %vm771_vm7, %v2256_v8, %v2258_v13  ;;  %v2260_v60 = vsel %vm771_vm7, %v2258_v13, %v2256_v8 }
 0x27b   :  { %v2273_v59 = vmul.f32 %v4476_v9, %v2259_v3  ;;  %v2274_v39 = vmul.f32 %v4479_v61, %v2260_v60 }
 0x27d   :  { %v2284_v37 = vrot.slane %v2273_v59, %v3407_v54  ;;  %v2288_v15 = vrot.slane %v2274_v39, %v3407_v54  ;;  %v2300_v35 = vrot.slane %v2273_v59, %v3410_v55  ;;  %v2304_v17 = vrot.slane %v2274_v39, %v3410_v55  ;;  %v2311_v4 = vpop.permute.xlu1 %2310 }
 0x27e   :  { %v2316_v12 = vrot.slane %v2273_v59, %v3438_v23  ;;  %v2320_v47 = vrot.slane %v2274_v39, %v3438_v23  ;;  %v2332_v49 = vrot.slane %v2273_v59, %v3450_v57  ;;  %v2336_v0 = vrot.slane %v2274_v39, %v3450_v57  ;;  %v4508_v59 = vld [vmem:[%s4880_s3] sm:$0xf] }
 0x27f   :  { %v2289_v48 = vmul.f32 %v2284_v37, %v2279_v28  ;;  %v2290_v21 = vmul.f32 %v2288_v15, %v2279_v28  ;;  %v2305_v5 = vmul.f32 %v2300_v35, %v2295_v7  ;;  %v2306_v24 = vmul.f32 %v2304_v17, %v2295_v7  ;;  %v2345_v37 = vpop.permute.xlu0 %2344 }
 0x280   :  { %v2321_v13 = vmul.f32 %v2316_v12, %v2311_v4  ;;  %v2322_v25 = vmul.f32 %v2320_v47, %v2311_v4  ;;  %v5071_v39 = vmov 8   ;;  %v5072_v4 = vmov 3  }
 0x281   :  { %v2291_v52 = vadd.f32 %v2289_v48, %v2253_v27  ;;  %v2292_v62 = vadd.f32 %v2290_v21, %v2254_v56  ;;  %v5073_v56 = vmov 11   ;;  %v5074_v7 = vmov 4  }
 0x282   :  { %v2327_v8 = vpop.permute.xlu1 %2326  ;;  %v5075_v48 = vmov 14   ;;  %v5076_v21 = vmov 6   ;;  %v5077_v12 = vmov 7   ;;  %v5078_v47 = vmov 9  }
 0x283   :  { %v2307_v10 = vadd.f32 %v2305_v5, %v2291_v52  ;;  %v2308_v58 = vadd.f32 %v2306_v24, %v2292_v62  ;;  %v2337_v28 = vmul.f32 %v2332_v49, %v2327_v8  ;;  %v2338_v60 = vmul.f32 %v2336_v0, %v2327_v8  ;;  %v3214_v24 = vld [vmem:[%s4880_s3] sm:$0xf] }
 0x284   :  { %v5079_v52 = vmov 21   ;;  %v5081_v62 = vmov 24   ;;  %v5083_v5 = vmov 13   ;;  %v5086_v49 = vmov 18   ;;  %v2995_v0 = vld [vmem:[%s4881_s4] sm:$0xf] }
 0x285   :  { %v2323_v6 = vadd.f32 %v2321_v13, %v2307_v10  ;;  %v2324_v3 = vadd.f32 %v2322_v25, %v2308_v58 }
 0x287   :  { %v2339_v33 = vadd.f32 %v2337_v28, %v2323_v6  ;;  %v2340_v31 = vadd.f32 %v2338_v60, %v2324_v3  ;;  %v5091_v3 = vld [vmem:[#allocation4_spill] sm:$0xff] }
 0x289   :  { %v2347_v15 = vadd.f32 %v2345_v37, %v2339_v33  ;;  %v2348_v27 = vadd.f32 %v2345_v37, %v2340_v31  ;;  %v5092_v33 = vmov 34  }
 0x28b   :  { %v4497_v35 = vmax.f32 %v2347_v15, 0.0  ;;  %v4499_v17 = vmax.f32 %v2348_v27, 0.0 }
 0x28d   :  { %2427 = vrot.lane.b32.xlu0 %v4499_v17, %s3222_s26  ;;  %2351 = vrot.lane.b32.xlu1 %v4497_v35, %s3219_s25 }
 0x291   :  { %2450 = vperm.xlu0 %3178, %v4508_v59   ;;  %2353 = vrot.lane.b32.xlu1 %v4499_v17, %s3219_s25 }
 0x295   :  { %2497 = vrot.lane.b32.xlu0 %v4497_v35, %s3225_s29  ;;  %2378 = vperm.xlu1 %3174, %v4508_v59  }
 0x296   :  { %3181 = vset.pattern.permute.xlu0 %v5071_v39 }
 0x299   :  { %2506 = vperm.xlu0 %3181, %v4508_v59   ;;  %3176 = vset.pattern.permute.xlu1 %v5072_v4 }
 0x29a   :  { %2410 = vperm.xlu1 %3176, %v4508_v59  }
 0x29d   :  { %3184 = vset.pattern.permute.xlu0 %v5073_v56 }
 0x29e   :  { %2554 = vperm.xlu0 %3184, %v4508_v59   ;;  %2425 = vrot.lane.b32.xlu1 %v4497_v35, %s3222_s26 }
 0x29f   :  { %3177 = vset.pattern.permute.xlu1 %v5074_v7 }
 0x2a2   :  { %2571 = vrot.lane.b32.xlu0 %v4499_v17, %s3235_s12  ;;  %2434 = vperm.xlu1 %3177, %v4508_v59  }
 0x2a3   :  { %3187 = vset.pattern.permute.xlu0 %v5075_v48 }
 0x2a6   :  { %2610 = vperm.xlu0 %3187, %v4508_v59   ;;  %3179 = vset.pattern.permute.xlu1 %v5076_v21 }
 0x2a7   :  { %2466 = vperm.xlu1 %3179, %v4508_v59  }
 0x2aa   :  { %3190 = vset.pattern.permute.xlu0 %v5033_v44  ;;  %v5080_v44 = vmov 10  }
 0x2ab   :  { %2660 = vperm.xlu0 %3190, %v4508_v59   ;;  %3180 = vset.pattern.permute.xlu1 %v5077_v12 }
 0x2ac   :  { %2482 = vperm.xlu1 %3180, %v4508_v59  }
 0x2af   :  { %3193 = vset.pattern.permute.xlu0 %v5035_v38  ;;  %v5082_v38 = vmov 12  }
 0x2b0   :  { %2716 = vperm.xlu0 %3193, %v4508_v59   ;;  %2499 = vrot.lane.b32.xlu1 %v4499_v17, %s3225_s29 }
 0x2b1   :  { %3182 = vset.pattern.permute.xlu1 %v5078_v47 }
 0x2b4   :  { %3194 = vset.pattern.permute.xlu0 %v5079_v52  ;;  %2522 = vperm.xlu1 %3182, %v4508_v59  }
 0x2b5   :  { %2732 = vperm.xlu0 %3194, %v4508_v59  }
 0x2b8   :  { %3183 = vset.pattern.permute.xlu1 %v5080_v44 }
 0x2b9   :  { %3197 = vset.pattern.permute.xlu0 %v5081_v62  ;;  %2538 = vperm.xlu1 %3183, %v4508_v59  }
 0x2ba   :  { %2788 = vperm.xlu0 %3197, %v4508_v59  }
 0x2bd   :  { %3185 = vset.pattern.permute.xlu1 %v5082_v38 }
 0x2be   :  { %3198 = vset.pattern.permute.xlu0 %v5041_v40  ;;  %2578 = vperm.xlu1 %3185, %v4508_v59   ;;  %v5084_v40 = vmov 15  }
 0x2bf   :  { %2804 = vperm.xlu0 %3198, %v4508_v59  }
 0x2c2   :  { %2569 = vrot.lane.b32.xlu1 %v4497_v35, %s3235_s12 }
 0x2c3   :  { %3199 = vset.pattern.permute.xlu0 %v5045_v29  ;;  %3186 = vset.pattern.permute.xlu1 %v5083_v5  ;;  %v5085_v29 = vmov 16  }
 0x2c4   :  { %1374 = vperm.xlu0 %3199, %v3214_v24  }
 0x2c6   :  { %2594 = vperm.xlu1 %3186, %v4508_v59  }
 0x2c8   :  { %2860 = vperm.xlu0 %3199, %v4508_v59  }
 0x2ca   :  { %3188 = vset.pattern.permute.xlu1 %v5084_v40 }
 0x2cb   :  { %2626 = vperm.xlu1 %3188, %v4508_v59  }
 0x2cc   :  { %3202 = vset.pattern.permute.xlu0 %v5004_v22  ;;  %v5087_v22 = vmov 33  }
 0x2cd   :  { %2876 = vperm.xlu0 %3202, %v4508_v59  }
 0x2cf   :  { %3189 = vset.pattern.permute.xlu1 %v5085_v29 }
 0x2d0   :  { %2644 = vperm.xlu1 %3189, %v4508_v59  }
 0x2d1   :  { %3203 = vset.pattern.permute.xlu0 %v5050_v20  ;;  %v5088_v20 = vmov 0  }
 0x2d2   :  { %1446 = vperm.xlu0 %3203, %v3214_v24  }
 0x2d4   :  { %3191 = vset.pattern.permute.xlu1 %v5086_v49 }
 0x2d5   :  { %2676 = vperm.xlu1 %3191, %v4508_v59  }
 0x2d6   :  { %2932 = vperm.xlu0 %3203, %v4508_v59  }
 0x2d9   :  { %3192 = vset.pattern.permute.xlu1 %v5034_v1  ;;  %v5089_v1 = vmov 27  }
 0x2da   :  { %2692 = vperm.xlu1 %3192, %v4508_v59   ;;  %3206 = vset.pattern.permute.xlu0 %v5087_v22  ;;  %v5093_v22 = vmov 35  }
 0x2db   :  { %2948 = vperm.xlu0 %3206, %v4508_v59  }
 0x2de   :  { %2707 = vrot.lane.b32.xlu1 %v4497_v35, %s3237_s13 }
 0x2df   :  { %3195 = vset.pattern.permute.xlu1 %v5036_v45  ;;  %3209 = vset.pattern.permute.xlu0 %v5088_v20  ;;  %v5090_v45 = vmov 30  }
 0x2e0   :  { %2998 = vperm.xlu0 %3209, %v2995_v0  }
 0x2e2   :  { %2709 = vrot.lane.b32.xlu1 %v4499_v17, %s3237_s13 }
 0x2e6   :  { %2748 = vperm.xlu1 %3195, %v4508_v59  }
 0x2ea   :  { %3196 = vset.pattern.permute.xlu1 %v5039_v14  ;;  %v2363_v14 = vpop.permute.xlu0 %2362 }
 0x2eb   :  { %2764 = vperm.xlu1 %3196, %v4508_v59  }
 0x2ef   :  { %2779 = vrot.lane.b32.xlu1 %v4497_v35, %s3239_s16 }
 0x2f0   :  { %3200 = vset.pattern.permute.xlu1 %v5002_v11  ;;  %v2395_v11 = vpop.permute.xlu0 %2394 }
 0x2f3   :  { %2781 = vrot.lane.b32.xlu1 %v4499_v17, %s3239_s16 }
 0x2f7   :  { %2820 = vperm.xlu1 %3200, %v4508_v59  }
 0x2fb   :  { %3201 = vset.pattern.permute.xlu1 %v5089_v1 }
 0x2fc   :  { %2836 = vperm.xlu1 %3201, %v4508_v59  }
 0x2ff   :  { %v2352_v8 = vpop.permute.xlu1 %2351  ;;  %v2428_v58 = vpop.permute.xlu0 %2427 }
 0x300   :  { %2851 = vrot.lane.b32.xlu1 %v4497_v35, %s3255_s23 }
 0x301   :  { %3204 = vset.pattern.permute.xlu1 %v5090_v45 }
 0x303   :  { %v2354_v10 = vpop.permute.xlu1 %2353 }
 0x304   :  { %2853 = vrot.lane.b32.xlu1 %v4499_v17, %s3255_s23  ;;  %v2355_v13 = vsel %vm33_vm0, %v2352_v8, %v2354_v10  ;;  %v2356_v25 = vsel %vm33_vm0, %v2354_v10, %v2352_v8  ;;  %v5094_v8 = vld [vmem:[#allocation5_spill] sm:$0xff] }
 0x305   :  { %v2357_v6 = vmul.f32 %v2356_v25, %v4188_v43  ;;  %v2358_v28 = vmul.f32 %v2355_v13, %v5091_v3  ;;  %v5095_v10 = vld [vmem:[#allocation13_spill] sm:$0xff] }
 0x307   :  { %v2368_v31 = vrot.slane %v2357_v6, %v3407_v54  ;;  %v2372_v37 = vrot.slane %v2358_v28, %v3407_v54  ;;  %v2384_v15 = vrot.slane %v2357_v6, %v3410_v55  ;;  %v2400_v48 = vrot.slane %v2357_v6, %v3438_v23 }
 0x308   :  { %2892 = vperm.xlu1 %3204, %v4508_v59   ;;  %v2404_v21 = vrot.slane %v2358_v28, %v3438_v23  ;;  %v2416_v5 = vrot.slane %v2357_v6, %v3450_v57  ;;  %v2420_v24 = vrot.slane %v2358_v28, %v3450_v57 }
 0x309   :  { %v2373_v56 = vmul.f32 %v2368_v31, %v2363_v14  ;;  %v2374_v7 = vmul.f32 %v2372_v37, %v2363_v14  ;;  %v2405_v62 = vmul.f32 %v2400_v48, %v2395_v11 }
 0x30a   :  { %v2406_v38 = vmul.f32 %v2404_v21, %v2395_v11 }
 0x30c   :  { %3205 = vset.pattern.permute.xlu1 %v5049_v18  ;;  %v2388_v18 = vrot.slane %v2358_v28, %v3410_v55 }
 0x30d   :  { %2908 = vperm.xlu1 %3205, %v4508_v59  }
 0x310   :  { %v2451_v60 = vpop.permute.xlu0 %2450 }
 0x311   :  { %2923 = vrot.lane.b32.xlu1 %v4497_v35, %s3258_s24 }
 0x312   :  { %3207 = vset.pattern.permute.xlu1 %v5092_v33 }
 0x314   :  { %v4616_v27 = vpop.permute.xlu0 %2497  ;;  %v2379_v39 = vpop.permute.xlu1 %2378 }
 0x315   :  { %v2389_v43 = vmul.f32 %v2384_v15, %v2379_v39  ;;  %v2390_v4 = vmul.f32 %v2388_v18, %v2379_v39  ;;  %2925 = vrot.lane.b32.xlu1 %v4499_v17, %s3258_s24 }
 0x317   :  { %v2391_v47 = vadd.f32 %v2389_v43, %v2373_v56  ;;  %v2392_v52 = vadd.f32 %v2390_v4, %v2374_v7 }
 0x318   :  { %v4622_v12 = vpop.permute.xlu0 %2506 }
 0x319   :  { %2964 = vperm.xlu1 %3207, %v4508_v59   ;;  %v2411_v44 = vpop.permute.xlu1 %2410  ;;  %v2407_v40 = vadd.f32 %v2405_v62, %v2391_v47  ;;  %v2408_v29 = vadd.f32 %v2406_v38, %v2392_v52 }
 0x31a   :  { %v2421_v20 = vmul.f32 %v2416_v5, %v2411_v44  ;;  %v2422_v1 = vmul.f32 %v2420_v24, %v2411_v44 }
 0x31c   :  { %v2423_v37 = vadd.f32 %v2421_v20, %v2407_v40  ;;  %v2424_v15 = vadd.f32 %v2422_v1, %v2408_v29 }
 0x31d   :  { %v4627_v49 = vpop.permute.xlu0 %2554  ;;  %3208 = vset.pattern.permute.xlu1 %v5093_v22  ;;  %v2426_v0 = vpop.permute.xlu1 %2425 }
 0x31e   :  { %v2429_v45 = vsel %vm120_vm1, %v2426_v0, %v2428_v58  ;;  %v2430_v14 = vsel %vm120_vm1, %v2428_v58, %v2426_v0  ;;  %2980 = vperm.xlu1 %3208, %v4508_v59  }
 0x31f   :  { %v2431_v11 = vmul.f32 %v2430_v14, %v5094_v8  ;;  %v2432_v13 = vmul.f32 %v2429_v45, %v5095_v10 }
 0x321   :  { %v4637_v25 = vpop.permute.xlu0 %2571  ;;  %v2440_v6 = vrot.slane %v2431_v11, %v3407_v54  ;;  %v2444_v3 = vrot.slane %v2432_v13, %v3407_v54  ;;  %v2435_v28 = vpop.permute.xlu1 %2434  ;;  %v2456_v33 = vrot.slane %v2431_v11, %v3410_v55  ;;  %v2460_v31 = vrot.slane %v2432_v13, %v3410_v55 }
 0x322   :  { %v2472_v7 = vrot.slane %v2431_v11, %v3438_v23  ;;  %v2476_v48 = vrot.slane %v2432_v13, %v3438_v23  ;;  %v2488_v24 = vrot.slane %v2431_v11, %v3450_v57  ;;  %v2492_v40 = vrot.slane %v2432_v13, %v3450_v57 }
 0x323   :  { %v2445_v58 = vmul.f32 %v2440_v6, %v2435_v28  ;;  %v2446_v18 = vmul.f32 %v2444_v3, %v2435_v28  ;;  %v2461_v59 = vmul.f32 %v2456_v33, %v2451_v60  ;;  %v2462_v39 = vmul.f32 %v2460_v31, %v2451_v60 }
 0x325   :  { %v2447_v43 = vadd.f32 %v2445_v58, %v2423_v37  ;;  %v2448_v4 = vadd.f32 %v2446_v18, %v2424_v15  ;;  %v4643_v56 = vpop.permute.xlu0 %2610  ;;  %v5097_v18 = vld [vmem:[#allocation20_spill] sm:$0xff] }
 0x326   :  { %v2467_v21 = vpop.permute.xlu1 %2466 }
 0x327   :  { %v2463_v47 = vadd.f32 %v2461_v59, %v2447_v43  ;;  %v2464_v52 = vadd.f32 %v2462_v39, %v2448_v4  ;;  %v2477_v44 = vmul.f32 %v2472_v7, %v2467_v21  ;;  %v2478_v62 = vmul.f32 %v2476_v48, %v2467_v21 }
 0x329   :  { %v2479_v38 = vadd.f32 %v2477_v44, %v2463_v47  ;;  %v2480_v5 = vadd.f32 %v2478_v62, %v2464_v52  ;;  %v5098_v62 = vld [vmem:[#allocation8_spill] sm:$0xff] }
 0x32a   :  { %v4649_v60 = vpop.permute.xlu0 %2660 }
 0x32b   :  { %v2483_v29 = vpop.permute.xlu1 %2482 }
 0x32c   :  { %v2493_v22 = vmul.f32 %v2488_v24, %v2483_v29  ;;  %v2494_v0 = vmul.f32 %v2492_v40, %v2483_v29 }
 0x32e   :  { %v2495_v20 = vadd.f32 %v2493_v22, %v2479_v38  ;;  %v2496_v1 = vadd.f32 %v2494_v0, %v2480_v5  ;;  %v5099_v5 = vld [vmem:[#allocation9_spill] sm:$0xff] }
 0x32f   :  { %v2500_v45 = vpop.permute.xlu1 %2499  ;;  %v4651_v14 = vpop.permute.xlu0 %2716 }
 0x330   :  { %v2501_v8 = vsel %vm208_vm2, %v4616_v27, %v2500_v45  ;;  %v2502_v11 = vsel %vm208_vm2, %v2500_v45, %v4616_v27  ;;  %v5096_v27 = vld [vmem:[#allocation21_spill] sm:$0xff] }
 0x331   :  { %v2503_v10 = vmul.f32 %v2502_v11, %v4289_v26  ;;  %v2504_v13 = vmul.f32 %v2501_v8, %v4292_v41  ;;  %v1369_v26 = vsel %vm683_vm6, %v5097_v18, %v5096_v27  ;;  %v1370_v41 = vsel %vm683_vm6, %v5096_v27, %v5097_v18 }
 0x332   :  { %v1371_v38 = vmul.f32 %v1369_v26, %v5098_v62  ;;  %v1372_v24 = vmul.f32 %v1370_v41, %v5099_v5 }
 0x333   :  { %v2512_v6 = vrot.slane %v2503_v10, %v3407_v54  ;;  %v2516_v3 = vrot.slane %v2504_v13, %v3407_v54  ;;  %v2528_v28 = vrot.slane %v2503_v10, %v3410_v55  ;;  %v2532_v33 = vrot.slane %v2504_v13, %v3410_v55  ;;  %v2523_v31 = vpop.permute.xlu1 %2522 }
 0x334   :  { %v4665_v37 = vpop.permute.xlu0 %2732  ;;  %v2560_v15 = vrot.slane %v2503_v10, %v3450_v57  ;;  %v2564_v58 = vrot.slane %v2504_v13, %v3450_v57  ;;  %v2544_v43 = vrot.slane %v2503_v10, %v3438_v23  ;;  %v2548_v4 = vrot.slane %v2504_v13, %v3438_v23 }
 0x335   :  { %v2517_v59 = vmul.f32 %v2512_v6, %v4622_v12  ;;  %v2518_v39 = vmul.f32 %v2516_v3, %v4622_v12  ;;  %v2533_v52 = vmul.f32 %v2528_v28, %v2523_v31  ;;  %v2534_v44 = vmul.f32 %v2532_v33, %v2523_v31  ;;  %v5100_v33 = vld [vmem:[#allocation22_spill] sm:$0xff] }
 0x336   :  { %v2565_v7 = vmul.f32 %v2560_v15, %v4627_v49  ;;  %v2566_v48 = vmul.f32 %v2564_v58, %v4627_v49  ;;  %v1396_v10 = vrot.slane %v1371_v38, %v3410_v55  ;;  %v1400_v49 = vrot.slane %v1372_v24, %v3410_v55 }
 0x337   :  { %v2519_v21 = vadd.f32 %v2517_v59, %v2495_v20  ;;  %v2520_v47 = vadd.f32 %v2518_v39, %v2496_v1  ;;  %v1428_v3 = vrot.slane %v1371_v38, %v3450_v57  ;;  %v1432_v28 = vrot.slane %v1372_v24, %v3450_v57 }
 0x338   :  { %v2539_v40 = vpop.permute.xlu1 %2538  ;;  %v1401_v31 = vmul.f32 %v1396_v10, %v5100_v33  ;;  %v1402_v15 = vmul.f32 %v1400_v49, %v5100_v33  ;;  %v1412_v58 = vrot.slane %v1371_v38, %v3438_v23  ;;  %v1416_v27 = vrot.slane %v1372_v24, %v3438_v23  ;;  %v5105_v49 = vld [vmem:[#allocation11_spill] sm:$0xff] }
 0x339   :  { %v2535_v29 = vadd.f32 %v2533_v52, %v2519_v21  ;;  %v2536_v22 = vadd.f32 %v2534_v44, %v2520_v47  ;;  %v2549_v12 = vmul.f32 %v2544_v43, %v2539_v40  ;;  %v2550_v0 = vmul.f32 %v2548_v4, %v2539_v40  ;;  %v4685_v45 = vpop.permute.xlu0 %2788  ;;  %v5102_v52 = vld [vmem:[#allocation25_spill] sm:$0xff]  ;;  %v5103_v44 = vld [vmem:[#allocation24_spill] sm:$0xff] }
 0x33a   :  { %v1380_v59 = vrot.slane %v1371_v38, %v3407_v54  ;;  %v1384_v39 = vrot.slane %v1372_v24, %v3407_v54  ;;  %v1441_v62 = vsel %vm771_vm7, %v5103_v44, %v5102_v52 }
 0x33b   :  { %v2551_v8 = vadd.f32 %v2549_v12, %v2535_v29  ;;  %v2552_v11 = vadd.f32 %v2550_v0, %v2536_v22 }
 0x33d   :  { %v2567_v20 = vadd.f32 %v2565_v7, %v2551_v8  ;;  %v2568_v1 = vadd.f32 %v2566_v48, %v2552_v11  ;;  %v2579_v13 = vpop.permute.xlu1 %2578  ;;  %v5101_v48 = vld [vmem:[#allocation15_spill] sm:$0xff]  ;;  %v5104_v11 = vld [vmem:[#allocation10_spill] sm:$0xff] }
 0x33e   :  { %v4689_v6 = vpop.permute.xlu0 %2804  ;;  %v4708_v21 = vmul.f32 %v1428_v3, %v5101_v48  ;;  %v1434_v47 = vmul.f32 %v1432_v28, %v5101_v48  ;;  %v4728_v10 = vmul.f32 %v1441_v62, %v5104_v11 }
 0x341   :  { %v2570_v18 = vpop.permute.xlu1 %2569 }
 0x342   :  { %v2573_v26 = vsel %vm296_vm3, %v2570_v18, %v4637_v25  ;;  %v2574_v41 = vsel %vm296_vm3, %v4637_v25, %v2570_v18  ;;  %v1442_v25 = vsel %vm771_vm7, %v5102_v52, %v5103_v44  ;;  %v5106_v52 = vld [vmem:[#allocation23_spill] sm:$0xff] }
 0x343   :  { %v2575_v43 = vmul.f32 %v2574_v41, %v4330_v2  ;;  %v2576_v4 = vmul.f32 %v2573_v26, %v4333_v63  ;;  %v1375_v7 = vpop.permute.xlu0 %1374  ;;  %v4731_v3 = vmul.f32 %v1442_v25, %v5105_v49  ;;  %v1417_v44 = vmul.f32 %v1412_v58, %v5106_v52 }
 0x344   :  { %v1385_v38 = vmul.f32 %v1380_v59, %v1375_v7  ;;  %v1386_v2 = vmul.f32 %v1384_v39, %v1375_v7  ;;  %v1418_v62 = vmul.f32 %v1416_v27, %v5106_v52  ;;  %v4741_v25 = vmul.f32 %v4499_v17, %v4352_v32  ;;  %v5107_v52 = vld [vmem:[#allocation26_spill] sm:$0xff] }
 0x345   :  { %v2584_v63 = vrot.slane %v2575_v43, %v3407_v54  ;;  %v2588_v5 = vrot.slane %v2576_v4, %v3407_v54  ;;  %v2600_v24 = vrot.slane %v2575_v43, %v3410_v55  ;;  %v2604_v40 = vrot.slane %v2576_v4, %v3410_v55  ;;  %v2595_v29 = vpop.permute.xlu1 %2594 }
 0x346   :  { %v1387_v22 = vadd.f32 %v1385_v38, %v4298_v42  ;;  %v1388_v12 = vadd.f32 %v1386_v2, %v4300_v34  ;;  %v2616_v0 = vrot.slane %v2575_v43, %v3438_v23  ;;  %v2620_v8 = vrot.slane %v2576_v4, %v3438_v23 }
 0x347   :  { %v2589_v28 = vmul.f32 %v2584_v63, %v2579_v13  ;;  %v2590_v33 = vmul.f32 %v2588_v5, %v2579_v13  ;;  %v4733_v18 = vpop.permute.xlu0 %2860  ;;  %v2605_v7 = vmul.f32 %v2600_v24, %v2595_v29  ;;  %v2606_v48 = vmul.f32 %v2604_v40, %v2595_v29 }
 0x348   :  { %v1403_v26 = vadd.f32 %v1401_v31, %v1387_v22  ;;  %v1404_v41 = vadd.f32 %v1402_v15, %v1388_v12  ;;  %v2621_v42 = vmul.f32 %v2616_v0, %v4643_v56  ;;  %v2622_v34 = vmul.f32 %v2620_v8, %v4643_v56 }
 0x349   :  { %v2591_v59 = vadd.f32 %v2589_v28, %v2567_v20  ;;  %v2592_v39 = vadd.f32 %v2590_v33, %v2568_v1  ;;  %v4745_v13 = vmul.f32 %v4497_v35, %v4349_v46  ;;  %v2632_v56 = vrot.slane %v2575_v43, %v3450_v57 }
 0x34a   :  { %v2627_v31 = vpop.permute.xlu1 %2626  ;;  %v2636_v20 = vrot.slane %v2576_v4, %v3450_v57  ;;  %v1500_v1 = vrot.slane %v4728_v10, %v3450_v57  ;;  %v1504_v58 = vrot.slane %v4731_v3, %v3450_v57  ;;  %v1420_v32 = vadd.f32 %v1418_v62, %v1404_v41 }
 0x34b   :  { %v2607_v15 = vadd.f32 %v2605_v7, %v2591_v59  ;;  %v2608_v38 = vadd.f32 %v2606_v48, %v2592_v39  ;;  %v1419_v17 = vadd.f32 %v1417_v44, %v1403_v26  ;;  %v2637_v35 = vmul.f32 %v2632_v56, %v2627_v31 }
 0x34c   :  { %v4753_v27 = vpop.permute.xlu0 %2876  ;;  %v2638_v63 = vmul.f32 %v2636_v20, %v2627_v31  ;;  %v1468_v5 = vrot.slane %v4728_v10, %v3410_v55  ;;  %v1472_v43 = vrot.slane %v4731_v3, %v3410_v55  ;;  %v2654_v4 = vrot.slane %v4741_v25, %v3407_v54 }
 0x34d   :  { %v2623_v2 = vadd.f32 %v2621_v42, %v2607_v15  ;;  %v2624_v46 = vadd.f32 %v2622_v34, %v2608_v38  ;;  %v2650_v24 = vrot.slane %v4745_v13, %v3407_v54  ;;  %v2670_v40 = vrot.slane %v4741_v25, %v3410_v55 }
 0x34e   :  { %v2666_v29 = vrot.slane %v4745_v13, %v3410_v55  ;;  %v1452_v49 = vrot.slane %v4728_v10, %v3407_v54  ;;  %v1456_v28 = vrot.slane %v4731_v3, %v3407_v54  ;;  %v1436_v41 = vadd.f32 %v1434_v47, %v1420_v32 }
 0x34f   :  { %v2639_v22 = vadd.f32 %v2637_v35, %v2623_v2  ;;  %v2640_v12 = vadd.f32 %v2638_v63, %v2624_v46  ;;  %v2645_v0 = vpop.permute.xlu1 %2644  ;;  %v2672_v26 = vmul.f32 %v2670_v40, %v4649_v60  ;;  %v1435_v34 = vadd.f32 %v4708_v21, %v1419_v17  ;;  %v5108_v21 = vld [vmem:[#allocation27_spill] sm:$0xff]  ;;  %v5109_v35 = vld [vmem:[#allocation16_spill] sm:$0xff] }
 0x350   :  { %v2655_v8 = vmul.f32 %v2650_v24, %v2645_v0  ;;  %v2656_v11 = vmul.f32 %v2654_v4, %v2645_v0  ;;  %v2671_v33 = vmul.f32 %v2666_v29, %v4649_v60  ;;  %v1473_v44 = vmul.f32 %v1468_v5, %v5107_v52  ;;  %v5110_v40 = vld [vmem:[#allocation28_spill] sm:$0xff] }
 0x351   :  { %v1447_v42 = vpop.permute.xlu0 %1446  ;;  %v1474_v62 = vmul.f32 %v1472_v43, %v5107_v52  ;;  %v1484_v31 = vrot.slane %v4728_v10, %v3438_v23  ;;  %v1488_v15 = vrot.slane %v4731_v3, %v3438_v23  ;;  %v1505_v63 = vmul.f32 %v1500_v1, %v5109_v35 }
 0x352   :  { %v2657_v59 = vadd.f32 %v2655_v8, %v2639_v22  ;;  %v2658_v39 = vadd.f32 %v2656_v11, %v2640_v12  ;;  %v1457_v7 = vmul.f32 %v1452_v49, %v1447_v42  ;;  %v1458_v48 = vmul.f32 %v1456_v28, %v1447_v42  ;;  %v5111_v11 = vld [vmem:[#allocation2_spill] sm:$0xff] }
 0x353   :  { %v1489_v32 = vmul.f32 %v1484_v31, %v5108_v21  ;;  %v1490_v17 = vmul.f32 %v1488_v15, %v5108_v21  ;;  %v1506_v5 = vmul.f32 %v1504_v58, %v5109_v35  ;;  %v2686_v0 = vrot.slane %v4741_v25, %v3438_v23  ;;  %v3215_v58 = vld [vmem:[%s4877_s0] sm:$0xff] }
 0x354   :  { %v1459_v38 = vadd.f32 %v1457_v7, %v1435_v34  ;;  %v1460_v60 = vadd.f32 %v1458_v48, %v1436_v41  ;;  %v2674_v47 = vadd.f32 %v2672_v26, %v2658_v39  ;;  %v2677_v56 = vpop.permute.xlu1 %2676  ;;  %v2673_v20 = vadd.f32 %v2671_v33, %v2657_v59 }
 0x355   :  { %v2682_v8 = vrot.slane %v4745_v13, %v3438_v23  ;;  %v2688_v33 = vmul.f32 %v2686_v0, %v2677_v56  ;;  %v2702_v42 = vrot.slane %v4741_v25, %v3450_v57  ;;  %v2698_v34 = vrot.slane %v4745_v13, %v3450_v57 }
 0x356   :  { %v1475_v2 = vadd.f32 %v1473_v44, %v1459_v38  ;;  %v1476_v46 = vadd.f32 %v1474_v62, %v1460_v60 }
 0x357   :  { %v2687_v28 = vmul.f32 %v2682_v8, %v2677_v56  ;;  %v2690_v38 = vadd.f32 %v2688_v33, %v2674_v47 }
 0x358   :  { %v1491_v43 = vadd.f32 %v1489_v32, %v1475_v2  ;;  %v1492_v10 = vadd.f32 %v1490_v17, %v1476_v46 }
 0x359   :  { %v2693_v4 = vpop.permute.xlu1 %2692  ;;  %v2689_v15 = vadd.f32 %v2687_v28, %v2673_v20 }
 0x35a   :  { %v1507_v24 = vadd.f32 %v1505_v63, %v1491_v43  ;;  %v1508_v3 = vadd.f32 %v1506_v5, %v1492_v10  ;;  %v2703_v52 = vmul.f32 %v2698_v34, %v2693_v4  ;;  %v2704_v44 = vmul.f32 %v2702_v42, %v2693_v4 }
 0x35c   :  { %v1515_v29 = vadd.f32 %v5110_v40, %v1507_v24  ;;  %v1516_v22 = vadd.f32 %v5110_v40, %v1508_v3  ;;  %v2705_v32 = vadd.f32 %v2703_v52, %v2689_v15  ;;  %v2706_v17 = vadd.f32 %v2704_v44, %v2690_v38 }
 0x35d   :  { %v2708_v12 = vpop.permute.xlu1 %2707 }
 0x35e   :  { %v1518_v1 = vadd.f32 %v1516_v22, %v5111_v11  ;;  %v1517_v49 = vadd.f32 %v3215_v58, %v1515_v29 }
 0x360   :  { %v1520_v26 = vmax.f32 %v1518_v1, 0.0  ;;  %v1519_v41 = vmax.f32 %v1517_v49, 0.0 }
 0x361   :  { %v2710_v59 = vpop.permute.xlu1 %2709 }
 0x362   :  { %v2711_v39 = vsel %vm507_vm4, %v2708_v12, %v2710_v59  ;;  %v2712_v7 = vsel %vm507_vm4, %v2710_v59, %v2708_v12  ;;  %v1523_v48 = vcombine.low %v1519_v41, %v1520_v26 }
 0x363   :  { %v2713_v62 = vmul.f32 %v2711_v39, %v4392_v50  ;;  %v2714_v31 = vmul.f32 %v2712_v7, %v4395_v53 }
 0x364   :  { %1525 = vst [vmem:[%s4882_s6] sm:$0xff] %v1523_v48 }
 0x365   :  { %v2722_v25 = vrot.slane %v2713_v62, %v3407_v54  ;;  %v2726_v13 = vrot.slane %v2714_v31, %v3407_v54  ;;  %v2738_v60 = vrot.slane %v2713_v62, %v3410_v55  ;;  %v2742_v56 = vrot.slane %v2714_v31, %v3410_v55  ;;  %v2749_v21 = vpop.permute.xlu1 %2748 }
 0x366   :  { %v2754_v43 = vrot.slane %v2713_v62, %v3438_v23  ;;  %v2758_v10 = vrot.slane %v2714_v31, %v3438_v23  ;;  %v2770_v29 = vrot.slane %v2713_v62, %v3450_v57 }
 0x367   :  { %v2727_v50 = vmul.f32 %v2722_v25, %v4651_v14  ;;  %v2728_v53 = vmul.f32 %v2726_v13, %v4651_v14  ;;  %v2743_v20 = vmul.f32 %v2738_v60, %v4665_v37  ;;  %v2744_v2 = vmul.f32 %v2742_v56, %v4665_v37 }
 0x368   :  { %v2759_v24 = vmul.f32 %v2754_v43, %v2749_v21  ;;  %v2760_v3 = vmul.f32 %v2758_v10, %v2749_v21  ;;  %v2774_v14 = vrot.slane %v2714_v31, %v3450_v57 }
 0x369   :  { %v2730_v47 = vadd.f32 %v2728_v53, %v2706_v17  ;;  %v2729_v46 = vadd.f32 %v2727_v50, %v2705_v32 }
 0x36a   :  { %v2765_v35 = vpop.permute.xlu1 %2764 }
 0x36b   :  { %v2746_v63 = vadd.f32 %v2744_v2, %v2730_v47  ;;  %v2745_v5 = vadd.f32 %v2743_v20, %v2729_v46  ;;  %v2775_v1 = vmul.f32 %v2770_v29, %v2765_v35  ;;  %v2776_v58 = vmul.f32 %v2774_v14, %v2765_v35 }
 0x36d   :  { %v2761_v12 = vadd.f32 %v2759_v24, %v2745_v5  ;;  %v2762_v0 = vadd.f32 %v2760_v3, %v2746_v63 }
 0x36e   :  { %v2780_v4 = vpop.permute.xlu1 %2779 }
 0x36f   :  { %v2777_v42 = vadd.f32 %v2775_v1, %v2761_v12  ;;  %v2778_v34 = vadd.f32 %v2776_v58, %v2762_v0 }
 0x372   :  { %v2782_v40 = vpop.permute.xlu1 %2781 }
 0x373   :  { %v2783_v22 = vsel %vm595_vm5, %v2780_v4, %v2782_v40  ;;  %v2784_v37 = vsel %vm595_vm5, %v2782_v40, %v2780_v4 }
 0x374   :  { %v2785_v8 = vmul.f32 %v2783_v22, %v4420_v16  ;;  %v2786_v11 = vmul.f32 %v2784_v37, %v4423_v36 }
 0x376   :  { %v2794_v49 = vrot.slane %v2785_v8, %v3407_v54  ;;  %v2798_v28 = vrot.slane %v2786_v11, %v3407_v54  ;;  %v2810_v33 = vrot.slane %v2785_v8, %v3410_v55  ;;  %v2814_v26 = vrot.slane %v2786_v11, %v3410_v55  ;;  %v2821_v41 = vpop.permute.xlu1 %2820 }
 0x377   :  { %v2826_v31 = vrot.slane %v2785_v8, %v3438_v23  ;;  %v2830_v15 = vrot.slane %v2786_v11, %v3438_v23  ;;  %v2842_v56 = vrot.slane %v2785_v8, %v3450_v57 }
 0x378   :  { %v2799_v59 = vmul.f32 %v2794_v49, %v4685_v45  ;;  %v2800_v39 = vmul.f32 %v2798_v28, %v4685_v45  ;;  %v2815_v36 = vmul.f32 %v2810_v33, %v4689_v6  ;;  %v2816_v7 = vmul.f32 %v2814_v26, %v4689_v6  ;;  %v2933_v33 = vpop.permute.xlu0 %2932 }
 0x379   :  { %v2831_v25 = vmul.f32 %v2826_v31, %v2821_v41  ;;  %v2832_v13 = vmul.f32 %v2830_v15, %v2821_v41  ;;  %v2846_v45 = vrot.slane %v2786_v11, %v3450_v57 }
 0x37a   :  { %v2802_v16 = vadd.f32 %v2800_v39, %v2778_v34  ;;  %v2801_v48 = vadd.f32 %v2799_v59, %v2777_v42 }
 0x37b   :  { %v2837_v52 = vpop.permute.xlu1 %2836 }
 0x37c   :  { %v2818_v44 = vadd.f32 %v2816_v7, %v2802_v16  ;;  %v2817_v62 = vadd.f32 %v2815_v36, %v2801_v48  ;;  %v2847_v47 = vmul.f32 %v2842_v56, %v2837_v52  ;;  %v2848_v20 = vmul.f32 %v2846_v45, %v2837_v52 }
 0x37e   :  { %v2833_v32 = vadd.f32 %v2831_v25, %v2817_v62  ;;  %v2834_v17 = vadd.f32 %v2832_v13, %v2818_v44  ;;  %v2949_v62 = vpop.permute.xlu0 %2948 }
 0x37f   :  { %v2852_v38 = vpop.permute.xlu1 %2851 }
 0x380   :  { %v2849_v43 = vadd.f32 %v2847_v47, %v2833_v32  ;;  %v2850_v10 = vadd.f32 %v2848_v20, %v2834_v17 }
 0x382   :  { %v2999_v47 = vpop.permute.xlu0 %2998 }
 0x383   :  { %v2854_v60 = vpop.permute.xlu1 %2853 }
 0x384   :  { %v2855_v21 = vsel %vm683_vm6, %v2852_v38, %v2854_v60  ;;  %v2856_v6 = vsel %vm683_vm6, %v2854_v60, %v2852_v38 }
 0x385   :  { %v2857_v50 = vmul.f32 %v2855_v21, %v4451_v19  ;;  %v2858_v53 = vmul.f32 %v2856_v6, %v4454_v30 }
 0x387   :  { %v2866_v2 = vrot.slane %v2857_v50, %v3407_v54  ;;  %v2870_v46 = vrot.slane %v2858_v53, %v3407_v54  ;;  %v2882_v35 = vrot.slane %v2857_v50, %v3410_v55  ;;  %v2886_v63 = vrot.slane %v2858_v53, %v3410_v55  ;;  %v2893_v5 = vpop.permute.xlu1 %2892 }
 0x388   :  { %v2898_v37 = vrot.slane %v2857_v50, %v3438_v23  ;;  %v2902_v12 = vrot.slane %v2858_v53, %v3438_v23  ;;  %v2914_v1 = vrot.slane %v2857_v50, %v3450_v57 }
 0x389   :  { %v2871_v4 = vmul.f32 %v2866_v2, %v4733_v18  ;;  %v2872_v24 = vmul.f32 %v2870_v46, %v4733_v18  ;;  %v2887_v30 = vmul.f32 %v2882_v35, %v4753_v27  ;;  %v2888_v3 = vmul.f32 %v2886_v63, %v4753_v27  ;;  %v3216_v35 = vld [vmem:[%s4877_s0 + $0x8] sm:$0xff] }
 0x38a   :  { %v2903_v8 = vmul.f32 %v2898_v37, %v2893_v5  ;;  %v2904_v11 = vmul.f32 %v2902_v12, %v2893_v5  ;;  %v2918_v18 = vrot.slane %v2858_v53, %v3450_v57 }
 0x38b   :  { %v2874_v19 = vadd.f32 %v2872_v24, %v2850_v10  ;;  %v2873_v40 = vadd.f32 %v2871_v4, %v2849_v43 }
 0x38c   :  { %v2909_v29 = vpop.permute.xlu1 %2908 }
 0x38d   :  { %v2890_v14 = vadd.f32 %v2888_v3, %v2874_v19  ;;  %v2889_v22 = vadd.f32 %v2887_v30, %v2873_v40  ;;  %v2919_v34 = vmul.f32 %v2914_v1, %v2909_v29  ;;  %v2920_v59 = vmul.f32 %v2918_v18, %v2909_v29 }
 0x38f   :  { %v2905_v49 = vadd.f32 %v2903_v8, %v2889_v22  ;;  %v2906_v28 = vadd.f32 %v2904_v11, %v2890_v14 }
 0x390   :  { %v2924_v0 = vpop.permute.xlu1 %2923 }
 0x391   :  { %v2921_v52 = vadd.f32 %v2919_v34, %v2905_v49  ;;  %v2922_v44 = vadd.f32 %v2920_v59, %v2906_v28 }
 0x394   :  { %v2926_v58 = vpop.permute.xlu1 %2925 }
 0x395   :  { %v2927_v27 = vsel %vm771_vm7, %v2924_v0, %v2926_v58  ;;  %v2928_v26 = vsel %vm771_vm7, %v2926_v58, %v2924_v0 }
 0x396   :  { %v2929_v41 = vmul.f32 %v2927_v27, %v4476_v9  ;;  %v2930_v42 = vmul.f32 %v2928_v26, %v4479_v61 }
 0x398   :  { %v2938_v39 = vrot.slane %v2929_v41, %v3407_v54  ;;  %v2942_v16 = vrot.slane %v2930_v42, %v3407_v54  ;;  %v2954_v36 = vrot.slane %v2929_v41, %v3410_v55  ;;  %v2958_v7 = vrot.slane %v2930_v42, %v3410_v55  ;;  %v2965_v48 = vpop.permute.xlu1 %2964 }
 0x399   :  { %v2970_v9 = vrot.slane %v2929_v41, %v3438_v23  ;;  %v2974_v61 = vrot.slane %v2930_v42, %v3438_v23  ;;  %v2986_v54 = vrot.slane %v2929_v41, %v3450_v57  ;;  %v2990_v60 = vrot.slane %v2930_v42, %v3450_v57  ;;  %v5112_v57 = vld [vmem:[#allocation12_spill] sm:$0xff] }
 0x39a   :  { %v2943_v51 = vmul.f32 %v2938_v39, %v2933_v33  ;;  %v2944_v31 = vmul.f32 %v2942_v16, %v2933_v33  ;;  %v2959_v25 = vmul.f32 %v2954_v36, %v2949_v62  ;;  %v2960_v13 = vmul.f32 %v2958_v7, %v2949_v62 }
 0x39b   :  { %v2975_v21 = vmul.f32 %v2970_v9, %v2965_v48  ;;  %v2976_v6 = vmul.f32 %v2974_v61, %v2965_v48 }
 0x39c   :  { %v2945_v15 = vadd.f32 %v2943_v51, %v2921_v52  ;;  %v2946_v38 = vadd.f32 %v2944_v31, %v2922_v44 }
 0x39d   :  { %v2981_v56 = vpop.permute.xlu1 %2980 }
 0x39e   :  { %v2961_v55 = vadd.f32 %v2959_v25, %v2945_v15  ;;  %v2962_v45 = vadd.f32 %v2960_v13, %v2946_v38  ;;  %v2991_v50 = vmul.f32 %v2986_v54, %v2981_v56  ;;  %v2992_v53 = vmul.f32 %v2990_v60, %v2981_v56 }
 0x3a0   :  { %v2977_v32 = vadd.f32 %v2975_v21, %v2961_v55  ;;  %v2978_v17 = vadd.f32 %v2976_v6, %v2962_v45 }
 0x3a2   :  { %v2993_v20 = vadd.f32 %v2991_v50, %v2977_v32  ;;  %v2994_v23 = vadd.f32 %v2992_v53, %v2978_v17 }
 0x3a4   :  { %v3001_v2 = vadd.f32 %v2999_v47, %v2993_v20  ;;  %v3002_v46 = vadd.f32 %v2999_v47, %v2994_v23 }
 0x3a6   :  { %v3003_v63 = vadd.f32 %v3216_v35, %v3001_v2  ;;  %v3004_v5 = vadd.f32 %v3002_v46, %v5112_v57 }
 0x3a8   :  { %v3005_v43 = vmax.f32 %v3003_v63, 0.0  ;;  %v3006_v10 = vmax.f32 %v3004_v5, 0.0 }
 0x3aa   :  { %v3009_v4 = vcombine.low %v3005_v43, %v3006_v10 }
 0x3ac   :  { %3034 = vst [vmem:[%s4882_s6 + $0x8] sm:$0xff] %v3009_v4 }

</bundles_post_ra>
